<compile_context>
chip_gen: v7x
topology: tpu7x:2x2x1
jax: 0.10.0
libtpu: 0.0.40
codegen_flags: <defaults>
</compile_context>

<pallas_src>
import math

import jax
import jax.numpy as jnp
from jax.experimental import pallas as pl
from jax.experimental.pallas import tpu as pltpu

# ----------------------------- tiny "codet5" config -----------------------------
VOCAB = 128
D_MODEL = 32
N_HEADS = 4
D_KV = 8            # per-head dim (N_HEADS * D_KV == inner dim)
D_FF = 64
N_LAYERS = 2        # encoder layers == decoder layers
REL_BUCKETS = 8
REL_MAX_DIST = 16
EPS = 1e-6
PAD_ID = 0
DEC_START_ID = 0
NEG_INF = -1e9
INNER = N_HEADS * D_KV

VMEM = pltpu.MemorySpace.VMEM

# Row indices inside the packed LayerNorm-weight block.
LN_ENC1 = 0
LN_ENC2 = N_LAYERS
LN_ENC_F = 2 * N_LAYERS
LN_DEC1 = 2 * N_LAYERS + 1
LN_DEC2 = 3 * N_LAYERS + 1
LN_DEC3 = 4 * N_LAYERS + 1
LN_DEC_F = 5 * N_LAYERS + 1
N_LN_ROWS = 5 * N_LAYERS + 2


# ------------------------------- host-side packing -------------------------------
def _pack_rows(pieces, dtype):
    """Pack [(name, 2D array)] into one row-stacked slab (single entry DMA).

    Each piece is padded to the common lane width and to an 8-row (sublane)
    aligned offset; returns (slab, {name: (row_off, rows, cols)}).
    """
    width = max(int(a.shape[1]) for _, a in pieces)
    layout, chunks, off = {}, [], 0
    for name, arr in pieces:
        arr = arr.astype(dtype)
        r, c = int(arr.shape[0]), int(arr.shape[1])
        rp = -(-r // 8) * 8
        layout[name] = (off, r, c)
        chunks.append(jnp.pad(arr, ((0, rp - r), (0, width - c))))
        off += rp
    return jnp.concatenate(chunks, axis=0), layout


# --------------------------- the fused forward kernel ----------------------------
def _make_kernel(B, T_enc, T_dec, c_layout, w_layout):
    N_enc = B * T_enc
    N_dec = B * T_dec

    def kernel(labels_ref, c_ref, w_ref, logits_ref, loss_ref):
        def C(name):                       # f32 constants/activations slab
            off, r, c = c_layout[name]
            return c_ref[off:off + r, :c]

        def W(name):                       # bf16 weight slab
            off, r, c = w_layout[name]
            return w_ref[off:off + r, :c]

        def mm(x, w_bf):
            # bf16 MXU operands, f32 accumulation; elementwise math stays f32.
            return jnp.dot(x.astype(jnp.bfloat16), w_bf,
                           preferred_element_type=jnp.float32)

        ln_all = C("ln")                   # (N_LN_ROWS, D_MODEL) f32, loaded once

        def rmsnorm(x, row):
            # T5 LayerNorm: x / sqrt(mean(x^2) + eps) * w
            w = ln_all[row:row + 1, :]
            var = jnp.mean(x * x, axis=-1, keepdims=True)
            return x * jax.lax.rsqrt(var + EPS) * w

        # Hoisted attention helper constants (shared by every layer).
        sel_e, bdm_e, smat_e = C("sel_enc"), C("bdm_enc"), C("smat_enc")
        sel_d, bdm_d, smat_d = C("sel_dec"), C("bdm_dec"), C("smat_dec")

        def mha(q2, k2, v2, wo_bf, bias2d, sel, bdm, smat, Tq, Tk):
            """All heads at once; heads stay in the lane dimension.

            q2: (B*Tq, INNER); k2, v2: (B*Tk, INNER); bias2d: (B*Tq, H*Tk)
            sel : (B*H*Tk, B*Tk) static selector, row (b,h,k) <- source row (b,k)
            bdm : (B*H*Tk, INNER) head-block lane mask
            smat: (H*Tk, H*Tk)    within-head summation matrix (softmax denom)
            T5 attention has no 1/sqrt(d_kv) scaling.
            """
            HT = N_HEADS * Tk
            # Head-block-diagonal K / V: row (b,h,k) holds token (b,k)'s k/v,
            # nonzero only on head h's lanes -> one batched matmul covers all heads.
            kbd = (jnp.dot(sel, k2, preferred_element_type=jnp.float32)
                   * bdm).reshape(B, HT, INNER)
            vbd = (jnp.dot(sel, v2, preferred_element_type=jnp.float32)
                   * bdm).reshape(B, HT, INNER)
            q3 = q2.reshape(B, Tq, INNER)
            s = jnp.einsum('bqi,bji->bqj', q3, kbd,
                           preferred_element_type=jnp.float32)
            s2 = s.reshape(B * Tq, HT) + bias2d
            m = jnp.max(s2, axis=-1, keepdims=True)      # shared max across heads
            p = jnp.exp(s2 - m)
            denom = jnp.dot(p, smat, preferred_element_type=jnp.float32)
            p = p / denom                                 # exact softmax division
            ctx = jnp.einsum('bqj,bji->bqi', p.reshape(B, Tq, HT), vbd,
                             preferred_element_type=jnp.float32)
            return mm(ctx.reshape(B * Tq, INNER), wo_bf)

        # --------------------------------- encoder ---------------------------------
        x = C("x_enc")                                    # (B*T_enc, D)
        enc_bias = C("enc_bias")                          # rel-pos + padding mask
        for l in range(N_LAYERS):
            h = rmsnorm(x, LN_ENC1 + l)
            qkv = mm(h, W(f"enc_wqkv_{l}"))               # fused (D, 3*INNER)
            x = x + mha(qkv[:, :INNER], qkv[:, INNER:2 * INNER], qkv[:, 2 * INNER:],
                        W(f"enc_wo_{l}"), enc_bias, sel_e, bdm_e, smat_e,
                        T_enc, T_enc)
            h = rmsnorm(x, LN_ENC2 + l)
            ff = jnp.maximum(mm(h, W(f"enc_wi_{l}")), 0.0)
            x = x + mm(ff, W(f"enc_wo_ff_{l}"))
        enc_out = rmsnorm(x, LN_ENC_F)                    # (B*T_enc, D)

        # Cross-attention K/V projections are loop-invariant over decoder layers:
        # project once with the layer-concatenated (D, L*2*INNER) weight.
        kv_all = mm(enc_out, W("dec_cwkv_all"))           # (B*T_enc, L*2*INNER)

        # --------------------------------- decoder ---------------------------------
        y = C("x_dec")                                    # (B*T_dec, D)
        dec_bias = C("dec_bias")                          # rel-pos + causal
        cross_bias = C("cross_bias")                      # encoder padding mask only
        for l in range(N_LAYERS):
            # causal self-attention
            h = rmsnorm(y, LN_DEC1 + l)
            qkv = mm(h, W(f"dec_wqkv_{l}"))
            y = y + mha(qkv[:, :INNER], qkv[:, INNER:2 * INNER], qkv[:, 2 * INNER:],
                        W(f"dec_wo_{l}"), dec_bias, sel_d, bdm_d, smat_d,
                        T_dec, T_dec)

            # cross-attention over the encoder output (hoisted K/V)
            h = rmsnorm(y, LN_DEC2 + l)
            q2 = mm(h, W(f"dec_cwq_{l}"))
            k2 = kv_all[:, 2 * INNER * l: 2 * INNER * l + INNER]
            v2 = kv_all[:, 2 * INNER * l + INNER: 2 * INNER * (l + 1)]
            y = y + mha(q2, k2, v2, W(f"dec_cwo_{l}"), cross_bias,
                        sel_e, bdm_e, smat_e, T_dec, T_enc)

            # FFN
            h = rmsnorm(y, LN_DEC3 + l)
            ff = jnp.maximum(mm(h, W(f"dec_wi_{l}")), 0.0)
            y = y + mm(ff, W(f"dec_wo_ff_{l}"))
        dec_out = rmsnorm(y, LN_DEC_F)                    # (B*T_dec, D)

        # ----------------------- tied LM head + cross entropy ----------------------
        seq = dec_out * (D_MODEL ** -0.5)                 # tied-embedding scaling
        logits = jax.lax.dot_general(                     # seq @ embed.T (no transpose op)
            seq.astype(jnp.bfloat16), W("embed"),
            (((1,), (1,)), ((), ())), preferred_element_type=jnp.float32)
        logits_ref[...] = logits                          # (B*T_dec, VOCAB)

        labels = labels_ref[...]                          # (B*T_dec, 1) int32
        m = jnp.max(logits, axis=-1, keepdims=True)
        lse = m + jnp.log(jnp.sum(jnp.exp(logits - m), axis=-1, keepdims=True))
        ids = jax.lax.broadcasted_iota(jnp.int32, (N_dec, VOCAB), 1)
        onehot = (ids == labels).astype(jnp.float32)
        tgt = jnp.sum(logits * onehot, axis=-1, keepdims=True)
        valid = (labels != -100).astype(jnp.float32)      # HF ignore_index=-100
        num = jnp.sum(valid * (lse - tgt), keepdims=True)       # (1,1)
        den = jnp.maximum(jnp.sum(valid, keepdims=True), 1.0)   # (1,1)
        loss_ref[...] = num / den

    return kernel


# ------------------------------- plain-JAX glue ----------------------------------
def _relative_position_bucket(relative_position, bidirectional, num_buckets, max_distance):
    relative_buckets = jnp.zeros_like(relative_position)
    if bidirectional:
        num_buckets //= 2
        relative_buckets += (relative_position > 0).astype(relative_position.dtype) * num_buckets
        relative_position = jnp.abs(relative_position)
    else:
        relative_position = -jnp.minimum(relative_position, jnp.zeros_like(relative_position))
    max_exact = num_buckets // 2
    is_small = relative_position < max_exact
    rel_if_large = max_exact + (
        jnp.log(relative_position.astype(jnp.float32) / max_exact + 1e-20)
        / math.log(max_distance / max_exact)
        * (num_buckets - max_exact)
    ).astype(relative_position.dtype)
    rel_if_large = jnp.minimum(rel_if_large, num_buckets - 1)
    relative_buckets += jnp.where(is_small, relative_position, rel_if_large)
    return relative_buckets


def compute_position_bias(q_len, k_len, rel_emb, bidirectional):
    ctx_pos = jnp.arange(q_len, dtype=jnp.int32)[:, None]
    mem_pos = jnp.arange(k_len, dtype=jnp.int32)[None, :]
    rel = mem_pos - ctx_pos
    buckets = _relative_position_bucket(rel, bidirectional, REL_BUCKETS, REL_MAX_DIST)
    values = rel_emb[buckets]                      # (q, k, H)
    return jnp.transpose(values, (2, 0, 1))        # compact (H, q, k)


def _attn_consts(B, Tk):
    """Static helper matrices for the all-head attention (built on host)."""
    HT = N_HEADS * Tk
    rows = jnp.arange(B * HT)
    r_b, r_hk = rows // HT, rows % HT
    r_h, r_k = r_hk // Tk, r_hk % Tk
    cols = jnp.arange(B * Tk)
    c_b, c_k = cols // Tk, cols % Tk
    sel = ((r_b[:, None] == c_b[None, :]) & (r_k[:, None] == c_k[None, :])).astype(jnp.float32)
    lane_h = jnp.arange(INNER) // D_KV
    bdm = (r_h[:, None] == lane_h[None, :]).astype(jnp.float32)
    hk = jnp.arange(HT) // Tk
    smat = (hk[:, None] == hk[None, :]).astype(jnp.float32)
    return sel, bdm, smat


def codet5_forward(params, input_ids, attention_mask, labels):
    """Mirrors T5ForConditionalGeneration.forward(input_ids, attention_mask, labels)."""
    B, T_dec = labels.shape
    T_enc = input_ids.shape[1]
    N_enc, N_dec = B * T_enc, B * T_dec

    # _shift_right: prepend decoder_start_token_id, drop last; replace -100 with pad.
    dec_input = jnp.concatenate(
        [jnp.full((B, 1), DEC_START_ID, labels.dtype), labels[:, :-1]], axis=1)
    dec_input = jnp.where(dec_input == -100, PAD_ID, dec_input)

    # Embedding lookups stay as plain-JAX gathers (tiny).
    x_enc = params["embed"][input_ids].reshape(N_enc, D_MODEL)
    x_dec = params["embed"][dec_input].reshape(N_dec, D_MODEL)

    # Biases pre-arranged to the kernel's (B*Tq, H*Tk) lane layout.
    enc_pos = compute_position_bias(T_enc, T_enc, params["enc_rel_bias"], True)   # (H,Tq,Tk)
    dec_pos = compute_position_bias(T_dec, T_dec, params["dec_rel_bias"], False)
    causal = jnp.where(jnp.arange(T_dec)[None, :] <= jnp.arange(T_dec)[:, None],
                       0.0, NEG_INF)
    mask_add = (1.0 - attention_mask.astype(jnp.float32)) * NEG_INF               # (B, T_enc)

    def to_qhk(pos):  # (H, Tq, Tk) -> (Tq, H*Tk)
        H_, Tq_, Tk_ = pos.shape
        return jnp.transpose(pos, (1, 0, 2)).reshape(Tq_, H_ * Tk_)

    mask_tiled = jnp.tile(mask_add, (1, N_HEADS))                                 # (B, H*T_enc)
    enc_bias = (to_qhk(enc_pos)[None] + mask_tiled[:, None, :]).reshape(
        N_enc, N_HEADS * T_enc)
    dec_bias = jnp.broadcast_to(to_qhk(dec_pos + causal[None])[None],
                                (B, T_dec, N_HEADS * T_dec)).reshape(
        N_dec, N_HEADS * T_dec)
    cross_bias = jnp.broadcast_to(mask_tiled[:, None, :],
                                  (B, T_dec, N_HEADS * T_enc)).reshape(
        N_dec, N_HEADS * T_enc)

    sel_e, bdm_e, smat_e = _attn_consts(B, T_enc)
    sel_d, bdm_d, smat_d = _attn_consts(B, T_dec)

    ln = jnp.concatenate([
        params["enc_ln1"].reshape(N_LAYERS, D_MODEL),
        params["enc_ln2"].reshape(N_LAYERS, D_MODEL),
        params["enc_final_ln"].reshape(1, D_MODEL),
        params["dec_ln1"].reshape(N_LAYERS, D_MODEL),
        params["dec_ln2"].reshape(N_LAYERS, D_MODEL),
        params["dec_ln3"].reshape(N_LAYERS, D_MODEL),
        params["dec_final_ln"].reshape(1, D_MODEL)], axis=0)                      # (N_LN_ROWS, D)

    # ----- pack inputs into 2 slabs (+ labels) => 3 entry DMAs instead of 25 -----
    c_pieces = [
        ("x_enc", x_enc), ("x_dec", x_dec),
        ("enc_bias", enc_bias), ("dec_bias", dec_bias), ("cross_bias", cross_bias),
        ("sel_enc", sel_e), ("bdm_enc", bdm_e), ("smat_enc", smat_e),
        ("sel_dec", sel_d), ("bdm_dec", bdm_d), ("smat_dec", smat_d),
        ("ln", ln),
    ]
    c_slab, c_layout = _pack_rows(c_pieces, jnp.float32)

    w_pieces = [("embed", params["embed"])]
    for l in range(N_LAYERS):
        w_pieces += [(f"enc_wqkv_{l}", params["enc_wqkv"][l]),
                     (f"enc_wo_{l}", params["enc_wo"][l]),
                     (f"enc_wi_{l}", params["enc_wi"][l]),
                     (f"enc_wo_ff_{l}", params["enc_wo_ff"][l])]
    for l in range(N_LAYERS):
        w_pieces += [(f"dec_wqkv_{l}", params["dec_wqkv"][l]),
                     (f"dec_wo_{l}", params["dec_wo"][l]),
                     (f"dec_cwq_{l}", params["dec_cross_wq"][l]),
                     (f"dec_cwo_{l}", params["dec_cross_wo"][l]),
                     (f"dec_wi_{l}", params["dec_wi"][l]),
                     (f"dec_wo_ff_{l}", params["dec_wo_ff"][l])]
    # Loop-invariant cross-attn K/V weights concatenated across layers -> (D, L*2*INNER)
    w_pieces.append(("dec_cwkv_all",
                     jnp.concatenate([params["dec_cross_wkv"][l]
                                      for l in range(N_LAYERS)], axis=-1)))
    w_slab, w_layout = _pack_rows(w_pieces, jnp.bfloat16)

    labels2d = labels.reshape(N_dec, 1).astype(jnp.int32)

    # --------------------------- advisory cost estimate ---------------------------
    def _fl(m, k, n):
        return 2 * m * k * n

    H_ = N_HEADS
    flops = 0
    for _ in range(N_LAYERS):
        flops += _fl(N_enc, D_MODEL, 3 * INNER) + _fl(N_enc, INNER, D_MODEL)
        flops += 2 * _fl(B * H_ * T_enc, N_enc, INNER)
        flops += (_fl(N_enc, INNER, H_ * T_enc) + _fl(N_enc, H_ * T_enc, H_ * T_enc)
                  + _fl(N_enc, H_ * T_enc, INNER))
        flops += _fl(N_enc, D_MODEL, D_FF) + _fl(N_enc, D_FF, D_MODEL)
        flops += _fl(N_dec, D_MODEL, 3 * INNER) + 2 * _fl(N_dec, INNER, D_MODEL)
        flops += _fl(N_dec, D_MODEL, INNER)
        flops += 2 * _fl(B * H_ * T_dec, N_dec, INNER) + 2 * _fl(B * H_ * T_enc, N_enc, INNER)
        flops += (_fl(N_dec, INNER, H_ * T_dec) + _fl(N_dec, H_ * T_dec, H_ * T_dec)
                  + _fl(N_dec, H_ * T_dec, INNER))
        flops += (_fl(N_dec, INNER, H_ * T_enc) + _fl(N_dec, H_ * T_enc, H_ * T_enc)
                  + _fl(N_dec, H_ * T_enc, INNER))
        flops += _fl(N_dec, D_MODEL, D_FF) + _fl(N_dec, D_FF, D_MODEL)
    flops += _fl(N_enc, D_MODEL, N_LAYERS * 2 * INNER)   # hoisted cross K/V
    flops += _fl(N_dec, D_MODEL, VOCAB)                  # LM head
    transc = (N_LAYERS * (N_enc * H_ * T_enc + N_dec * H_ * (T_dec + T_enc))
              + N_dec * VOCAB)
    bytes_acc = (labels2d.size * 4 + c_slab.size * 4 + w_slab.size * 2
                 + N_dec * VOCAB * 4 + 4)
    cost = pl.CostEstimate(flops=int(flops), transcendentals=int(transc),
                           bytes_accessed=int(bytes_acc))

    # ------------------------------ single fused call ------------------------------
    # No grid: everything (~300 KB) is VMEM-resident for one invocation.
    # TODO(synk): at real codet5-base sizes this would need a grid over decoder-token
    # tiles (logits alone would blow v7x's 64 MiB VMEM) and per-layer weight streaming.
    logits, loss = pl.pallas_call(
        _make_kernel(B, T_enc, T_dec, c_layout, w_layout),
        out_shape=(jax.ShapeDtypeStruct((N_dec, VOCAB), jnp.float32),
                   jax.ShapeDtypeStruct((1, 1), jnp.float32)),
        in_specs=[pl.BlockSpec(memory_space=VMEM)] * 3,
        out_specs=(pl.BlockSpec(memory_space=VMEM),
                   pl.BlockSpec(memory_space=VMEM)),
        cost_estimate=cost,
    )(labels2d, c_slab, w_slab)

    return {"loss": loss[0, 0], "logits": logits.reshape(B, T_dec, VOCAB)}


# ------------------------------ deterministic init --------------------------------
def init_params(key):
    keys = iter(jax.random.split(key, 64))

    def nrm(shape, scale):
        return scale * jax.random.normal(next(keys), shape, dtype=jnp.float32)

    def qkv_stack():
        wq = nrm((N_LAYERS, D_MODEL, INNER), D_MODEL ** -0.5)
        wk = nrm((N_LAYERS, D_MODEL, INNER), D_MODEL ** -0.5)
        wv = nrm((N_LAYERS, D_MODEL, INNER), D_MODEL ** -0.5)
        return jnp.concatenate([wq, wk, wv], axis=-1)     # fused (L, D, 3*INNER)

    def ln_stack():
        return jnp.ones((N_LAYERS, 1, D_MODEL), jnp.float32)

    return dict(
        embed=nrm((VOCAB, D_MODEL), 1.0),
        enc_rel_bias=nrm((REL_BUCKETS, N_HEADS), 0.1),
        dec_rel_bias=nrm((REL_BUCKETS, N_HEADS), 0.1),
        # encoder (weights stacked over layers, fused QKV)
        enc_ln1=ln_stack(), enc_ln2=ln_stack(),
        enc_wqkv=qkv_stack(),
        enc_wo=nrm((N_LAYERS, INNER, D_MODEL), INNER ** -0.5),
        enc_wi=nrm((N_LAYERS, D_MODEL, D_FF), D_MODEL ** -0.5),
        enc_wo_ff=nrm((N_LAYERS, D_FF, D_MODEL), D_FF ** -0.5),
        enc_final_ln=jnp.ones((1, D_MODEL), jnp.float32),
        # decoder
        dec_ln1=ln_stack(), dec_ln2=ln_stack(), dec_ln3=ln_stack(),
        dec_wqkv=qkv_stack(),
        dec_wo=nrm((N_LAYERS, INNER, D_MODEL), INNER ** -0.5),
        dec_cross_wq=nrm((N_LAYERS, D_MODEL, INNER), D_MODEL ** -0.5),
        dec_cross_wkv=jnp.concatenate(
            [nrm((N_LAYERS, D_MODEL, INNER), D_MODEL ** -0.5),
             nrm((N_LAYERS, D_MODEL, INNER), D_MODEL ** -0.5)], axis=-1),
        dec_cross_wo=nrm((N_LAYERS, INNER, D_MODEL), INNER ** -0.5),
        dec_wi=nrm((N_LAYERS, D_MODEL, D_FF), D_MODEL ** -0.5),
        dec_wo_ff=nrm((N_LAYERS, D_FF, D_MODEL), D_FF ** -0.5),
        dec_final_ln=jnp.ones((1, D_MODEL), jnp.float32),
    )


# ---------------------------------------- main ------------------------------------
if __name__ == "__main__":
    key = jax.random.PRNGKey(0)
    pkey, ikey, lkey = jax.random.split(key, 3)
    params = init_params(pkey)

    B, T_ENC, T_DEC = 2, 8, 8
    input_ids = jax.random.randint(ikey, (B, T_ENC), 1, VOCAB, dtype=jnp.int32)
    attention_mask = jnp.ones((B, T_ENC), dtype=jnp.int32)
    attention_mask = attention_mask.at[1, -2:].set(0)   # exercise the padding mask
    input_ids = jnp.where(attention_mask == 1, input_ids, PAD_ID)
    labels = jax.random.randint(lkey, (B, T_DEC), 1, VOCAB, dtype=jnp.int32)

    outputs = jax.jit(codet5_forward)(params, input_ids, attention_mask, labels)
    outputs = jax.block_until_ready(outputs)

    assert outputs["logits"].shape == (B, T_DEC, VOCAB)
    assert bool(jnp.isfinite(outputs["loss"]))
    assert bool(jnp.all(jnp.isfinite(outputs["logits"])))
    print("KERNEL_OK")
</pallas_src>

<mosaic_0001>
module attributes {stable_mosaic.version = 11 : i64} {
  func.func @kernel(%arg0: memref<16x1xi32, #tpu.memory_space<vmem>>, %arg1: memref<416x32xf32, #tpu.memory_space<vmem>>, %arg2: memref<928x128xbf16, #tpu.memory_space<vmem>>, %arg3: memref<16x128xf32, #tpu.memory_space<vmem>>, %arg4: memref<1x1xf32, #tpu.memory_space<vmem>>) attributes {dimension_semantics = [], scalar_prefetch = 0 : i64, scratch_operands = 0 : i64, tpu.core_type = #tpu.core_type<tc>} {
    %c400 = arith.constant 400 : index
    %c0 = arith.constant 0 : index
    %0 = vector.load %arg1[%c400, %c0] : memref<416x32xf32, #tpu.memory_space<vmem>>, vector<12x32xf32>
    %c80 = arith.constant 80 : index
    %c0_0 = arith.constant 0 : index
    %1 = vector.load %arg1[%c80, %c0_0] : memref<416x32xf32, #tpu.memory_space<vmem>>, vector<64x16xf32>
    %c144 = arith.constant 144 : index
    %c0_1 = arith.constant 0 : index
    %2 = vector.load %arg1[%c144, %c0_1] : memref<416x32xf32, #tpu.memory_space<vmem>>, vector<64x32xf32>
    %c208 = arith.constant 208 : index
    %c0_2 = arith.constant 0 : index
    %3 = vector.load %arg1[%c208, %c0_2] : memref<416x32xf32, #tpu.memory_space<vmem>>, vector<32x32xf32>
    %c240 = arith.constant 240 : index
    %c0_3 = arith.constant 0 : index
    %4 = vector.load %arg1[%c240, %c0_3] : memref<416x32xf32, #tpu.memory_space<vmem>>, vector<64x16xf32>
    %c304 = arith.constant 304 : index
    %c0_4 = arith.constant 0 : index
    %5 = vector.load %arg1[%c304, %c0_4] : memref<416x32xf32, #tpu.memory_space<vmem>>, vector<64x32xf32>
    %c368 = arith.constant 368 : index
    %c0_5 = arith.constant 0 : index
    %6 = vector.load %arg1[%c368, %c0_5] : memref<416x32xf32, #tpu.memory_space<vmem>>, vector<32x32xf32>
    %c0_6 = arith.constant 0 : index
    %c0_7 = arith.constant 0 : index
    %7 = vector.load %arg1[%c0_6, %c0_7] : memref<416x32xf32, #tpu.memory_space<vmem>>, vector<16x32xf32>
    %c32 = arith.constant 32 : index
    %c0_8 = arith.constant 0 : index
    %8 = vector.load %arg1[%c32, %c0_8] : memref<416x32xf32, #tpu.memory_space<vmem>>, vector<16x32xf32>
    %9 = vector.extract_strided_slice %0 {offsets = [0, 0], sizes = [1, 32], strides = [1, 1]} : vector<12x32xf32> to vector<1x32xf32>
    %10 = arith.mulf %7, %7 : vector<16x32xf32>
    %cst = arith.constant dense<0.000000e+00> : vector<16xf32>
    %11 = vector.multi_reduction <add>, %10, %cst [1] : vector<16x32xf32> to vector<16xf32>
    %12 = vector.shape_cast %11 : vector<16xf32> to vector<16x1xf32>
    %cst_9 = arith.constant 3.200000e+01 : f32
    %13 = vector.broadcast %cst_9 : f32 to vector<16x1xf32>
    %14 = arith.divf %12, %13 : vector<16x1xf32>
    %cst_10 = arith.constant 9.99999997E-7 : f32
    %15 = vector.broadcast %cst_10 : f32 to vector<16x1xf32>
    %16 = arith.addf %14, %15 : vector<16x1xf32>
    %17 = math.rsqrt %16 : vector<16x1xf32>
    %18 = vector.broadcast %17 : vector<16x1xf32> to vector<16x32xf32>
    %19 = arith.mulf %7, %18 : vector<16x32xf32>
    %20 = vector.broadcast %9 : vector<1x32xf32> to vector<16x32xf32>
    %21 = arith.mulf %19, %20 : vector<16x32xf32>
    %c128 = arith.constant 128 : index
    %c0_11 = arith.constant 0 : index
    %22 = vector.load %arg2[%c128, %c0_11] : memref<928x128xbf16, #tpu.memory_space<vmem>>, vector<32x96xbf16>
    %23 = arith.truncf %21 : vector<16x32xf32> to vector<16x32xbf16>
    %cst_12 = arith.constant dense<0.000000e+00> : vector<16x96xf32>
    %24 = tpu.matmul %23, %22, %cst_12 {dimension_numbers = #tpu.dot_dimension_numbers<[1], [0], [0], [1], [0, 0, 1, 1], [], []>} : vector<16x32xbf16>, vector<32x96xbf16>, vector<16x96xf32> -> vector<16x96xf32>
    %25 = vector.extract_strided_slice %24 {offsets = [0, 0], sizes = [16, 32], strides = [1, 1]} : vector<16x96xf32> to vector<16x32xf32>
    %26 = vector.extract_strided_slice %24 {offsets = [0, 32], sizes = [16, 32], strides = [1, 1]} : vector<16x96xf32> to vector<16x32xf32>
    %27 = vector.extract_strided_slice %24 {offsets = [0, 64], sizes = [16, 32], strides = [1, 1]} : vector<16x96xf32> to vector<16x32xf32>
    %c160 = arith.constant 160 : index
    %c0_13 = arith.constant 0 : index
    %28 = vector.load %arg2[%c160, %c0_13] : memref<928x128xbf16, #tpu.memory_space<vmem>>, vector<32x32xbf16>
    %cst_14 = arith.constant dense<0.000000e+00> : vector<64x32xf32>
    %29 = tpu.matmul %1, %26, %cst_14 {dimension_numbers = #tpu.dot_dimension_numbers<[1], [0], [0], [1], [0, 0, 1, 1], [], []>} : vector<64x16xf32>, vector<16x32xf32>, vector<64x32xf32> -> vector<64x32xf32>
    %30 = arith.mulf %29, %2 : vector<64x32xf32>
    %31 = vector.shape_cast %30 : vector<64x32xf32> to vector<2x32x32xf32>
    %cst_15 = arith.constant dense<0.000000e+00> : vector<64x32xf32>
    %32 = tpu.matmul %1, %27, %cst_15 {dimension_numbers = #tpu.dot_dimension_numbers<[1], [0], [0], [1], [0, 0, 1, 1], [], []>} : vector<64x16xf32>, vector<16x32xf32>, vector<64x32xf32> -> vector<64x32xf32>
    %33 = arith.mulf %32, %2 : vector<64x32xf32>
    %34 = vector.shape_cast %33 : vector<64x32xf32> to vector<2x32x32xf32>
    %35 = vector.shape_cast %25 : vector<16x32xf32> to vector<2x8x32xf32>
    "tpu.trace_start"() <{level = 10 : i32, message = "bqi,bji->bqj"}> : () -> ()
    %cst_16 = arith.constant dense<0.000000e+00> : vector<2x8x32xf32>
    %36 = tpu.matmul %35, %31, %cst_16 {dimension_numbers = #tpu.dot_dimension_numbers<[2], [2], [1], [1], [0, 0, 0, 1, 1, 1], [0], [0]>} : vector<2x8x32xf32>, vector<2x32x32xf32>, vector<2x8x32xf32> -> vector<2x8x32xf32>
    "tpu.trace_stop"() : () -> ()
    %37 = vector.shape_cast %36 : vector<2x8x32xf32> to vector<16x32xf32>
    %38 = arith.addf %37, %8 : vector<16x32xf32>
    %cst_17 = arith.constant dense<0xFF800000> : vector<16xf32>
    %39 = vector.multi_reduction <maximumf>, %38, %cst_17 [1] : vector<16x32xf32> to vector<16xf32>
    %40 = vector.shape_cast %39 : vector<16xf32> to vector<16x1xf32>
    %41 = vector.broadcast %40 : vector<16x1xf32> to vector<16x32xf32>
    %42 = arith.subf %38, %41 : vector<16x32xf32>
    %43 = math.exp %42 : vector<16x32xf32>
    %cst_18 = arith.constant dense<0.000000e+00> : vector<16x32xf32>
    %44 = tpu.matmul %43, %3, %cst_18 {dimension_numbers = #tpu.dot_dimension_numbers<[1], [0], [0], [1], [0, 0, 1, 1], [], []>} : vector<16x32xf32>, vector<32x32xf32>, vector<16x32xf32> -> vector<16x32xf32>
    %45 = arith.divf %43, %44 : vector<16x32xf32>
    %46 = vector.shape_cast %45 : vector<16x32xf32> to vector<2x8x32xf32>
    "tpu.trace_start"() <{level = 10 : i32, message = "bqj,bji->bqi"}> : () -> ()
    %cst_19 = arith.constant dense<0.000000e+00> : vector<2x8x32xf32>
    %47 = tpu.matmul %46, %34, %cst_19 {dimension_numbers = #tpu.dot_dimension_numbers<[2], [1], [1], [2], [0, 0, 0, 1, 1, 2], [0], [0]>} : vector<2x8x32xf32>, vector<2x32x32xf32>, vector<2x8x32xf32> -> vector<2x8x32xf32>
    "tpu.trace_stop"() : () -> ()
    %48 = vector.shape_cast %47 : vector<2x8x32xf32> to vector<16x32xf32>
    %49 = arith.truncf %48 : vector<16x32xf32> to vector<16x32xbf16>
    %cst_20 = arith.constant dense<0.000000e+00> : vector<16x32xf32>
    %50 = tpu.matmul %49, %28, %cst_20 {dimension_numbers = #tpu.dot_dimension_numbers<[1], [0], [0], [1], [0, 0, 1, 1], [], []>} : vector<16x32xbf16>, vector<32x32xbf16>, vector<16x32xf32> -> vector<16x32xf32>
    %51 = arith.addf %7, %50 : vector<16x32xf32>
    %52 = vector.extract_strided_slice %0 {offsets = [2, 0], sizes = [1, 32], strides = [1, 1]} : vector<12x32xf32> to vector<1x32xf32>
    %53 = arith.mulf %51, %51 : vector<16x32xf32>
    %cst_21 = arith.constant dense<0.000000e+00> : vector<16xf32>
    %54 = vector.multi_reduction <add>, %53, %cst_21 [1] : vector<16x32xf32> to vector<16xf32>
    %55 = vector.shape_cast %54 : vector<16xf32> to vector<16x1xf32>
    %cst_22 = arith.constant 3.200000e+01 : f32
    %56 = vector.broadcast %cst_22 : f32 to vector<16x1xf32>
    %57 = arith.divf %55, %56 : vector<16x1xf32>
    %cst_23 = arith.constant 9.99999997E-7 : f32
    %58 = vector.broadcast %cst_23 : f32 to vector<16x1xf32>
    %59 = arith.addf %57, %58 : vector<16x1xf32>
    %60 = math.rsqrt %59 : vector<16x1xf32>
    %61 = vector.broadcast %60 : vector<16x1xf32> to vector<16x32xf32>
    %62 = arith.mulf %51, %61 : vector<16x32xf32>
    %63 = vector.broadcast %52 : vector<1x32xf32> to vector<16x32xf32>
    %64 = arith.mulf %62, %63 : vector<16x32xf32>
    %c192 = arith.constant 192 : index
    %c0_24 = arith.constant 0 : index
    %65 = vector.load %arg2[%c192, %c0_24] : memref<928x128xbf16, #tpu.memory_space<vmem>>, vector<32x64xbf16>
    %66 = arith.truncf %64 : vector<16x32xf32> to vector<16x32xbf16>
    %cst_25 = arith.constant dense<0.000000e+00> : vector<16x64xf32>
    %67 = tpu.matmul %66, %65, %cst_25 {dimension_numbers = #tpu.dot_dimension_numbers<[1], [0], [0], [1], [0, 0, 1, 1], [], []>} : vector<16x32xbf16>, vector<32x64xbf16>, vector<16x64xf32> -> vector<16x64xf32>
    %cst_26 = arith.constant 0.000000e+00 : f32
    %68 = vector.broadcast %cst_26 : f32 to vector<16x64xf32>
    %69 = arith.maximumf %67, %68 : vector<16x64xf32>
    %c224 = arith.constant 224 : index
    %c0_27 = arith.constant 0 : index
    %70 = vector.load %arg2[%c224, %c0_27] : memref<928x128xbf16, #tpu.memory_space<vmem>>, vector<64x32xbf16>
    %71 = arith.truncf %69 : vector<16x64xf32> to vector<16x64xbf16>
    %cst_28 = arith.constant dense<0.000000e+00> : vector<16x32xf32>
    %72 = tpu.matmul %71, %70, %cst_28 {dimension_numbers = #tpu.dot_dimension_numbers<[1], [0], [0], [1], [0, 0, 1, 1], [], []>} : vector<16x64xbf16>, vector<64x32xbf16>, vector<16x32xf32> -> vector<16x32xf32>
    %73 = arith.addf %51, %72 : vector<16x32xf32>
    %74 = vector.extract_strided_slice %0 {offsets = [1, 0], sizes = [1, 32], strides = [1, 1]} : vector<12x32xf32> to vector<1x32xf32>
    %75 = arith.mulf %73, %73 : vector<16x32xf32>
    %cst_29 = arith.constant dense<0.000000e+00> : vector<16xf32>
    %76 = vector.multi_reduction <add>, %75, %cst_29 [1] : vector<16x32xf32> to vector<16xf32>
    %77 = vector.shape_cast %76 : vector<16xf32> to vector<16x1xf32>
    %cst_30 = arith.constant 3.200000e+01 : f32
    %78 = vector.broadcast %cst_30 : f32 to vector<16x1xf32>
    %79 = arith.divf %77, %78 : vector<16x1xf32>
    %cst_31 = arith.constant 9.99999997E-7 : f32
    %80 = vector.broadcast %cst_31 : f32 to vector<16x1xf32>
    %81 = arith.addf %79, %80 : vector<16x1xf32>
    %82 = math.rsqrt %81 : vector<16x1xf32>
    %83 = vector.broadcast %82 : vector<16x1xf32> to vector<16x32xf32>
    %84 = arith.mulf %73, %83 : vector<16x32xf32>
    %85 = vector.broadcast %74 : vector<1x32xf32> to vector<16x32xf32>
    %86 = arith.mulf %84, %85 : vector<16x32xf32>
    %c288 = arith.constant 288 : index
    %c0_32 = arith.constant 0 : index
    %87 = vector.load %arg2[%c288, %c0_32] : memref<928x128xbf16, #tpu.memory_space<vmem>>, vector<32x96xbf16>
    %88 = arith.truncf %86 : vector<16x32xf32> to vector<16x32xbf16>
    %cst_33 = arith.constant dense<0.000000e+00> : vector<16x96xf32>
    %89 = tpu.matmul %88, %87, %cst_33 {dimension_numbers = #tpu.dot_dimension_numbers<[1], [0], [0], [1], [0, 0, 1, 1], [], []>} : vector<16x32xbf16>, vector<32x96xbf16>, vector<16x96xf32> -> vector<16x96xf32>
    %90 = vector.extract_strided_slice %89 {offsets = [0, 0], sizes = [16, 32], strides = [1, 1]} : vector<16x96xf32> to vector<16x32xf32>
    %91 = vector.extract_strided_slice %89 {offsets = [0, 32], sizes = [16, 32], strides = [1, 1]} : vector<16x96xf32> to vector<16x32xf32>
    %92 = vector.extract_strided_slice %89 {offsets = [0, 64], sizes = [16, 32], strides = [1, 1]} : vector<16x96xf32> to vector<16x32xf32>
    %c320 = arith.constant 320 : index
    %c0_34 = arith.constant 0 : index
    %93 = vector.load %arg2[%c320, %c0_34] : memref<928x128xbf16, #tpu.memory_space<vmem>>, vector<32x32xbf16>
    %cst_35 = arith.constant dense<0.000000e+00> : vector<64x32xf32>
    %94 = tpu.matmul %1, %91, %cst_35 {dimension_numbers = #tpu.dot_dimension_numbers<[1], [0], [0], [1], [0, 0, 1, 1], [], []>} : vector<64x16xf32>, vector<16x32xf32>, vector<64x32xf32> -> vector<64x32xf32>
    %95 = arith.mulf %94, %2 : vector<64x32xf32>
    %96 = vector.shape_cast %95 : vector<64x32xf32> to vector<2x32x32xf32>
    %cst_36 = arith.constant dense<0.000000e+00> : vector<64x32xf32>
    %97 = tpu.matmul %1, %92, %cst_36 {dimension_numbers = #tpu.dot_dimension_numbers<[1], [0], [0], [1], [0, 0, 1, 1], [], []>} : vector<64x16xf32>, vector<16x32xf32>, vector<64x32xf32> -> vector<64x32xf32>
    %98 = arith.mulf %97, %2 : vector<64x32xf32>
    %99 = vector.shape_cast %98 : vector<64x32xf32> to vector<2x32x32xf32>
    %100 = vector.shape_cast %90 : vector<16x32xf32> to vector<2x8x32xf32>
    "tpu.trace_start"() <{level = 10 : i32, message = "bqi,bji->bqj"}> : () -> ()
    %cst_37 = arith.constant dense<0.000000e+00> : vector<2x8x32xf32>
    %101 = tpu.matmul %100, %96, %cst_37 {dimension_numbers = #tpu.dot_dimension_numbers<[2], [2], [1], [1], [0, 0, 0, 1, 1, 1], [0], [0]>} : vector<2x8x32xf32>, vector<2x32x32xf32>, vector<2x8x32xf32> -> vector<2x8x32xf32>
    "tpu.trace_stop"() : () -> ()
    %102 = vector.shape_cast %101 : vector<2x8x32xf32> to vector<16x32xf32>
    %103 = arith.addf %102, %8 : vector<16x32xf32>
    %cst_38 = arith.constant dense<0xFF800000> : vector<16xf32>
    %104 = vector.multi_reduction <maximumf>, %103, %cst_38 [1] : vector<16x32xf32> to vector<16xf32>
    %105 = vector.shape_cast %104 : vector<16xf32> to vector<16x1xf32>
    %106 = vector.broadcast %105 : vector<16x1xf32> to vector<16x32xf32>
    %107 = arith.subf %103, %106 : vector<16x32xf32>
    %108 = math.exp %107 : vector<16x32xf32>
    %cst_39 = arith.constant dense<0.000000e+00> : vector<16x32xf32>
    %109 = tpu.matmul %108, %3, %cst_39 {dimension_numbers = #tpu.dot_dimension_numbers<[1], [0], [0], [1], [0, 0, 1, 1], [], []>} : vector<16x32xf32>, vector<32x32xf32>, vector<16x32xf32> -> vector<16x32xf32>
    %110 = arith.divf %108, %109 : vector<16x32xf32>
    %111 = vector.shape_cast %110 : vector<16x32xf32> to vector<2x8x32xf32>
    "tpu.trace_start"() <{level = 10 : i32, message = "bqj,bji->bqi"}> : () -> ()
    %cst_40 = arith.constant dense<0.000000e+00> : vector<2x8x32xf32>
    %112 = tpu.matmul %111, %99, %cst_40 {dimension_numbers = #tpu.dot_dimension_numbers<[2], [1], [1], [2], [0, 0, 0, 1, 1, 2], [0], [0]>} : vector<2x8x32xf32>, vector<2x32x32xf32>, vector<2x8x32xf32> -> vector<2x8x32xf32>
    "tpu.trace_stop"() : () -> ()
    %113 = vector.shape_cast %112 : vector<2x8x32xf32> to vector<16x32xf32>
    %114 = arith.truncf %113 : vector<16x32xf32> to vector<16x32xbf16>
    %cst_41 = arith.constant dense<0.000000e+00> : vector<16x32xf32>
    %115 = tpu.matmul %114, %93, %cst_41 {dimension_numbers = #tpu.dot_dimension_numbers<[1], [0], [0], [1], [0, 0, 1, 1], [], []>} : vector<16x32xbf16>, vector<32x32xbf16>, vector<16x32xf32> -> vector<16x32xf32>
    %116 = arith.addf %73, %115 : vector<16x32xf32>
    %117 = vector.extract_strided_slice %0 {offsets = [3, 0], sizes = [1, 32], strides = [1, 1]} : vector<12x32xf32> to vector<1x32xf32>
    %118 = arith.mulf %116, %116 : vector<16x32xf32>
    %cst_42 = arith.constant dense<0.000000e+00> : vector<16xf32>
    %119 = vector.multi_reduction <add>, %118, %cst_42 [1] : vector<16x32xf32> to vector<16xf32>
    %120 = vector.shape_cast %119 : vector<16xf32> to vector<16x1xf32>
    %cst_43 = arith.constant 3.200000e+01 : f32
    %121 = vector.broadcast %cst_43 : f32 to vector<16x1xf32>
    %122 = arith.divf %120, %121 : vector<16x1xf32>
    %cst_44 = arith.constant 9.99999997E-7 : f32
    %123 = vector.broadcast %cst_44 : f32 to vector<16x1xf32>
    %124 = arith.addf %122, %123 : vector<16x1xf32>
    %125 = math.rsqrt %124 : vector<16x1xf32>
    %126 = vector.broadcast %125 : vector<16x1xf32> to vector<16x32xf32>
    %127 = arith.mulf %116, %126 : vector<16x32xf32>
    %128 = vector.broadcast %117 : vector<1x32xf32> to vector<16x32xf32>
    %129 = arith.mulf %127, %128 : vector<16x32xf32>
    %c352 = arith.constant 352 : index
    %c0_45 = arith.constant 0 : index
    %130 = vector.load %arg2[%c352, %c0_45] : memref<928x128xbf16, #tpu.memory_space<vmem>>, vector<32x64xbf16>
    %131 = arith.truncf %129 : vector<16x32xf32> to vector<16x32xbf16>
    %cst_46 = arith.constant dense<0.000000e+00> : vector<16x64xf32>
    %132 = tpu.matmul %131, %130, %cst_46 {dimension_numbers = #tpu.dot_dimension_numbers<[1], [0], [0], [1], [0, 0, 1, 1], [], []>} : vector<16x32xbf16>, vector<32x64xbf16>, vector<16x64xf32> -> vector<16x64xf32>
    %cst_47 = arith.constant 0.000000e+00 : f32
    %133 = vector.broadcast %cst_47 : f32 to vector<16x64xf32>
    %134 = arith.maximumf %132, %133 : vector<16x64xf32>
    %c384 = arith.constant 384 : index
    %c0_48 = arith.constant 0 : index
    %135 = vector.load %arg2[%c384, %c0_48] : memref<928x128xbf16, #tpu.memory_space<vmem>>, vector<64x32xbf16>
    %136 = arith.truncf %134 : vector<16x64xf32> to vector<16x64xbf16>
    %cst_49 = arith.constant dense<0.000000e+00> : vector<16x32xf32>
    %137 = tpu.matmul %136, %135, %cst_49 {dimension_numbers = #tpu.dot_dimension_numbers<[1], [0], [0], [1], [0, 0, 1, 1], [], []>} : vector<16x64xbf16>, vector<64x32xbf16>, vector<16x32xf32> -> vector<16x32xf32>
    %138 = arith.addf %116, %137 : vector<16x32xf32>
    %139 = vector.extract_strided_slice %0 {offsets = [4, 0], sizes = [1, 32], strides = [1, 1]} : vector<12x32xf32> to vector<1x32xf32>
    %140 = arith.mulf %138, %138 : vector<16x32xf32>
    %cst_50 = arith.constant dense<0.000000e+00> : vector<16xf32>
    %141 = vector.multi_reduction <add>, %140, %cst_50 [1] : vector<16x32xf32> to vector<16xf32>
    %142 = vector.shape_cast %141 : vector<16xf32> to vector<16x1xf32>
    %cst_51 = arith.constant 3.200000e+01 : f32
    %143 = vector.broadcast %cst_51 : f32 to vector<16x1xf32>
    %144 = arith.divf %142, %143 : vector<16x1xf32>
    %cst_52 = arith.constant 9.99999997E-7 : f32
    %145 = vector.broadcast %cst_52 : f32 to vector<16x1xf32>
    %146 = arith.addf %144, %145 : vector<16x1xf32>
    %147 = math.rsqrt %146 : vector<16x1xf32>
    %148 = vector.broadcast %147 : vector<16x1xf32> to vector<16x32xf32>
    %149 = arith.mulf %138, %148 : vector<16x32xf32>
    %150 = vector.broadcast %139 : vector<1x32xf32> to vector<16x32xf32>
    %151 = arith.mulf %149, %150 : vector<16x32xf32>
    %c896 = arith.constant 896 : index
    %c0_53 = arith.constant 0 : index
    %152 = vector.load %arg2[%c896, %c0_53] : memref<928x128xbf16, #tpu.memory_space<vmem>>, vector<32x128xbf16>
    %153 = arith.truncf %151 : vector<16x32xf32> to vector<16x32xbf16>
    %cst_54 = arith.constant dense<0.000000e+00> : vector<16x128xf32>
    %154 = tpu.matmul %153, %152, %cst_54 {dimension_numbers = #tpu.dot_dimension_numbers<[1], [0], [0], [1], [0, 0, 1, 1], [], []>} : vector<16x32xbf16>, vector<32x128xbf16>, vector<16x128xf32> -> vector<16x128xf32>
    %c16 = arith.constant 16 : index
    %c0_55 = arith.constant 0 : index
    %155 = vector.load %arg1[%c16, %c0_55] : memref<416x32xf32, #tpu.memory_space<vmem>>, vector<16x32xf32>
    %c48 = arith.constant 48 : index
    %c0_56 = arith.constant 0 : index
    %156 = vector.load %arg1[%c48, %c0_56] : memref<416x32xf32, #tpu.memory_space<vmem>>, vector<16x32xf32>
    %c64 = arith.constant 64 : index
    %c0_57 = arith.constant 0 : index
    %157 = vector.load %arg1[%c64, %c0_57] : memref<416x32xf32, #tpu.memory_space<vmem>>, vector<16x32xf32>
    %158 = vector.extract_strided_slice %0 {offsets = [5, 0], sizes = [1, 32], strides = [1, 1]} : vector<12x32xf32> to vector<1x32xf32>
    %159 = arith.mulf %155, %155 : vector<16x32xf32>
    %cst_58 = arith.constant dense<0.000000e+00> : vector<16xf32>
    %160 = vector.multi_reduction <add>, %159, %cst_58 [1] : vector<16x32xf32> to vector<16xf32>
    %161 = vector.shape_cast %160 : vector<16xf32> to vector<16x1xf32>
    %cst_59 = arith.constant 3.200000e+01 : f32
    %162 = vector.broadcast %cst_59 : f32 to vector<16x1xf32>
    %163 = arith.divf %161, %162 : vector<16x1xf32>
    %cst_60 = arith.constant 9.99999997E-7 : f32
    %164 = vector.broadcast %cst_60 : f32 to vector<16x1xf32>
    %165 = arith.addf %163, %164 : vector<16x1xf32>
    %166 = math.rsqrt %165 : vector<16x1xf32>
    %167 = vector.broadcast %166 : vector<16x1xf32> to vector<16x32xf32>
    %168 = arith.mulf %155, %167 : vector<16x32xf32>
    %169 = vector.broadcast %158 : vector<1x32xf32> to vector<16x32xf32>
    %170 = arith.mulf %168, %169 : vector<16x32xf32>
    %c448 = arith.constant 448 : index
    %c0_61 = arith.constant 0 : index
    %171 = vector.load %arg2[%c448, %c0_61] : memref<928x128xbf16, #tpu.memory_space<vmem>>, vector<32x96xbf16>
    %172 = arith.truncf %170 : vector<16x32xf32> to vector<16x32xbf16>
    %cst_62 = arith.constant dense<0.000000e+00> : vector<16x96xf32>
    %173 = tpu.matmul %172, %171, %cst_62 {dimension_numbers = #tpu.dot_dimension_numbers<[1], [0], [0], [1], [0, 0, 1, 1], [], []>} : vector<16x32xbf16>, vector<32x96xbf16>, vector<16x96xf32> -> vector<16x96xf32>
    %174 = vector.extract_strided_slice %173 {offsets = [0, 0], sizes = [16, 32], strides = [1, 1]} : vector<16x96xf32> to vector<16x32xf32>
    %175 = vector.extract_strided_slice %173 {offsets = [0, 32], sizes = [16, 32], strides = [1, 1]} : vector<16x96xf32> to vector<16x32xf32>
    %176 = vector.extract_strided_slice %173 {offsets = [0, 64], sizes = [16, 32], strides = [1, 1]} : vector<16x96xf32> to vector<16x32xf32>
    %c480 = arith.constant 480 : index
    %c0_63 = arith.constant 0 : index
    %177 = vector.load %arg2[%c480, %c0_63] : memref<928x128xbf16, #tpu.memory_space<vmem>>, vector<32x32xbf16>
    %cst_64 = arith.constant dense<0.000000e+00> : vector<64x32xf32>
    %178 = tpu.matmul %4, %175, %cst_64 {dimension_numbers = #tpu.dot_dimension_numbers<[1], [0], [0], [1], [0, 0, 1, 1], [], []>} : vector<64x16xf32>, vector<16x32xf32>, vector<64x32xf32> -> vector<64x32xf32>
    %179 = arith.mulf %178, %5 : vector<64x32xf32>
    %180 = vector.shape_cast %179 : vector<64x32xf32> to vector<2x32x32xf32>
    %cst_65 = arith.constant dense<0.000000e+00> : vector<64x32xf32>
    %181 = tpu.matmul %4, %176, %cst_65 {dimension_numbers = #tpu.dot_dimension_numbers<[1], [0], [0], [1], [0, 0, 1, 1], [], []>} : vector<64x16xf32>, vector<16x32xf32>, vector<64x32xf32> -> vector<64x32xf32>
    %182 = arith.mulf %181, %5 : vector<64x32xf32>
    %183 = vector.shape_cast %182 : vector<64x32xf32> to vector<2x32x32xf32>
    %184 = vector.shape_cast %174 : vector<16x32xf32> to vector<2x8x32xf32>
    "tpu.trace_start"() <{level = 10 : i32, message = "bqi,bji->bqj"}> : () -> ()
    %cst_66 = arith.constant dense<0.000000e+00> : vector<2x8x32xf32>
    %185 = tpu.matmul %184, %180, %cst_66 {dimension_numbers = #tpu.dot_dimension_numbers<[2], [2], [1], [1], [0, 0, 0, 1, 1, 1], [0], [0]>} : vector<2x8x32xf32>, vector<2x32x32xf32>, vector<2x8x32xf32> -> vector<2x8x32xf32>
    "tpu.trace_stop"() : () -> ()
    %186 = vector.shape_cast %185 : vector<2x8x32xf32> to vector<16x32xf32>
    %187 = arith.addf %186, %156 : vector<16x32xf32>
    %cst_67 = arith.constant dense<0xFF800000> : vector<16xf32>
    %188 = vector.multi_reduction <maximumf>, %187, %cst_67 [1] : vector<16x32xf32> to vector<16xf32>
    %189 = vector.shape_cast %188 : vector<16xf32> to vector<16x1xf32>
    %190 = vector.broadcast %189 : vector<16x1xf32> to vector<16x32xf32>
    %191 = arith.subf %187, %190 : vector<16x32xf32>
    %192 = math.exp %191 : vector<16x32xf32>
    %cst_68 = arith.constant dense<0.000000e+00> : vector<16x32xf32>
    %193 = tpu.matmul %192, %6, %cst_68 {dimension_numbers = #tpu.dot_dimension_numbers<[1], [0], [0], [1], [0, 0, 1, 1], [], []>} : vector<16x32xf32>, vector<32x32xf32>, vector<16x32xf32> -> vector<16x32xf32>
    %194 = arith.divf %192, %193 : vector<16x32xf32>
    %195 = vector.shape_cast %194 : vector<16x32xf32> to vector<2x8x32xf32>
    "tpu.trace_start"() <{level = 10 : i32, message = "bqj,bji->bqi"}> : () -> ()
    %cst_69 = arith.constant dense<0.000000e+00> : vector<2x8x32xf32>
    %196 = tpu.matmul %195, %183, %cst_69 {dimension_numbers = #tpu.dot_dimension_numbers<[2], [1], [1], [2], [0, 0, 0, 1, 1, 2], [0], [0]>} : vector<2x8x32xf32>, vector<2x32x32xf32>, vector<2x8x32xf32> -> vector<2x8x32xf32>
    "tpu.trace_stop"() : () -> ()
    %197 = vector.shape_cast %196 : vector<2x8x32xf32> to vector<16x32xf32>
    %198 = arith.truncf %197 : vector<16x32xf32> to vector<16x32xbf16>
    %cst_70 = arith.constant dense<0.000000e+00> : vector<16x32xf32>
    %199 = tpu.matmul %198, %177, %cst_70 {dimension_numbers = #tpu.dot_dimension_numbers<[1], [0], [0], [1], [0, 0, 1, 1], [], []>} : vector<16x32xbf16>, vector<32x32xbf16>, vector<16x32xf32> -> vector<16x32xf32>
    %200 = arith.addf %155, %199 : vector<16x32xf32>
    %201 = vector.extract_strided_slice %0 {offsets = [7, 0], sizes = [1, 32], strides = [1, 1]} : vector<12x32xf32> to vector<1x32xf32>
    %202 = arith.mulf %200, %200 : vector<16x32xf32>
    %cst_71 = arith.constant dense<0.000000e+00> : vector<16xf32>
    %203 = vector.multi_reduction <add>, %202, %cst_71 [1] : vector<16x32xf32> to vector<16xf32>
    %204 = vector.shape_cast %203 : vector<16xf32> to vector<16x1xf32>
    %cst_72 = arith.constant 3.200000e+01 : f32
    %205 = vector.broadcast %cst_72 : f32 to vector<16x1xf32>
    %206 = arith.divf %204, %205 : vector<16x1xf32>
    %cst_73 = arith.constant 9.99999997E-7 : f32
    %207 = vector.broadcast %cst_73 : f32 to vector<16x1xf32>
    %208 = arith.addf %206, %207 : vector<16x1xf32>
    %209 = math.rsqrt %208 : vector<16x1xf32>
    %210 = vector.broadcast %209 : vector<16x1xf32> to vector<16x32xf32>
    %211 = arith.mulf %200, %210 : vector<16x32xf32>
    %212 = vector.broadcast %201 : vector<1x32xf32> to vector<16x32xf32>
    %213 = arith.mulf %211, %212 : vector<16x32xf32>
    %c512 = arith.constant 512 : index
    %c0_74 = arith.constant 0 : index
    %214 = vector.load %arg2[%c512, %c0_74] : memref<928x128xbf16, #tpu.memory_space<vmem>>, vector<32x32xbf16>
    %215 = arith.truncf %213 : vector<16x32xf32> to vector<16x32xbf16>
    %cst_75 = arith.constant dense<0.000000e+00> : vector<16x32xf32>
    %216 = tpu.matmul %215, %214, %cst_75 {dimension_numbers = #tpu.dot_dimension_numbers<[1], [0], [0], [1], [0, 0, 1, 1], [], []>} : vector<16x32xbf16>, vector<32x32xbf16>, vector<16x32xf32> -> vector<16x32xf32>
    %217 = vector.extract_strided_slice %154 {offsets = [0, 0], sizes = [16, 32], strides = [1, 1]} : vector<16x128xf32> to vector<16x32xf32>
    %218 = vector.extract_strided_slice %154 {offsets = [0, 32], sizes = [16, 32], strides = [1, 1]} : vector<16x128xf32> to vector<16x32xf32>
    %c544 = arith.constant 544 : index
    %c0_76 = arith.constant 0 : index
    %219 = vector.load %arg2[%c544, %c0_76] : memref<928x128xbf16, #tpu.memory_space<vmem>>, vector<32x32xbf16>
    %cst_77 = arith.constant dense<0.000000e+00> : vector<64x32xf32>
    %220 = tpu.matmul %1, %217, %cst_77 {dimension_numbers = #tpu.dot_dimension_numbers<[1], [0], [0], [1], [0, 0, 1, 1], [], []>} : vector<64x16xf32>, vector<16x32xf32>, vector<64x32xf32> -> vector<64x32xf32>
    %221 = arith.mulf %220, %2 : vector<64x32xf32>
    %222 = vector.shape_cast %221 : vector<64x32xf32> to vector<2x32x32xf32>
    %cst_78 = arith.constant dense<0.000000e+00> : vector<64x32xf32>
    %223 = tpu.matmul %1, %218, %cst_78 {dimension_numbers = #tpu.dot_dimension_numbers<[1], [0], [0], [1], [0, 0, 1, 1], [], []>} : vector<64x16xf32>, vector<16x32xf32>, vector<64x32xf32> -> vector<64x32xf32>
    %224 = arith.mulf %223, %2 : vector<64x32xf32>
    %225 = vector.shape_cast %224 : vector<64x32xf32> to vector<2x32x32xf32>
    %226 = vector.shape_cast %216 : vector<16x32xf32> to vector<2x8x32xf32>
    "tpu.trace_start"() <{level = 10 : i32, message = "bqi,bji->bqj"}> : () -> ()
    %cst_79 = arith.constant dense<0.000000e+00> : vector<2x8x32xf32>
    %227 = tpu.matmul %226, %222, %cst_79 {dimension_numbers = #tpu.dot_dimension_numbers<[2], [2], [1], [1], [0, 0, 0, 1, 1, 1], [0], [0]>} : vector<2x8x32xf32>, vector<2x32x32xf32>, vector<2x8x32xf32> -> vector<2x8x32xf32>
    "tpu.trace_stop"() : () -> ()
    %228 = vector.shape_cast %227 : vector<2x8x32xf32> to vector<16x32xf32>
    %229 = arith.addf %228, %157 : vector<16x32xf32>
    %cst_80 = arith.constant dense<0xFF800000> : vector<16xf32>
    %230 = vector.multi_reduction <maximumf>, %229, %cst_80 [1] : vector<16x32xf32> to vector<16xf32>
    %231 = vector.shape_cast %230 : vector<16xf32> to vector<16x1xf32>
    %232 = vector.broadcast %231 : vector<16x1xf32> to vector<16x32xf32>
    %233 = arith.subf %229, %232 : vector<16x32xf32>
    %234 = math.exp %233 : vector<16x32xf32>
    %cst_81 = arith.constant dense<0.000000e+00> : vector<16x32xf32>
    %235 = tpu.matmul %234, %3, %cst_81 {dimension_numbers = #tpu.dot_dimension_numbers<[1], [0], [0], [1], [0, 0, 1, 1], [], []>} : vector<16x32xf32>, vector<32x32xf32>, vector<16x32xf32> -> vector<16x32xf32>
    %236 = arith.divf %234, %235 : vector<16x32xf32>
    %237 = vector.shape_cast %236 : vector<16x32xf32> to vector<2x8x32xf32>
    "tpu.trace_start"() <{level = 10 : i32, message = "bqj,bji->bqi"}> : () -> ()
    %cst_82 = arith.constant dense<0.000000e+00> : vector<2x8x32xf32>
    %238 = tpu.matmul %237, %225, %cst_82 {dimension_numbers = #tpu.dot_dimension_numbers<[2], [1], [1], [2], [0, 0, 0, 1, 1, 2], [0], [0]>} : vector<2x8x32xf32>, vector<2x32x32xf32>, vector<2x8x32xf32> -> vector<2x8x32xf32>
    "tpu.trace_stop"() : () -> ()
    %239 = vector.shape_cast %238 : vector<2x8x32xf32> to vector<16x32xf32>
    %240 = arith.truncf %239 : vector<16x32xf32> to vector<16x32xbf16>
    %cst_83 = arith.constant dense<0.000000e+00> : vector<16x32xf32>
    %241 = tpu.matmul %240, %219, %cst_83 {dimension_numbers = #tpu.dot_dimension_numbers<[1], [0], [0], [1], [0, 0, 1, 1], [], []>} : vector<16x32xbf16>, vector<32x32xbf16>, vector<16x32xf32> -> vector<16x32xf32>
    %242 = arith.addf %200, %241 : vector<16x32xf32>
    %243 = vector.extract_strided_slice %0 {offsets = [9, 0], sizes = [1, 32], strides = [1, 1]} : vector<12x32xf32> to vector<1x32xf32>
    %244 = arith.mulf %242, %242 : vector<16x32xf32>
    %cst_84 = arith.constant dense<0.000000e+00> : vector<16xf32>
    %245 = vector.multi_reduction <add>, %244, %cst_84 [1] : vector<16x32xf32> to vector<16xf32>
    %246 = vector.shape_cast %245 : vector<16xf32> to vector<16x1xf32>
    %cst_85 = arith.constant 3.200000e+01 : f32
    %247 = vector.broadcast %cst_85 : f32 to vector<16x1xf32>
    %248 = arith.divf %246, %247 : vector<16x1xf32>
    %cst_86 = arith.constant 9.99999997E-7 : f32
    %249 = vector.broadcast %cst_86 : f32 to vector<16x1xf32>
    %250 = arith.addf %248, %249 : vector<16x1xf32>
    %251 = math.rsqrt %250 : vector<16x1xf32>
    %252 = vector.broadcast %251 : vector<16x1xf32> to vector<16x32xf32>
    %253 = arith.mulf %242, %252 : vector<16x32xf32>
    %254 = vector.broadcast %243 : vector<1x32xf32> to vector<16x32xf32>
    %255 = arith.mulf %253, %254 : vector<16x32xf32>
    %c576 = arith.constant 576 : index
    %c0_87 = arith.constant 0 : index
    %256 = vector.load %arg2[%c576, %c0_87] : memref<928x128xbf16, #tpu.memory_space<vmem>>, vector<32x64xbf16>
    %257 = arith.truncf %255 : vector<16x32xf32> to vector<16x32xbf16>
    %cst_88 = arith.constant dense<0.000000e+00> : vector<16x64xf32>
    %258 = tpu.matmul %257, %256, %cst_88 {dimension_numbers = #tpu.dot_dimension_numbers<[1], [0], [0], [1], [0, 0, 1, 1], [], []>} : vector<16x32xbf16>, vector<32x64xbf16>, vector<16x64xf32> -> vector<16x64xf32>
    %cst_89 = arith.constant 0.000000e+00 : f32
    %259 = vector.broadcast %cst_89 : f32 to vector<16x64xf32>
    %260 = arith.maximumf %258, %259 : vector<16x64xf32>
    %c608 = arith.constant 608 : index
    %c0_90 = arith.constant 0 : index
    %261 = vector.load %arg2[%c608, %c0_90] : memref<928x128xbf16, #tpu.memory_space<vmem>>, vector<64x32xbf16>
    %262 = arith.truncf %260 : vector<16x64xf32> to vector<16x64xbf16>
    %cst_91 = arith.constant dense<0.000000e+00> : vector<16x32xf32>
    %263 = tpu.matmul %262, %261, %cst_91 {dimension_numbers = #tpu.dot_dimension_numbers<[1], [0], [0], [1], [0, 0, 1, 1], [], []>} : vector<16x64xbf16>, vector<64x32xbf16>, vector<16x32xf32> -> vector<16x32xf32>
    %264 = arith.addf %242, %263 : vector<16x32xf32>
    %265 = vector.extract_strided_slice %0 {offsets = [6, 0], sizes = [1, 32], strides = [1, 1]} : vector<12x32xf32> to vector<1x32xf32>
    %266 = arith.mulf %264, %264 : vector<16x32xf32>
    %cst_92 = arith.constant dense<0.000000e+00> : vector<16xf32>
    %267 = vector.multi_reduction <add>, %266, %cst_92 [1] : vector<16x32xf32> to vector<16xf32>
    %268 = vector.shape_cast %267 : vector<16xf32> to vector<16x1xf32>
    %cst_93 = arith.constant 3.200000e+01 : f32
    %269 = vector.broadcast %cst_93 : f32 to vector<16x1xf32>
    %270 = arith.divf %268, %269 : vector<16x1xf32>
    %cst_94 = arith.constant 9.99999997E-7 : f32
    %271 = vector.broadcast %cst_94 : f32 to vector<16x1xf32>
    %272 = arith.addf %270, %271 : vector<16x1xf32>
    %273 = math.rsqrt %272 : vector<16x1xf32>
    %274 = vector.broadcast %273 : vector<16x1xf32> to vector<16x32xf32>
    %275 = arith.mulf %264, %274 : vector<16x32xf32>
    %276 = vector.broadcast %265 : vector<1x32xf32> to vector<16x32xf32>
    %277 = arith.mulf %275, %276 : vector<16x32xf32>
    %c672 = arith.constant 672 : index
    %c0_95 = arith.constant 0 : index
    %278 = vector.load %arg2[%c672, %c0_95] : memref<928x128xbf16, #tpu.memory_space<vmem>>, vector<32x96xbf16>
    %279 = arith.truncf %277 : vector<16x32xf32> to vector<16x32xbf16>
    %cst_96 = arith.constant dense<0.000000e+00> : vector<16x96xf32>
    %280 = tpu.matmul %279, %278, %cst_96 {dimension_numbers = #tpu.dot_dimension_numbers<[1], [0], [0], [1], [0, 0, 1, 1], [], []>} : vector<16x32xbf16>, vector<32x96xbf16>, vector<16x96xf32> -> vector<16x96xf32>
    %281 = vector.extract_strided_slice %280 {offsets = [0, 0], sizes = [16, 32], strides = [1, 1]} : vector<16x96xf32> to vector<16x32xf32>
    %282 = vector.extract_strided_slice %280 {offsets = [0, 32], sizes = [16, 32], strides = [1, 1]} : vector<16x96xf32> to vector<16x32xf32>
    %283 = vector.extract_strided_slice %280 {offsets = [0, 64], sizes = [16, 32], strides = [1, 1]} : vector<16x96xf32> to vector<16x32xf32>
    %c704 = arith.constant 704 : index
    %c0_97 = arith.constant 0 : index
    %284 = vector.load %arg2[%c704, %c0_97] : memref<928x128xbf16, #tpu.memory_space<vmem>>, vector<32x32xbf16>
    %cst_98 = arith.constant dense<0.000000e+00> : vector<64x32xf32>
    %285 = tpu.matmul %4, %282, %cst_98 {dimension_numbers = #tpu.dot_dimension_numbers<[1], [0], [0], [1], [0, 0, 1, 1], [], []>} : vector<64x16xf32>, vector<16x32xf32>, vector<64x32xf32> -> vector<64x32xf32>
    %286 = arith.mulf %285, %5 : vector<64x32xf32>
    %287 = vector.shape_cast %286 : vector<64x32xf32> to vector<2x32x32xf32>
    %cst_99 = arith.constant dense<0.000000e+00> : vector<64x32xf32>
    %288 = tpu.matmul %4, %283, %cst_99 {dimension_numbers = #tpu.dot_dimension_numbers<[1], [0], [0], [1], [0, 0, 1, 1], [], []>} : vector<64x16xf32>, vector<16x32xf32>, vector<64x32xf32> -> vector<64x32xf32>
    %289 = arith.mulf %288, %5 : vector<64x32xf32>
    %290 = vector.shape_cast %289 : vector<64x32xf32> to vector<2x32x32xf32>
    %291 = vector.shape_cast %281 : vector<16x32xf32> to vector<2x8x32xf32>
    "tpu.trace_start"() <{level = 10 : i32, message = "bqi,bji->bqj"}> : () -> ()
    %cst_100 = arith.constant dense<0.000000e+00> : vector<2x8x32xf32>
    %292 = tpu.matmul %291, %287, %cst_100 {dimension_numbers = #tpu.dot_dimension_numbers<[2], [2], [1], [1], [0, 0, 0, 1, 1, 1], [0], [0]>} : vector<2x8x32xf32>, vector<2x32x32xf32>, vector<2x8x32xf32> -> vector<2x8x32xf32>
    "tpu.trace_stop"() : () -> ()
    %293 = vector.shape_cast %292 : vector<2x8x32xf32> to vector<16x32xf32>
    %294 = arith.addf %293, %156 : vector<16x32xf32>
    %cst_101 = arith.constant dense<0xFF800000> : vector<16xf32>
    %295 = vector.multi_reduction <maximumf>, %294, %cst_101 [1] : vector<16x32xf32> to vector<16xf32>
    %296 = vector.shape_cast %295 : vector<16xf32> to vector<16x1xf32>
    %297 = vector.broadcast %296 : vector<16x1xf32> to vector<16x32xf32>
    %298 = arith.subf %294, %297 : vector<16x32xf32>
    %299 = math.exp %298 : vector<16x32xf32>
    %cst_102 = arith.constant dense<0.000000e+00> : vector<16x32xf32>
    %300 = tpu.matmul %299, %6, %cst_102 {dimension_numbers = #tpu.dot_dimension_numbers<[1], [0], [0], [1], [0, 0, 1, 1], [], []>} : vector<16x32xf32>, vector<32x32xf32>, vector<16x32xf32> -> vector<16x32xf32>
    %301 = arith.divf %299, %300 : vector<16x32xf32>
    %302 = vector.shape_cast %301 : vector<16x32xf32> to vector<2x8x32xf32>
    "tpu.trace_start"() <{level = 10 : i32, message = "bqj,bji->bqi"}> : () -> ()
    %cst_103 = arith.constant dense<0.000000e+00> : vector<2x8x32xf32>
    %303 = tpu.matmul %302, %290, %cst_103 {dimension_numbers = #tpu.dot_dimension_numbers<[2], [1], [1], [2], [0, 0, 0, 1, 1, 2], [0], [0]>} : vector<2x8x32xf32>, vector<2x32x32xf32>, vector<2x8x32xf32> -> vector<2x8x32xf32>
    "tpu.trace_stop"() : () -> ()
    %304 = vector.shape_cast %303 : vector<2x8x32xf32> to vector<16x32xf32>
    %305 = arith.truncf %304 : vector<16x32xf32> to vector<16x32xbf16>
    %cst_104 = arith.constant dense<0.000000e+00> : vector<16x32xf32>
    %306 = tpu.matmul %305, %284, %cst_104 {dimension_numbers = #tpu.dot_dimension_numbers<[1], [0], [0], [1], [0, 0, 1, 1], [], []>} : vector<16x32xbf16>, vector<32x32xbf16>, vector<16x32xf32> -> vector<16x32xf32>
    %307 = arith.addf %264, %306 : vector<16x32xf32>
    %308 = vector.extract_strided_slice %0 {offsets = [8, 0], sizes = [1, 32], strides = [1, 1]} : vector<12x32xf32> to vector<1x32xf32>
    %309 = arith.mulf %307, %307 : vector<16x32xf32>
    %cst_105 = arith.constant dense<0.000000e+00> : vector<16xf32>
    %310 = vector.multi_reduction <add>, %309, %cst_105 [1] : vector<16x32xf32> to vector<16xf32>
    %311 = vector.shape_cast %310 : vector<16xf32> to vector<16x1xf32>
    %cst_106 = arith.constant 3.200000e+01 : f32
    %312 = vector.broadcast %cst_106 : f32 to vector<16x1xf32>
    %313 = arith.divf %311, %312 : vector<16x1xf32>
    %cst_107 = arith.constant 9.99999997E-7 : f32
    %314 = vector.broadcast %cst_107 : f32 to vector<16x1xf32>
    %315 = arith.addf %313, %314 : vector<16x1xf32>
    %316 = math.rsqrt %315 : vector<16x1xf32>
    %317 = vector.broadcast %316 : vector<16x1xf32> to vector<16x32xf32>
    %318 = arith.mulf %307, %317 : vector<16x32xf32>
    %319 = vector.broadcast %308 : vector<1x32xf32> to vector<16x32xf32>
    %320 = arith.mulf %318, %319 : vector<16x32xf32>
    %c736 = arith.constant 736 : index
    %c0_108 = arith.constant 0 : index
    %321 = vector.load %arg2[%c736, %c0_108] : memref<928x128xbf16, #tpu.memory_space<vmem>>, vector<32x32xbf16>
    %322 = arith.truncf %320 : vector<16x32xf32> to vector<16x32xbf16>
    %cst_109 = arith.constant dense<0.000000e+00> : vector<16x32xf32>
    %323 = tpu.matmul %322, %321, %cst_109 {dimension_numbers = #tpu.dot_dimension_numbers<[1], [0], [0], [1], [0, 0, 1, 1], [], []>} : vector<16x32xbf16>, vector<32x32xbf16>, vector<16x32xf32> -> vector<16x32xf32>
    %324 = vector.extract_strided_slice %154 {offsets = [0, 64], sizes = [16, 32], strides = [1, 1]} : vector<16x128xf32> to vector<16x32xf32>
    %325 = vector.extract_strided_slice %154 {offsets = [0, 96], sizes = [16, 32], strides = [1, 1]} : vector<16x128xf32> to vector<16x32xf32>
    %c768 = arith.constant 768 : index
    %c0_110 = arith.constant 0 : index
    %326 = vector.load %arg2[%c768, %c0_110] : memref<928x128xbf16, #tpu.memory_space<vmem>>, vector<32x32xbf16>
    %cst_111 = arith.constant dense<0.000000e+00> : vector<64x32xf32>
    %327 = tpu.matmul %1, %324, %cst_111 {dimension_numbers = #tpu.dot_dimension_numbers<[1], [0], [0], [1], [0, 0, 1, 1], [], []>} : vector<64x16xf32>, vector<16x32xf32>, vector<64x32xf32> -> vector<64x32xf32>
    %328 = arith.mulf %327, %2 : vector<64x32xf32>
    %329 = vector.shape_cast %328 : vector<64x32xf32> to vector<2x32x32xf32>
    %cst_112 = arith.constant dense<0.000000e+00> : vector<64x32xf32>
    %330 = tpu.matmul %1, %325, %cst_112 {dimension_numbers = #tpu.dot_dimension_numbers<[1], [0], [0], [1], [0, 0, 1, 1], [], []>} : vector<64x16xf32>, vector<16x32xf32>, vector<64x32xf32> -> vector<64x32xf32>
    %331 = arith.mulf %330, %2 : vector<64x32xf32>
    %332 = vector.shape_cast %331 : vector<64x32xf32> to vector<2x32x32xf32>
    %333 = vector.shape_cast %323 : vector<16x32xf32> to vector<2x8x32xf32>
    "tpu.trace_start"() <{level = 10 : i32, message = "bqi,bji->bqj"}> : () -> ()
    %cst_113 = arith.constant dense<0.000000e+00> : vector<2x8x32xf32>
    %334 = tpu.matmul %333, %329, %cst_113 {dimension_numbers = #tpu.dot_dimension_numbers<[2], [2], [1], [1], [0, 0, 0, 1, 1, 1], [0], [0]>} : vector<2x8x32xf32>, vector<2x32x32xf32>, vector<2x8x32xf32> -> vector<2x8x32xf32>
    "tpu.trace_stop"() : () -> ()
    %335 = vector.shape_cast %334 : vector<2x8x32xf32> to vector<16x32xf32>
    %336 = arith.addf %335, %157 : vector<16x32xf32>
    %cst_114 = arith.constant dense<0xFF800000> : vector<16xf32>
    %337 = vector.multi_reduction <maximumf>, %336, %cst_114 [1] : vector<16x32xf32> to vector<16xf32>
    %338 = vector.shape_cast %337 : vector<16xf32> to vector<16x1xf32>
    %339 = vector.broadcast %338 : vector<16x1xf32> to vector<16x32xf32>
    %340 = arith.subf %336, %339 : vector<16x32xf32>
    %341 = math.exp %340 : vector<16x32xf32>
    %cst_115 = arith.constant dense<0.000000e+00> : vector<16x32xf32>
    %342 = tpu.matmul %341, %3, %cst_115 {dimension_numbers = #tpu.dot_dimension_numbers<[1], [0], [0], [1], [0, 0, 1, 1], [], []>} : vector<16x32xf32>, vector<32x32xf32>, vector<16x32xf32> -> vector<16x32xf32>
    %343 = arith.divf %341, %342 : vector<16x32xf32>
    %344 = vector.shape_cast %343 : vector<16x32xf32> to vector<2x8x32xf32>
    "tpu.trace_start"() <{level = 10 : i32, message = "bqj,bji->bqi"}> : () -> ()
    %cst_116 = arith.constant dense<0.000000e+00> : vector<2x8x32xf32>
    %345 = tpu.matmul %344, %332, %cst_116 {dimension_numbers = #tpu.dot_dimension_numbers<[2], [1], [1], [2], [0, 0, 0, 1, 1, 2], [0], [0]>} : vector<2x8x32xf32>, vector<2x32x32xf32>, vector<2x8x32xf32> -> vector<2x8x32xf32>
    "tpu.trace_stop"() : () -> ()
    %346 = vector.shape_cast %345 : vector<2x8x32xf32> to vector<16x32xf32>
    %347 = arith.truncf %346 : vector<16x32xf32> to vector<16x32xbf16>
    %cst_117 = arith.constant dense<0.000000e+00> : vector<16x32xf32>
    %348 = tpu.matmul %347, %326, %cst_117 {dimension_numbers = #tpu.dot_dimension_numbers<[1], [0], [0], [1], [0, 0, 1, 1], [], []>} : vector<16x32xbf16>, vector<32x32xbf16>, vector<16x32xf32> -> vector<16x32xf32>
    %349 = arith.addf %307, %348 : vector<16x32xf32>
    %350 = vector.extract_strided_slice %0 {offsets = [10, 0], sizes = [1, 32], strides = [1, 1]} : vector<12x32xf32> to vector<1x32xf32>
    %351 = arith.mulf %349, %349 : vector<16x32xf32>
    %cst_118 = arith.constant dense<0.000000e+00> : vector<16xf32>
    %352 = vector.multi_reduction <add>, %351, %cst_118 [1] : vector<16x32xf32> to vector<16xf32>
    %353 = vector.shape_cast %352 : vector<16xf32> to vector<16x1xf32>
    %cst_119 = arith.constant 3.200000e+01 : f32
    %354 = vector.broadcast %cst_119 : f32 to vector<16x1xf32>
    %355 = arith.divf %353, %354 : vector<16x1xf32>
    %cst_120 = arith.constant 9.99999997E-7 : f32
    %356 = vector.broadcast %cst_120 : f32 to vector<16x1xf32>
    %357 = arith.addf %355, %356 : vector<16x1xf32>
    %358 = math.rsqrt %357 : vector<16x1xf32>
    %359 = vector.broadcast %358 : vector<16x1xf32> to vector<16x32xf32>
    %360 = arith.mulf %349, %359 : vector<16x32xf32>
    %361 = vector.broadcast %350 : vector<1x32xf32> to vector<16x32xf32>
    %362 = arith.mulf %360, %361 : vector<16x32xf32>
    %c800 = arith.constant 800 : index
    %c0_121 = arith.constant 0 : index
    %363 = vector.load %arg2[%c800, %c0_121] : memref<928x128xbf16, #tpu.memory_space<vmem>>, vector<32x64xbf16>
    %364 = arith.truncf %362 : vector<16x32xf32> to vector<16x32xbf16>
    %cst_122 = arith.constant dense<0.000000e+00> : vector<16x64xf32>
    %365 = tpu.matmul %364, %363, %cst_122 {dimension_numbers = #tpu.dot_dimension_numbers<[1], [0], [0], [1], [0, 0, 1, 1], [], []>} : vector<16x32xbf16>, vector<32x64xbf16>, vector<16x64xf32> -> vector<16x64xf32>
    %cst_123 = arith.constant 0.000000e+00 : f32
    %366 = vector.broadcast %cst_123 : f32 to vector<16x64xf32>
    %367 = arith.maximumf %365, %366 : vector<16x64xf32>
    %c832 = arith.constant 832 : index
    %c0_124 = arith.constant 0 : index
    %368 = vector.load %arg2[%c832, %c0_124] : memref<928x128xbf16, #tpu.memory_space<vmem>>, vector<64x32xbf16>
    %369 = arith.truncf %367 : vector<16x64xf32> to vector<16x64xbf16>
    %cst_125 = arith.constant dense<0.000000e+00> : vector<16x32xf32>
    %370 = tpu.matmul %369, %368, %cst_125 {dimension_numbers = #tpu.dot_dimension_numbers<[1], [0], [0], [1], [0, 0, 1, 1], [], []>} : vector<16x64xbf16>, vector<64x32xbf16>, vector<16x32xf32> -> vector<16x32xf32>
    %371 = arith.addf %349, %370 : vector<16x32xf32>
    %372 = vector.extract_strided_slice %0 {offsets = [11, 0], sizes = [1, 32], strides = [1, 1]} : vector<12x32xf32> to vector<1x32xf32>
    %373 = arith.mulf %371, %371 : vector<16x32xf32>
    %cst_126 = arith.constant dense<0.000000e+00> : vector<16xf32>
    %374 = vector.multi_reduction <add>, %373, %cst_126 [1] : vector<16x32xf32> to vector<16xf32>
    %375 = vector.shape_cast %374 : vector<16xf32> to vector<16x1xf32>
    %cst_127 = arith.constant 3.200000e+01 : f32
    %376 = vector.broadcast %cst_127 : f32 to vector<16x1xf32>
    %377 = arith.divf %375, %376 : vector<16x1xf32>
    %cst_128 = arith.constant 9.99999997E-7 : f32
    %378 = vector.broadcast %cst_128 : f32 to vector<16x1xf32>
    %379 = arith.addf %377, %378 : vector<16x1xf32>
    %380 = math.rsqrt %379 : vector<16x1xf32>
    %381 = vector.broadcast %380 : vector<16x1xf32> to vector<16x32xf32>
    %382 = arith.mulf %371, %381 : vector<16x32xf32>
    %383 = vector.broadcast %372 : vector<1x32xf32> to vector<16x32xf32>
    %384 = arith.mulf %382, %383 : vector<16x32xf32>
    %cst_129 = arith.constant 0.176776692 : f32
    %385 = vector.broadcast %cst_129 : f32 to vector<16x32xf32>
    %386 = arith.mulf %384, %385 : vector<16x32xf32>
    %387 = arith.truncf %386 : vector<16x32xf32> to vector<16x32xbf16>
    %c0_130 = arith.constant 0 : index
    %c0_131 = arith.constant 0 : index
    %388 = vector.load %arg2[%c0_130, %c0_131] : memref<928x128xbf16, #tpu.memory_space<vmem>>, vector<128x32xbf16>
    %cst_132 = arith.constant dense<0.000000e+00> : vector<16x128xf32>
    %389 = tpu.matmul %387, %388, %cst_132 {dimension_numbers = #tpu.dot_dimension_numbers<[1], [1], [0], [0], [0, 0, 1, 0], [], []>} : vector<16x32xbf16>, vector<128x32xbf16>, vector<16x128xf32> -> vector<16x128xf32>
    %c0_133 = arith.constant 0 : index
    %c0_134 = arith.constant 0 : index
    %390 = vector.load %arg3[%c0_133, %c0_134] : memref<16x128xf32, #tpu.memory_space<vmem>>, vector<16x128xf32>
    tpu.vector_store %arg3[%c0_133, %c0_134], %389 {strides = array<i32>} : memref<16x128xf32, #tpu.memory_space<vmem>>, vector<16x128xf32>,
    %c0_135 = arith.constant 0 : index
    %c0_136 = arith.constant 0 : index
    %391 = vector.load %arg0[%c0_135, %c0_136] : memref<16x1xi32, #tpu.memory_space<vmem>>, vector<16x1xi32>
    %cst_137 = arith.constant dense<0xFF800000> : vector<16xf32>
    %392 = vector.multi_reduction <maximumf>, %389, %cst_137 [1] : vector<16x128xf32> to vector<16xf32>
    %393 = vector.shape_cast %392 : vector<16xf32> to vector<16x1xf32>
    %394 = vector.broadcast %393 : vector<16x1xf32> to vector<16x128xf32>
    %395 = arith.subf %389, %394 : vector<16x128xf32>
    %396 = math.exp %395 : vector<16x128xf32>
    %cst_138 = arith.constant dense<0.000000e+00> : vector<16xf32>
    %397 = vector.multi_reduction <add>, %396, %cst_138 [1] : vector<16x128xf32> to vector<16xf32>
    %398 = vector.shape_cast %397 : vector<16xf32> to vector<16x1xf32>
    %399 = math.log %398 : vector<16x1xf32>
    %400 = arith.addf %393, %399 : vector<16x1xf32>
    %401 = tpu.iota {dimensions = array<i32: 1>} : vector<16x128xi32>
    %402 = vector.broadcast %391 : vector<16x1xi32> to vector<16x128xi32>
    %403 = arith.cmpi eq, %401, %402 : vector<16x128xi32>
    %404 = arith.extui %403 : vector<16x128xi1> to vector<16x128xi32>
    %405 = arith.sitofp %404 : vector<16x128xi32> to vector<16x128xf32>
    %406 = arith.mulf %389, %405 : vector<16x128xf32>
    %cst_139 = arith.constant dense<0.000000e+00> : vector<16xf32>
    %407 = vector.multi_reduction <add>, %406, %cst_139 [1] : vector<16x128xf32> to vector<16xf32>
    %408 = vector.shape_cast %407 : vector<16xf32> to vector<16x1xf32>
    %c-100_i32 = arith.constant -100 : i32
    %409 = vector.broadcast %c-100_i32 : i32 to vector<16x1xi32>
    %410 = arith.cmpi ne, %391, %409 : vector<16x1xi32>
    %411 = arith.extui %410 : vector<16x1xi1> to vector<16x1xi32>
    %412 = arith.sitofp %411 : vector<16x1xi32> to vector<16x1xf32>
    %413 = arith.subf %400, %408 : vector<16x1xf32>
    %414 = arith.mulf %412, %413 : vector<16x1xf32>
    %415 = vector.shape_cast %414 : vector<16x1xf32> to vector<1x16x1xf32>
    %cst_140 = arith.constant dense<0.000000e+00> : vector<1xf32>
    %416 = vector.multi_reduction <add>, %415, %cst_140 [1, 2] : vector<1x16x1xf32> to vector<1xf32>
    %417 = vector.shape_cast %416 : vector<1xf32> to vector<1x1x1xf32>
    %418 = vector.extract %417[0, 0, 0] : f32 from vector<1x1x1xf32>
    %419 = vector.broadcast %418 : f32 to vector<1x1xf32>
    %420 = vector.shape_cast %412 : vector<16x1xf32> to vector<1x16x1xf32>
    %cst_141 = arith.constant dense<0.000000e+00> : vector<1xf32>
    %421 = vector.multi_reduction <add>, %420, %cst_141 [1, 2] : vector<1x16x1xf32> to vector<1xf32>
    %422 = vector.shape_cast %421 : vector<1xf32> to vector<1x1x1xf32>
    %423 = vector.extract %422[0, 0, 0] : f32 from vector<1x1x1xf32>
    %424 = vector.broadcast %423 : f32 to vector<1x1xf32>
    %cst_142 = arith.constant 1.000000e+00 : f32
    %425 = vector.broadcast %cst_142 : f32 to vector<1x1xf32>
    %426 = arith.maximumf %424, %425 : vector<1x1xf32>
    %427 = arith.divf %419, %426 : vector<1x1xf32>
    %c0_143 = arith.constant 0 : index
    %c0_144 = arith.constant 0 : index
    %428 = vector.load %arg4[%c0_143, %c0_144] : memref<1x1xf32, #tpu.memory_space<vmem>>, vector<1x1xf32>
    tpu.vector_store %arg4[%c0_143, %c0_144], %427 {strides = array<i32>} : memref<1x1xf32, #tpu.memory_space<vmem>>, vector<1x1xf32>,
    return
  }
}

</mosaic_0001>

<bundles_post_ra>
// kernel: codet5_forward.1
= control target key start
LH: loop header
LB: loop body
LE: loop exit
PB: predicated region body
PF: predicated region fallthrough
CT: control target
= control target key end

     0   :  { %10 = vsyncpa [#allocation3], 0  ;;  %vm67_vm0 = vcmask 261120   ;;  %v7828_v7 = vmov 0.0   ;;  %vm7829_vm1 = vmmov 0   ;;  %s9275_s0 = inlined_call_operand.vmem [shape: s32[16,1], index: 0, kind: input, shape index: {}]   ;;  %s9276_s1 = inlined_call_operand.vmem [shape: f32[416,32], index: 1, kind: input, shape index: {}]   ;;  %s9277_s2 = inlined_call_operand.vmem [shape: bf16[928,128], index: 2, kind: input, shape index: {}]   ;;  %s9278_s3 = inlined_call_operand.hbm [shape: f32[16,128], index: 3, kind: output, shape index: {0}]   ;;  %s9279_s4 = inlined_call_operand.hbm [shape: f32[1,1], index: 4, kind: output, shape index: {1}]  }
   0x1   :  { %v7867_v0 = vld [vmem:[%s9276_s1] sm:$0xff]  ;;  %v7872_v1 = vld [vmem:[%s9276_s1 + $0x8] sm:$0xff]  ;;  %6537 = vmatprep.subr.bf16.mxu0 %v7828_v7  ;;  %6541 = vmatprep.mubr.msk.bf16.mxu0 %vm7829_vm1, %v7828_v7 }
   0x2   :  { %v65_v2 = vmul.f32 %v7867_v0, %v7867_v0  ;;  %v66_v3 = vmul.f32 %v7872_v1, %v7872_v1  ;;  %v7599_v6 = vld [vmem:[%s9277_s2 + $0x40] sm:$0xff]   ;;  %v7600_v8 = vld [vmem:[%s9277_s2 + $0x48] sm:$0xff]  }
   0x3   :  { %6538 = vmatpush3.bf16.msra.mxu0 %v7599_v6 }
   0x4   :  { %v68_v4 = vsel %vm67_vm0, %v65_v2, 0.0  ;;  %v71_v5 = vsel %vm67_vm0, %v66_v3, 0.0  ;;  %6539 = vmatprep.subr.bf16.mxu0 %v7828_v7 }
   0x5   :  { %69 = vadd.xlane.f32.xlu0 %v68_v4 }
   0x7   :  { %6540 = vmatpush3.bf16.msra.mxu0 %v7600_v8 }
   0x9   :  { %72 = vadd.xlane.f32.xlu0 %v71_v5 }
   0xa   :  { %11 = vsyncpa [#allocation5], 0  ;;  %v9280_v14 = vlaneseq  ;;  %v7897_v19 = vld [vmem:[%s9276_s1 + $0x190] sm:$0xff]  ;;  %vm162_vm2 = vcmask 130048   ;;  %s7830_s27 = smov 96   ;;  %s7831_s28 = smov 64  }
   0xb   :  { %v7908_v27 = vld [vmem:[%s9276_s1 + $0x50] sm:$0xff]  ;;  %v7925_v40 = vld [vmem:[%s9276_s1 + $0x58] sm:$0xff]  ;;  %v7930_v42 = vld [vmem:[%s9276_s1 + $0x60] sm:$0xff]  ;;  %v7832_v48 = vmov 0.0|0.0   ;;  %vm1009_vm4 = vcmask 523264   ;;  %vm5855_vm9 = vcmask 7168  }
   0xc   :  { %v7891_v16 = vshrl.u32 %v9280_v14, 7  ;;  %6549 = vmatprep.mubr.msk.f32.mxu1 %vm162_vm2, %v7908_v27  ;;  %v7939_v43 = vld [vmem:[%s9276_s1 + $0x68] sm:$0xff]  ;;  %v7944_v44 = vld [vmem:[%s9276_s1 + $0x70] sm:$0xff]  ;;  %v7955_v45 = vld [vmem:[%s9276_s1 + $0x78] sm:$0xff] }
   0xd   :  { %v7962_v46 = vld [vmem:[%s9276_s1 + $0x80] sm:$0xff]  ;;  %v7973_v47 = vld [vmem:[%s9276_s1 + $0x88] sm:$0xff]  ;;  %v7994_v49 = vld [vmem:[%s9276_s1 + $0x98] sm:$0xff] }
   0xe   :  { %v9283_v17 = vsub.s32 0, %v7891_v16  ;;  %v7999_v50 = vld [vmem:[%s9276_s1 + $0x90] sm:$0xff]  ;;  %v8006_v55 = vld [vmem:[%s9276_s1 + $0xa8] sm:$0xff]  ;;  %v8011_v56 = vld [vmem:[%s9276_s1 + $0xa0] sm:$0xff] }
   0xf   :  { %vm8015_vm3 = vmpackc.low %vm67_vm0, %vm67_vm0  ;;  %v8029_v4 = vld [vmem:[%s9276_s1 + $0xb8] sm:$0xff]  ;;  %v8037_v6 = vld [vmem:[%s9276_s1 + $0xb0] sm:$0xff] }
  0x10   :  { %v86_v21 = vrot.slane %v7897_v19, %v9283_v17 }
  0x92   :  { %v70_v9 = vpop.xlane.xlu0 %69 }
  0x93   :  { %v75_v10 = vmul.f32 0.03125, %v70_v9 }
  0x95   :  { %v77_v11 = vadd.f32 1e-06, %v75_v10 }
  0x96   :  { %v73_v12 = vpop.xlane.xlu0 %72 }
  0x97   :  { %7657 = vrsqrt.f32 %v77_v11  ;;  %v76_v13 = vmul.f32 0.03125, %v73_v12 }
  0x99   :  { %v78_v15 = vadd.f32 1e-06, %v76_v13 }
  0x9b   :  { %7659 = vrsqrt.f32 %v78_v15 }
  0xa1   :  { %v7658_v18 = vpop.eup %7657 }
  0xa2   :  { %v81_v20 = vmul.f32 %v7658_v18, %v7867_v0 }
  0xa4   :  { %v87_v24 = vmul.f32 %v86_v21, %v81_v20 }
  0xa5   :  { %v7660_v22 = vpop.eup %7659 }
  0xa6   :  { %v82_v23 = vmul.f32 %v7660_v22, %v7872_v1 }
  0xa8   :  { %v88_v25 = vmul.f32 %v86_v21, %v82_v23  ;;  %v8050_v21 = vld [vmem:[%s9276_s1 + $0xc8] sm:$0xff]  ;;  %v8058_v23 = vld [vmem:[%s9276_s1 + $0xc0] sm:$0xff] }
  0xaa   :  { %v93_v26 = vpack.c.bf16 %v88_v25, %v87_v24 }
  0xac   :  { %6542 = vmatmul.mubr.msk.bf16.vlgmr.msra.gmra.mrb[0].mxu0 %vm67_vm0, %v93_v26 }
  0xad   :  { %6565 = vmatprep.mubr.msk.f32.mxu0 %vm162_vm2, %v7908_v27 }
 0x17f   :  { %v7914_v28 = vpop.f32.mrb[0].mxu0 }
 0x180   :  { %v6543_v29 = vpop.f32.mrb[1].mxu0 }
 0x181   :  { %v7916_v30 = vpop.f32.mrb[2].mxu0 }
 0x182   :  { %v7547_v31 = vpack.i.bf16 %v7916_v30, %v7914_v28  ;;  %v6544_v32 = vpop.f32.mrb[3].mxu0 }
 0x184   :  { %7543 = vrot.lane.b32.xlu1 %v7547_v31, %s7830_s27 }
 0x188   :  { %7548 = vrot.lane.b32.xlu1 %v7547_v31, %s7831_s28 }
 0x1f6   :  { %v7544_v33 = vpop.permute.xlu1 %7543 }
 0x1f7   :  { %v7546_v34 = vunpack.i.h.bf16 %v7544_v33  ;;  %v7545_v35 = vunpack.i.l.bf16 %v7544_v33 }
 0x1f9   :  { %v7263_v36 = vpack.c.bf16 %v7546_v34, %v7545_v35 }
 0x1fa   :  { %v7549_v37 = vpop.permute.xlu1 %7548 }
 0x1fb   :  { %v7551_v38 = vunpack.i.h.bf16 %v7549_v37  ;;  %v7550_v39 = vunpack.i.l.bf16 %v7549_v37  ;;  %7264 = vmatprep.subr.bf16.mxu1 %v7263_v36 }
 0x1fc   :  { %7266 = vmatpush3.bf16.msra.mxu1 %v7263_v36 }
 0x1fd   :  { %v7267_v41 = vpack.c.bf16 %v7551_v38, %v7550_v39  ;;  %7271 = vmatprep.subr.bf16.mxu1 %v7832_v48 }
 0x1ff   :  { %6550 = vmatmul.mubr.msk.f32.vlgmr.msra.gmra.mrb[0].mxu1 %vm162_vm2, %v7925_v40  ;;  %7268 = vmatprep.subr.bf16.mxu0 %v7267_v41 }
 0x200   :  { %7270 = vmatpush3.bf16.msra.mxu0 %v7267_v41  ;;  %6552 = vmatprep.mubr.msk.f32.mxu1 %vm162_vm2, %v7930_v42 }
 0x201   :  { %7279 = vmatprep.subr.bf16.mxu0 %v7832_v48 }
 0x203   :  { %6553 = vmatmul.mubr.msk.f32.gmra.mrb[2].mxu1 %vm162_vm2, %v7939_v43  ;;  %6566 = vmatmul.mubr.msk.f32.vlgmr.msra.gmra.mrb[4].mxu0 %vm162_vm2, %v7925_v40 }
 0x204   :  { %6555 = vmatprep.mubr.msk.f32.mxu1 %vm162_vm2, %v7944_v44  ;;  %6568 = vmatprep.mubr.msk.f32.mxu0 %vm162_vm2, %v7930_v42 }
 0x207   :  { %6556 = vmatmul.mubr.msk.f32.gmra.mrb[4].mxu1 %vm162_vm2, %v7955_v45  ;;  %6569 = vmatmul.mubr.msk.f32.gmra.mrb[6].mxu0 %vm162_vm2, %v7939_v43 }
 0x208   :  { %6558 = vmatprep.mubr.msk.f32.mxu1 %vm162_vm2, %v7962_v46  ;;  %6571 = vmatprep.mubr.msk.f32.mxu0 %vm162_vm2, %v7944_v44 }
 0x20b   :  { %6559 = vmatmul.mubr.msk.f32.gmra.mrb[6].mxu1 %vm162_vm2, %v7973_v47  ;;  %6572 = vmatmul.mubr.msk.f32.gmra.mrb[8].mxu0 %vm162_vm2, %v7955_v45 }
 0x20c   :  { %6585 = vmatprep.mubr.msk.f32.mxu1 %vm7829_vm1, %v7828_v7  ;;  %6574 = vmatprep.mubr.msk.f32.mxu0 %vm162_vm2, %v7962_v46 }
 0x20f   :  { %6575 = vmatmul.mubr.msk.f32.gmra.mrb[10].mxu0 %vm162_vm2, %v7973_v47 }
 0x210   :  { %6596 = vmatprep.mubr.msk.f32.mxu0 %vm7829_vm1, %v7828_v7 }
 0x2d2   :  { %v6551_v51 = vpop.f32.mrb[0].mxu1 }
 0x2d3   :  { %v293_v52 = vmul.f32 %v6551_v51, %v7994_v49  ;;  %v253_v53 = vpop.f32.mrb[1].mxu1 }
 0x2d4   :  { %v292_v54 = vmul.f32 %v253_v53, %v7999_v50 }
 0x2d6   :  { %v7272_v58 = vpack.c.bf16 %v293_v52, %v292_v54  ;;  %v6554_v59 = vpop.f32.mrb[2].mxu1  ;;  %v6567_v60 = vpop.f32.mrb[4].mxu0 }
 0x2d7   :  { %v295_v61 = vmul.f32 %v6554_v59, %v8006_v55  ;;  %v263_v62 = vpop.f32.mrb[3].mxu1  ;;  %v8021_v63 = vmul.f32 %v6567_v60, %v7994_v49  ;;  %v372_v2 = vpop.f32.mrb[5].mxu0  ;;  %v8094_v60 = vld [vmem:[%s9276_s1 + $0x28] sm:$0xff] }
 0x2d8   :  { %v294_v3 = vmul.f32 %v263_v62, %v8011_v56  ;;  %7274 = vmatpush3.bf16.xpose.msk.msra.mxu1 %vm8015_vm3, %v7272_v58  ;;  %v8032_v5 = vmul.f32 %v372_v2, %v7999_v50 }
 0x2d9   :  { %7275 = vmatprep.subr.bf16.mxu1 %v7832_v48 }
 0x2da   :  { %v7276_v8 = vpack.c.bf16 %v295_v61, %v294_v3  ;;  %v6557_v9 = vpop.f32.mrb[4].mxu1  ;;  %v7296_v10 = vpack.c.bf16 %v8021_v63, %v8032_v5  ;;  %v6570_v11 = vpop.f32.mrb[6].mxu0 }
 0x2db   :  { %v297_v12 = vmul.f32 %v6557_v9, %v8029_v4  ;;  %v273_v13 = vpop.f32.mrb[5].mxu1  ;;  %v8044_v15 = vmul.f32 %v6570_v11, %v8006_v55  ;;  %v382_v18 = vpop.f32.mrb[7].mxu0  ;;  %v38_v9 = vld [vmem:[%s9276_s1 + $0xd8] sm:$0xff] }
 0x2dc   :  { %v296_v20 = vmul.f32 %v273_v13, %v8037_v6  ;;  %v8053_v22 = vmul.f32 %v382_v18, %v8011_v56  ;;  %v40_v13 = vld [vmem:[%s9276_s1 + $0xe8] sm:$0xff] }
 0x2de   :  { %v7280_v24 = vpack.c.bf16 %v297_v12, %v296_v20  ;;  %v6560_v25 = vpop.f32.mrb[6].mxu1  ;;  %v7299_v26 = vpack.c.bf16 %v8044_v15, %v8053_v22  ;;  %v6573_v29 = vpop.f32.mrb[8].mxu0  ;;  %v39_v12 = vld [vmem:[%s9276_s1 + $0xe0] sm:$0xff]  ;;  %v7602_v15 = vld [vmem:[%s9277_s2 + $0x58] sm:$0xff]  }
 0x2df   :  { %v299_v31 = vmul.f32 %v6560_v25, %v8050_v21  ;;  %v283_v32 = vpop.f32.mrb[7].mxu1  ;;  %v416_v33 = vmul.f32 %v6573_v29, %v8029_v4  ;;  %v392_v34 = vpop.f32.mrb[9].mxu0  ;;  %v8114_v18 = vpack.c.bf16 %v40_v13, %v39_v12 }
 0x2e0   :  { %7278 = vmatpush3.bf16.xpose.msk.msra.mxu1 %vm8015_vm3, %v7276_v8  ;;  %7282 = vmatpush3.bf16.xpose.msk.msra.mxu0 %vm8015_vm3, %v7280_v24  ;;  %v298_v35 = vmul.f32 %v283_v32, %v8058_v23  ;;  %v415_v36 = vmul.f32 %v392_v34, %v8037_v6  ;;  %v37_v8 = vld [vmem:[%s9276_s1 + $0xd0] sm:$0xff] }
 0x2e1   :  { %7283 = vmatprep.subr.bf16.mxu0 %v7832_v48  ;;  %v8104_v11 = vpack.c.bf16 %v38_v9, %v37_v8  ;;  %v7603_v8 = vld [vmem:[%s9277_s2 + $0x60] sm:$0xff]  }
 0x2e2   :  { %v7284_v37 = vpack.c.bf16 %v299_v31, %v298_v35  ;;  %v7302_v38 = vpack.c.bf16 %v416_v33, %v415_v36  ;;  %v6576_v39 = vpop.f32.mrb[10].mxu0 }
 0x2e3   :  { %v418_v41 = vmul.f32 %v6576_v39, %v8050_v21  ;;  %v402_v51 = vpop.f32.mrb[11].mxu0  ;;  %7288 = vmatprep.subr.bf16.mxu1 %v8104_v11 }
 0x2e7   :  { %6586 = vmatmul.mubr.msk.f32.vlgmr.msra.gmra.mrb[8].mxu1 %vm67_vm0, %v7914_v28  ;;  %v417_v28 = vmul.f32 %v402_v51, %v8058_v23 }
 0x2e8   :  { %7286 = vmatpush3.bf16.xpose.msk.msra.mxu0 %vm8015_vm3, %v7284_v37  ;;  %7290 = vmatpush3.bf16.msra.mxu1 %v8104_v11 }
 0x2e9   :  { %7301 = vmatprep.subr.bf16.mxu0 %v7832_v48  ;;  %v7305_v52 = vpack.c.bf16 %v418_v41, %v417_v28  ;;  %7292 = vmatprep.subr.bf16.mxu1 %v8114_v18 }
 0x2ec   :  { %7294 = vmatpush3.bf16.msra.mxu1 %v8114_v18 }
 0x2ed   :  { %7295 = vmatprep.subr.bf16.mxu1 %v7832_v48 }
 0x2ef   :  { %6597 = vmatmul.mubr.msk.f32.vlgmr.msra.gmra.mrb[12].mxu0 %vm67_vm0, %v7916_v30  ;;  %v8087_v30 = vld [vmem:[%s9276_s1 + $0x20] sm:$0xff] }
 0x2f0   :  { %7303 = vmatpush3.bf16.msra.mxu0 %v7302_v38  ;;  %6629 = vmatprep.mubr.msk.f32.mxu0 %vm7829_vm1, %v7828_v7  ;;  %v7601_v38 = vld [vmem:[%s9277_s2 + $0x50] sm:$0xff]  }
 0x2f1   :  { %7304 = vmatprep.subr.bf16.mxu0 %v7832_v48 }
 0x2f4   :  { %7306 = vmatpush3.bf16.msra.mxu0 %v7305_v52 }
 0x2f5   :  { %6632 = vmatprep.subr.bf16.mxu0 %v7828_v7 }
 0x3ba   :  { %v499_v53 = vpop.f32.mrb[8].mxu1 }
 0x3bb   :  { %v587_v54 = vadd.f32 %v499_v53, %v8087_v30  ;;  %v6587_v58 = vpop.f32.mrb[9].mxu1 }
 0x3bd   :  { %v589_v59 = vsel %vm67_vm0, %v587_v54, -inf }
 0x3be   :  { %590 = vmax.xlane.f32.xlu0 %v589_v59 }
 0x3c2   :  { %v583_v61 = vpop.f32.mrb[12].mxu0 }
 0x3c3   :  { %v588_v62 = vadd.f32 %v583_v61, %v8094_v60  ;;  %v6598_v2 = vpop.f32.mrb[13].mxu0 }
 0x3c5   :  { %v592_v3 = vsel %vm67_vm0, %v588_v62, -inf }
 0x3c6   :  { %593 = vmax.xlane.f32.xlu1 %v592_v3 }
 0x44b   :  { %v591_v20 = vpop.xlane.xlu0 %590 }
 0x44c   :  { %v595_v24 = vsub.f32 %v587_v54, %v591_v20 }
 0x44e   :  { %v597_v25 = vmul.f32 1.442695, %v595_v24 }
 0x450   :  { %7661 = vpow2.f32 %v597_v25  ;;  %v9282_v25 = vsub.s32 2, %v7891_v16 }
 0x453   :  { %v594_v29 = vpop.xlane.xlu1 %593 }
 0x454   :  { %v596_v31 = vsub.f32 %v588_v62, %v594_v29 }
 0x456   :  { %v599_v32 = vmul.f32 1.442695, %v596_v31 }
 0x458   :  { %7663 = vpow2.f32 %v599_v32  ;;  %v910_v32 = vrot.slane %v7897_v19, %v9282_v25 }
 0x45a   :  { %v7662_v33 = vpop.eup %7661 }
 0x45b   :  { %6607 = vmatprep.mubr.msk.f32.mxu1 %vm67_vm0, %v7662_v33 }
 0x462   :  { %v7664_v34 = vpop.eup %7663 }
 0x463   :  { %6608 = vmatmul.mubr.msk.f32.vlgmr.msra.gmra.mrb[10].mxu1 %vm67_vm0, %v7664_v34 }
 0x464   :  { %7297 = vmatpush3.bf16.msra.mxu1 %v7296_v10  ;;  %6618 = vmatprep.mubr.msk.f32.mxu1 %vm7829_vm1, %v7828_v7 }
 0x465   :  { %7298 = vmatprep.subr.bf16.mxu1 %v7832_v48 }
 0x468   :  { %7300 = vmatpush3.bf16.msra.mxu1 %v7299_v26 }
 0x536   :  { %v6609_v35 = vpop.f32.mrb[10].mxu1 }
 0x537   :  { %7665 = vrcp.f32 %v6609_v35  ;;  %v673_v36 = vpop.f32.mrb[11].mxu1 }
 0x538   :  { %7667 = vrcp.f32 %v673_v36 }
 0x541   :  { %v7666_v37 = vpop.eup %7665 }
 0x542   :  { %v7668_v63 = vpop.eup %7667  ;;  %v685_v5 = vmul.f32 %v7666_v37, %v7664_v34  ;;  %v7605_v37 = vld [vmem:[%s9277_s2 + $0x70] sm:$0xff]  }
 0x543   :  { %v683_v10 = vmul.f32 %v7668_v63, %v7662_v33  ;;  %v7606_v63 = vld [vmem:[%s9277_s2 + $0x78] sm:$0xff]  }
 0x544   :  { %6630 = vmatmul.mubr.msk.f32.vlgmr.msra.gmra.mrb[14].mxu0 %vm67_vm0, %v685_v5  ;;  %v7607_v5 = vld [vmem:[%s9277_s2 + $0x80] sm:$0xff]  }
 0x545   :  { %6619 = vmatmul.mubr.msk.f32.vlgmr.msra.gmra.mrb[12].mxu1 %vm67_vm0, %v683_v10  ;;  %6633 = vmatpush3.bf16.msra.mxu0 %v7601_v38  ;;  %v7608_v10 = vld [vmem:[%s9277_s2 + $0x88] sm:$0xff]  }
 0x546   :  { %6634 = vmatprep.subr.bf16.mxu0 %v7828_v7  ;;  %6636 = vmatprep.mubr.msk.bf16.mxu0 %vm7829_vm1, %v7828_v7 }
 0x547   :  { %6688 = vmatprep.mubr.msk.f32.mxu1 %vm162_vm2, %v7908_v27 }
 0x549   :  { %6635 = vmatpush3.bf16.msra.mxu0 %v7602_v15 }
 0x54a   :  { %6640 = vmatprep.subr.bf16.mxu0 %v7828_v7 }
 0x617   :  { %v828_v22 = vpop.f32.mrb[14].mxu0 }
 0x618   :  { %v755_v26 = vpop.f32.mrb[12].mxu1  ;;  %v6631_v39 = vpop.f32.mrb[15].mxu0 }
 0x619   :  { %v832_v41 = vpack.c.bf16 %v828_v22, %v755_v26  ;;  %v6620_v51 = vpop.f32.mrb[13].mxu1 }
 0x61b   :  { %6637 = vmatmul.mubr.msk.bf16.vlgmr.msra.gmra.mrb[16].mxu0 %vm67_vm0, %v832_v41 }
 0x61c   :  { %6644 = vmatprep.mubr.msk.bf16.mxu0 %vm7829_vm1, %v7828_v7  ;;  %6641 = vmatpush3.bf16.msra.mxu0 %v7603_v8 }
 0x61d   :  { %6642 = vmatprep.subr.bf16.mxu0 %v7828_v7 }
 0x6ee   :  { %v882_v28 = vpop.f32.mrb[16].mxu0 }
 0x6ef   :  { %v889_v52 = vadd.f32 %v882_v28, %v7867_v0  ;;  %v6638_v53 = vpop.f32.mrb[17].mxu0  ;;  %v7604_v0 = vld [vmem:[%s9277_s2 + $0x68] sm:$0xff]  }
 0x6f0   :  { %v885_v54 = vpop.f32.mrb[18].mxu0  ;;  %6643 = vmatpush3.bf16.msra.mxu0 %v7604_v0 }
 0x6f1   :  { %v890_v58 = vadd.f32 %v885_v54, %v7872_v1  ;;  %v6639_v59 = vpop.f32.mrb[19].mxu0  ;;  %v891_v61 = vmul.f32 %v889_v52, %v889_v52  ;;  %6648 = vmatprep.subr.bf16.mxu0 %v7828_v7 }
 0x6f3   :  { %v893_v62 = vsel %vm67_vm0, %v891_v61, 0.0  ;;  %v892_v2 = vmul.f32 %v890_v58, %v890_v58 }
 0x6f4   :  { %894 = vadd.xlane.f32.xlu0 %v893_v62 }
 0x6f5   :  { %v896_v3 = vsel %vm67_vm0, %v892_v2, 0.0 }
 0x6f8   :  { %897 = vadd.xlane.f32.xlu0 %v896_v3 }
 0x781   :  { %v895_v1 = vpop.xlane.xlu0 %894 }
 0x782   :  { %v899_v9 = vmul.f32 0.03125, %v895_v1 }
 0x784   :  { %v901_v12 = vadd.f32 1e-06, %v899_v9 }
 0x785   :  { %v898_v13 = vpop.xlane.xlu0 %897 }
 0x786   :  { %7669 = vrsqrt.f32 %v901_v12  ;;  %v900_v20 = vmul.f32 0.03125, %v898_v13 }
 0x788   :  { %v902_v24 = vadd.f32 1e-06, %v900_v20 }
 0x78a   :  { %7671 = vrsqrt.f32 %v902_v24 }
 0x790   :  { %v7670_v29 = vpop.eup %7669 }
 0x791   :  { %v905_v31 = vmul.f32 %v7670_v29, %v889_v52 }
 0x793   :  { %v911_v35 = vmul.f32 %v910_v32, %v905_v31  ;;  %v9284_v31 = vsub.s32 1, %v7891_v16 }
 0x794   :  { %v7672_v33 = vpop.eup %7671 }
 0x795   :  { %v906_v34 = vmul.f32 %v7672_v33, %v890_v58 }
 0x797   :  { %v912_v36 = vmul.f32 %v910_v32, %v906_v34  ;;  %v1075_v34 = vrot.slane %v7897_v19, %v9284_v31 }
 0x799   :  { %v917_v38 = vpack.c.bf16 %v912_v36, %v911_v35 }
 0x79b   :  { %6645 = vmatmul.mubr.msk.bf16.vlgmr.msra.gmra.mrb[20].mxu0 %vm67_vm0, %v917_v38 }
 0x79c   :  { %6649 = vmatpush3.bf16.msra.mxu0 %v7605_v37  ;;  %6656 = vmatprep.mubr.msk.bf16.mxu0 %vm7829_vm1, %v7828_v7 }
 0x79d   :  { %6650 = vmatprep.subr.bf16.mxu0 %v7828_v7 }
 0x7a0   :  { %6651 = vmatpush3.bf16.msra.mxu0 %v7606_v63 }
 0x7a1   :  { %6652 = vmatprep.subr.bf16.mxu0 %v7828_v7 }
 0x7a4   :  { %6653 = vmatpush3.bf16.msra.mxu0 %v7607_v5 }
 0x7a5   :  { %6654 = vmatprep.subr.bf16.mxu0 %v7828_v7 }
 0x7a8   :  { %6655 = vmatpush3.bf16.msra.mxu0 %v7608_v10 }
 0x7a9   :  { %6660 = vmatprep.subr.bf16.mxu0 %v7828_v7 }
 0x86e   :  { %v967_v15 = vpop.f32.mrb[20].mxu0 }
 0x86f   :  { %v6646_v22 = vpop.f32.mrb[21].mxu0  ;;  %v974_v39 = vmax.f32 %v967_v15, 0.0 }
 0x870   :  { %v970_v26 = vpop.f32.mrb[22].mxu0 }
 0x871   :  { %v975_v41 = vmax.f32 %v970_v26, 0.0  ;;  %v6647_v51 = vpop.f32.mrb[23].mxu0 }
 0x873   :  { %v984_v28 = vpack.c.bf16 %v975_v41, %v974_v39 }
 0x875   :  { %6657 = vmatmul.mubr.msk.bf16.vlgmr.msra.gmra.mrb[24].mxu0 %vm1009_vm4, %v984_v28 }
 0x876   :  { %6664 = vmatprep.mubr.msk.bf16.mxu0 %vm7829_vm1, %v7828_v7 }
 0x948   :  { %v1047_v53 = vpop.f32.mrb[24].mxu0 }
 0x949   :  { %v8185_v54 = vadd.f32 %v1047_v53, %v889_v52  ;;  %v6658_v59 = vpop.f32.mrb[25].mxu0  ;;  %v7609_v52 = vld [vmem:[%s9277_s2 + $0x90] sm:$0xff]  }
 0x94a   :  { %v1050_v61 = vpop.f32.mrb[26].mxu0  ;;  %6661 = vmatpush3.bf16.msra.mxu0 %v7609_v52 }
 0x94b   :  { %v8187_v62 = vadd.f32 %v1050_v61, %v890_v58  ;;  %v6659_v2 = vpop.f32.mrb[27].mxu0  ;;  %v1056_v3 = vmul.f32 %v8185_v54, %v8185_v54  ;;  %v7610_v58 = vld [vmem:[%s9277_s2 + $0x98] sm:$0xff]   ;;  %6662 = vmatprep.subr.bf16.mxu0 %v7828_v7 }
 0x94d   :  { %v1058_v8 = vsel %vm67_vm0, %v1056_v3, 0.0  ;;  %v1057_v0 = vmul.f32 %v8187_v62, %v8187_v62 }
 0x94e   :  { %1059 = vadd.xlane.f32.xlu0 %v1058_v8  ;;  %6663 = vmatpush3.bf16.msra.mxu0 %v7610_v58 }
 0x94f   :  { %v1061_v1 = vsel %vm67_vm0, %v1057_v0, 0.0 }
 0x952   :  { %1062 = vadd.xlane.f32.xlu0 %v1061_v1 }
 0x9db   :  { %v1060_v9 = vpop.xlane.xlu0 %1059 }
 0x9dc   :  { %v1064_v12 = vmul.f32 0.03125, %v1060_v9 }
 0x9de   :  { %v1066_v13 = vadd.f32 1e-06, %v1064_v12 }
 0x9df   :  { %v1063_v20 = vpop.xlane.xlu0 %1062 }
 0x9e0   :  { %7673 = vrsqrt.f32 %v1066_v13  ;;  %v1065_v24 = vmul.f32 0.03125, %v1063_v20 }
 0x9e2   :  { %v1067_v29 = vadd.f32 1e-06, %v1065_v24 }
 0x9e4   :  { %7675 = vrsqrt.f32 %v1067_v29 }
 0x9ea   :  { %v7674_v32 = vpop.eup %7673 }
 0x9eb   :  { %v1070_v33 = vmul.f32 %v7674_v32, %v8185_v54 }
 0x9ed   :  { %v1076_v37 = vmul.f32 %v1075_v34, %v1070_v33 }
 0x9ee   :  { %v7676_v35 = vpop.eup %7675 }
 0x9ef   :  { %v1071_v36 = vmul.f32 %v7676_v35, %v8187_v62 }
 0x9f1   :  { %v1077_v38 = vmul.f32 %v1075_v34, %v1071_v36 }
 0x9f3   :  { %v1082_v63 = vpack.c.bf16 %v1077_v38, %v1076_v37 }
 0x9f5   :  { %6665 = vmatmul.mubr.msk.bf16.vlgmr.msra.gmra.mrb[28].mxu0 %vm67_vm0, %v1082_v63 }
 0x9f6   :  { %6672 = vmatprep.mubr.msk.f32.mxu0 %vm162_vm2, %v7908_v27 }
 0xac8   :  { %v8211_v5 = vpop.f32.mrb[28].mxu0 }
 0xac9   :  { %v6666_v10 = vpop.f32.mrb[29].mxu0 }
 0xaca   :  { %v8213_v15 = vpop.f32.mrb[30].mxu0 }
 0xacb   :  { %v7557_v22 = vpack.i.bf16 %v8213_v15, %v8211_v5  ;;  %v6667_v26 = vpop.f32.mrb[31].mxu0 }
 0xacd   :  { %7558 = vrot.lane.b32.xlu1 %v7557_v22, %s7831_s28  ;;  %7553 = vrot.lane.b32.xlu0 %v7557_v22, %s7830_s27 }
 0xb3f   :  { %v7559_v39 = vpop.permute.xlu1 %7558  ;;  %v7554_v41 = vpop.permute.xlu0 %7553 }
 0xb40   :  { %v7561_v51 = vunpack.i.h.bf16 %v7559_v39  ;;  %v7560_v28 = vunpack.i.l.bf16 %v7559_v39  ;;  %v7556_v53 = vunpack.i.h.bf16 %v7554_v41  ;;  %v7555_v59 = vunpack.i.l.bf16 %v7554_v41 }
 0xb42   :  { %v7311_v27 = vpack.c.bf16 %v7561_v51, %v7560_v28  ;;  %v7307_v61 = vpack.c.bf16 %v7556_v53, %v7555_v59 }
 0xb44   :  { %7308 = vmatprep.subr.bf16.mxu0 %v7307_v61  ;;  %7312 = vmatprep.subr.bf16.mxu1 %v7311_v27 }
 0xb45   :  { %7310 = vmatpush3.bf16.msra.mxu0 %v7307_v61  ;;  %7314 = vmatpush3.bf16.msra.mxu1 %v7311_v27 }
 0xb46   :  { %7315 = vmatprep.subr.bf16.mxu0 %v7832_v48  ;;  %7323 = vmatprep.subr.bf16.mxu1 %v7832_v48 }
 0xb48   :  { %6673 = vmatmul.mubr.msk.f32.vlgmr.msra.gmra.mrb[32].mxu0 %vm162_vm2, %v7925_v40  ;;  %6689 = vmatmul.mubr.msk.f32.vlgmr.msra.gmra.mrb[14].mxu1 %vm162_vm2, %v7925_v40 }
 0xb49   :  { %6675 = vmatprep.mubr.msk.f32.mxu0 %vm162_vm2, %v7930_v42  ;;  %6691 = vmatprep.mubr.msk.f32.mxu1 %vm162_vm2, %v7930_v42 }
 0xb4c   :  { %6676 = vmatmul.mubr.msk.f32.gmra.mrb[34].mxu0 %vm162_vm2, %v7939_v43  ;;  %6692 = vmatmul.mubr.msk.f32.gmra.mrb[16].mxu1 %vm162_vm2, %v7939_v43 }
 0xb4d   :  { %6678 = vmatprep.mubr.msk.f32.mxu0 %vm162_vm2, %v7944_v44  ;;  %6694 = vmatprep.mubr.msk.f32.mxu1 %vm162_vm2, %v7944_v44 }
 0xb50   :  { %6679 = vmatmul.mubr.msk.f32.gmra.mrb[36].mxu0 %vm162_vm2, %v7955_v45  ;;  %6695 = vmatmul.mubr.msk.f32.gmra.mrb[18].mxu1 %vm162_vm2, %v7955_v45 }
 0xb51   :  { %6681 = vmatprep.mubr.msk.f32.mxu0 %vm162_vm2, %v7962_v46  ;;  %6697 = vmatprep.mubr.msk.f32.mxu1 %vm162_vm2, %v7962_v46 }
 0xb54   :  { %6682 = vmatmul.mubr.msk.f32.gmra.mrb[38].mxu0 %vm162_vm2, %v7973_v47  ;;  %6698 = vmatmul.mubr.msk.f32.gmra.mrb[20].mxu1 %vm162_vm2, %v7973_v47 }
 0xb55   :  { %6708 = vmatprep.mubr.msk.f32.mxu0 %vm7829_vm1, %v7828_v7  ;;  %6719 = vmatprep.mubr.msk.f32.mxu1 %vm7829_vm1, %v7828_v7 }
 0xc1b   :  { %v6674_v40 = vpop.f32.mrb[32].mxu0  ;;  %v6690_v42 = vpop.f32.mrb[14].mxu1 }
 0xc1c   :  { %v1257_v43 = vmul.f32 %v6674_v40, %v7994_v49  ;;  %v1217_v44 = vpop.f32.mrb[33].mxu0  ;;  %v1376_v45 = vmul.f32 %v6690_v42, %v7994_v49  ;;  %v1336_v46 = vpop.f32.mrb[15].mxu1 }
 0xc1d   :  { %v1256_v2 = vmul.f32 %v1217_v44, %v7999_v50  ;;  %v1375_v3 = vmul.f32 %v1336_v46, %v7999_v50 }
 0xc1f   :  { %v7316_v8 = vpack.c.bf16 %v1257_v43, %v1256_v2  ;;  %v6677_v47 = vpop.f32.mrb[34].mxu0  ;;  %v7340_v0 = vpack.c.bf16 %v1376_v45, %v1375_v3  ;;  %v6693_v1 = vpop.f32.mrb[16].mxu1 }
 0xc20   :  { %v1259_v52 = vmul.f32 %v6677_v47, %v8006_v55  ;;  %v1227_v58 = vpop.f32.mrb[35].mxu0  ;;  %v1378_v9 = vmul.f32 %v6693_v1, %v8006_v55  ;;  %v1346_v12 = vpop.f32.mrb[17].mxu1 }
 0xc21   :  { %v1258_v13 = vmul.f32 %v1227_v58, %v8011_v56  ;;  %7318 = vmatpush3.bf16.xpose.msk.msra.mxu0 %vm8015_vm3, %v7316_v8  ;;  %v1377_v49 = vmul.f32 %v1346_v12, %v8011_v56 }
 0xc22   :  { %7319 = vmatprep.subr.bf16.mxu0 %v7832_v48 }
 0xc23   :  { %v7320_v50 = vpack.c.bf16 %v1259_v52, %v1258_v13  ;;  %v6680_v20 = vpop.f32.mrb[36].mxu0  ;;  %v7343_v24 = vpack.c.bf16 %v1378_v9, %v1377_v49  ;;  %v6696_v29 = vpop.f32.mrb[18].mxu1  ;;  %v7612_v52 = vld [vmem:[%s9277_s2 + $0xa8] sm:$0xff]  }
 0xc24   :  { %v1261_v32 = vmul.f32 %v6680_v20, %v8029_v4  ;;  %v1237_v33 = vpop.f32.mrb[37].mxu0  ;;  %v1380_v34 = vmul.f32 %v6696_v29, %v8029_v4  ;;  %v1356_v55 = vpop.f32.mrb[19].mxu1 }
 0xc25   :  { %v1260_v35 = vmul.f32 %v1237_v33, %v8037_v6  ;;  %v1379_v36 = vmul.f32 %v1356_v55, %v8037_v6 }
 0xc27   :  { %v7324_v37 = vpack.c.bf16 %v1261_v32, %v1260_v35  ;;  %v6683_v38 = vpop.f32.mrb[38].mxu0  ;;  %v7346_v63 = vpack.c.bf16 %v1380_v34, %v1379_v36  ;;  %v6699_v6 = vpop.f32.mrb[20].mxu1 }
 0xc28   :  { %v1263_v56 = vmul.f32 %v6683_v38, %v8050_v21  ;;  %v1247_v10 = vpop.f32.mrb[39].mxu0  ;;  %v1366_v26 = vpop.f32.mrb[21].mxu1  ;;  %v7616_v38 = vld [vmem:[%s9277_s2 + $0xc8] sm:$0xff]  }
 0xc29   :  { %7322 = vmatpush3.bf16.xpose.msk.msra.mxu0 %vm8015_vm3, %v7320_v50  ;;  %7326 = vmatpush3.bf16.xpose.msk.msra.mxu1 %vm8015_vm3, %v7324_v37  ;;  %v1262_v22 = vmul.f32 %v1247_v10, %v8058_v23  ;;  %v1381_v39 = vmul.f32 %v1366_v26, %v8058_v23  ;;  %v7613_v37 = vld [vmem:[%s9277_s2 + $0xb0] sm:$0xff]  }
 0xc2a   :  { %7327 = vmatprep.subr.bf16.mxu1 %v7832_v48  ;;  %7332 = vmatprep.subr.bf16.mxu0 %v8104_v11 }
 0xc2b   :  { %v7328_v4 = vpack.c.bf16 %v1263_v56, %v1262_v22 }
 0xc30   :  { %6709 = vmatmul.mubr.msk.f32.vlgmr.msra.gmra.mrb[40].mxu0 %vm67_vm0, %v8211_v5  ;;  %v1382_v5 = vmul.f32 %v6699_v6, %v8050_v21 }
 0xc31   :  { %7330 = vmatpush3.bf16.xpose.msk.msra.mxu1 %vm8015_vm3, %v7328_v4  ;;  %7334 = vmatpush3.bf16.msra.mxu0 %v8104_v11 }
 0xc32   :  { %7339 = vmatprep.subr.bf16.mxu1 %v7832_v48  ;;  %7336 = vmatprep.subr.bf16.mxu0 %v8114_v18  ;;  %v7349_v41 = vpack.c.bf16 %v1382_v5, %v1381_v39  ;;  %v9281_v5 = vsub.s32 3, %v7891_v16 }
 0xc35   :  { %7338 = vmatpush3.bf16.msra.mxu0 %v8114_v18 }
 0xc36   :  { %7345 = vmatprep.subr.bf16.mxu0 %v7832_v48 }
 0xc38   :  { %6720 = vmatmul.mubr.msk.f32.vlgmr.msra.gmra.mrb[22].mxu1 %vm67_vm0, %v8213_v15 }
 0xc39   :  { %7341 = vmatpush3.bf16.msra.mxu1 %v7340_v0  ;;  %6741 = vmatprep.mubr.msk.f32.mxu1 %vm7829_vm1, %v7828_v7  ;;  %v7611_v0 = vld [vmem:[%s9277_s2 + $0xa0] sm:$0xff]  }
 0xc3a   :  { %7342 = vmatprep.subr.bf16.mxu1 %v7832_v48 }
 0xc3d   :  { %7344 = vmatpush3.bf16.msra.mxu1 %v7343_v24 }
 0xc3e   :  { %6755 = vmatprep.subr.bf16.mxu1 %v7828_v7 }
 0xd03   :  { %v1463_v51 = vpop.f32.mrb[40].mxu0 }
 0xd04   :  { %v1551_v28 = vadd.f32 %v1463_v51, %v8087_v30  ;;  %v6710_v15 = vpop.f32.mrb[41].mxu0 }
 0xd06   :  { %v1553_v53 = vsel %vm67_vm0, %v1551_v28, -inf }
 0xd07   :  { %1554 = vmax.xlane.f32.xlu0 %v1553_v53 }
 0xd0b   :  { %v1547_v59 = vpop.f32.mrb[22].mxu1 }
 0xd0c   :  { %v1552_v27 = vadd.f32 %v1547_v59, %v8094_v60  ;;  %v6721_v61 = vpop.f32.mrb[23].mxu1 }
 0xd0e   :  { %v1556_v40 = vsel %vm67_vm0, %v1552_v27, -inf }
 0xd0f   :  { %1557 = vmax.xlane.f32.xlu1 %v1556_v40 }
 0xd94   :  { %v1555_v42 = vpop.xlane.xlu0 %1554 }
 0xd95   :  { %v1559_v21 = vsub.f32 %v1551_v28, %v1555_v42 }
 0xd97   :  { %v1561_v43 = vmul.f32 1.442695, %v1559_v21 }
 0xd99   :  { %7677 = vpow2.f32 %v1561_v43 }
 0xd9c   :  { %v1558_v23 = vpop.xlane.xlu1 %1557 }
 0xd9d   :  { %v1560_v44 = vsub.f32 %v1552_v27, %v1558_v23  ;;  %v7617_v27 = vld [vmem:[%s9277_s2 + $0xd0] sm:$0xff]  }
 0xd9f   :  { %v1563_v45 = vmul.f32 1.442695, %v1560_v44 }
 0xda1   :  { %7679 = vpow2.f32 %v1563_v45  ;;  %v8358_v45 = vld [vmem:[%s9276_s1 + $0x18] sm:$0xff] }
 0xda3   :  { %v7678_v30 = vpop.eup %7677 }
 0xda4   :  { %6730 = vmatprep.mubr.msk.f32.mxu0 %vm67_vm0, %v7678_v30 }
 0xdab   :  { %v7680_v46 = vpop.eup %7679 }
 0xdac   :  { %6731 = vmatmul.mubr.msk.f32.vlgmr.msra.gmra.mrb[42].mxu0 %vm67_vm0, %v7680_v46 }
 0xdad   :  { %7347 = vmatpush3.bf16.msra.mxu0 %v7346_v63  ;;  %6752 = vmatprep.mubr.msk.f32.mxu0 %vm7829_vm1, %v7828_v7 }
 0xdae   :  { %7348 = vmatprep.subr.bf16.mxu0 %v7832_v48 }
 0xdb1   :  { %7350 = vmatpush3.bf16.msra.mxu0 %v7349_v41  ;;  %v1874_v41 = vrot.slane %v7897_v19, %v9281_v5  ;;  %v7618_v19 = vld [vmem:[%s9277_s2 + $0xd8] sm:$0xff]  }
 0xdb2   :  { %6763 = vmatprep.subr.bf16.mxu0 %v7828_v7 }
 0xe7f   :  { %v6732_v60 = vpop.f32.mrb[42].mxu0 }
 0xe80   :  { %7681 = vrcp.f32 %v6732_v60  ;;  %v1637_v2 = vpop.f32.mrb[43].mxu0 }
 0xe81   :  { %7683 = vrcp.f32 %v1637_v2 }
 0xe8a   :  { %v7682_v3 = vpop.eup %7681 }
 0xe8b   :  { %v7684_v8 = vpop.eup %7683  ;;  %v1649_v47 = vmul.f32 %v7682_v3, %v7680_v46 }
 0xe8c   :  { %v1647_v1 = vmul.f32 %v7684_v8, %v7678_v30  ;;  %v2109_v30 = vmul.f32 %v8358_v45, %v8358_v45 }
 0xe8d   :  { %6753 = vmatmul.mubr.msk.f32.vlgmr.msra.gmra.mrb[44].mxu0 %vm67_vm0, %v1649_v47 }
 0xe8e   :  { %6742 = vmatmul.mubr.msk.f32.vlgmr.msra.gmra.mrb[24].mxu1 %vm67_vm0, %v1647_v1  ;;  %6767 = vmatprep.mubr.msk.bf16.mxu0 %vm7829_vm1, %v7828_v7  ;;  %v2113_v46 = vsel %vm67_vm0, %v2109_v30, 0.0 }
 0xe8f   :  { %6756 = vmatpush3.bf16.msra.mxu1 %v7611_v0  ;;  %6759 = vmatprep.mubr.msk.bf16.mxu1 %vm7829_vm1, %v7828_v7 }
 0xe90   :  { %6757 = vmatprep.subr.bf16.mxu1 %v7828_v7  ;;  %6764 = vmatpush3.bf16.msra.mxu0 %v7613_v37 }
 0xe91   :  { %6765 = vmatprep.subr.bf16.mxu0 %v7828_v7  ;;  %2114 = vadd.xlane.f32.xlu1 %v2113_v46 }
 0xe93   :  { %6758 = vmatpush3.bf16.msra.mxu1 %v7612_v52  ;;  %v8366_v52 = vld [vmem:[%s9276_s1 + $0x10] sm:$0xff] }
 0xe94   :  { %6771 = vmatprep.subr.bf16.mxu1 %v7828_v7 }
 0xf60   :  { %v1792_v58 = vpop.f32.mrb[44].mxu0 }
 0xf61   :  { %v1719_v9 = vpop.f32.mrb[24].mxu1  ;;  %v6754_v12 = vpop.f32.mrb[45].mxu0 }
 0xf62   :  { %v1796_v13 = vpack.c.bf16 %v1792_v58, %v1719_v9  ;;  %v6743_v49 = vpop.f32.mrb[25].mxu1  ;;  %v2108_v12 = vmul.f32 %v8366_v52, %v8366_v52 }
 0xf64   :  { %6760 = vmatmul.mubr.msk.bf16.vlgmr.msra.gmra.mrb[28].mxu1 %vm67_vm0, %v1796_v13  ;;  %v2110_v49 = vsel %vm67_vm0, %v2108_v12, 0.0 }
 0xf65   :  { %6779 = vmatprep.mubr.msk.bf16.mxu1 %vm7829_vm1, %v7828_v7 }
0x1037   :  { %v1846_v50 = vpop.f32.mrb[28].mxu1 }
0x1038   :  { %v1853_v20 = vadd.f32 %v1846_v50, %v8185_v54  ;;  %v6761_v24 = vpop.f32.mrb[29].mxu1  ;;  %v7614_v54 = vld [vmem:[%s9277_s2 + $0xb8] sm:$0xff]   ;;  %v7619_v50 = vld [vmem:[%s9277_s2 + $0x1c0] sm:$0xff]  }
0x1039   :  { %v1849_v29 = vpop.f32.mrb[30].mxu1  ;;  %6766 = vmatpush3.bf16.msra.mxu0 %v7614_v54  ;;  %v2115_v24 = vpop.xlane.xlu1 %2114 }
0x103a   :  { %v1854_v32 = vadd.f32 %v1849_v29, %v8187_v62  ;;  %v6762_v33 = vpop.f32.mrb[31].mxu1  ;;  %v1855_v34 = vmul.f32 %v1853_v20, %v1853_v20  ;;  %6783 = vmatprep.subr.bf16.mxu0 %v7828_v7  ;;  %v7615_v62 = vld [vmem:[%s9277_s2 + $0xc0] sm:$0xff]  }
0x103b   :  { %6772 = vmatpush3.bf16.msra.mxu1 %v7615_v62 }
0x103c   :  { %v1857_v55 = vsel %vm67_vm0, %v1855_v34, 0.0  ;;  %v1856_v35 = vmul.f32 %v1854_v32, %v1854_v32  ;;  %6773 = vmatprep.subr.bf16.mxu1 %v7828_v7 }
0x103d   :  { %1858 = vadd.xlane.f32.xlu0 %v1857_v55 }
0x103e   :  { %v1860_v36 = vsel %vm67_vm0, %v1856_v35, 0.0 }
0x103f   :  { %6774 = vmatpush3.bf16.msra.mxu1 %v7616_v38 }
0x1040   :  { %6775 = vmatprep.subr.bf16.mxu1 %v7828_v7 }
0x1041   :  { %1861 = vadd.xlane.f32.xlu0 %v1860_v36 }
0x1043   :  { %6776 = vmatpush3.bf16.msra.mxu1 %v7617_v27  ;;  %v7621_v27 = vld [vmem:[%s9277_s2 + $0xe0] sm:$0xff]  }
0x1044   :  { %6777 = vmatprep.subr.bf16.mxu1 %v7828_v7 }
0x1047   :  { %6778 = vmatpush3.bf16.msra.mxu1 %v7618_v19 }
0x10ca   :  { %v1859_v63 = vpop.xlane.xlu0 %1858 }
0x10cb   :  { %v1863_v56 = vmul.f32 0.03125, %v1859_v63  ;;  %v2037_v63 = vsub.s32 4, %v7891_v16 }
0x10cd   :  { %v1865_v10 = vadd.f32 1e-06, %v1863_v56 }
0x10ce   :  { %v1862_v22 = vpop.xlane.xlu0 %1861 }
0x10cf   :  { %7685 = vrsqrt.f32 %v1865_v10  ;;  %v1864_v4 = vmul.f32 0.03125, %v1862_v22 }
0x10d1   :  { %v1866_v6 = vadd.f32 1e-06, %v1864_v4  ;;  %v8385_v4 = vld [vmem:[%s9276_s1 + $0x190] sm:$0xff] }
0x10d3   :  { %7687 = vrsqrt.f32 %v1866_v6  ;;  %v2038_v6 = vrot.slane %v8385_v4, %v2037_v63 }
0x10d9   :  { %v7686_v26 = vpop.eup %7685 }
0x10da   :  { %v1869_v39 = vmul.f32 %v7686_v26, %v1853_v20  ;;  %v2126_v26 = vsub.s32 5, %v7891_v16 }
0x10dc   :  { %v1875_v15 = vmul.f32 %v1874_v41, %v1869_v39 }
0x10dd   :  { %v7688_v51 = vpop.eup %7687 }
0x10de   :  { %v1870_v28 = vmul.f32 %v7688_v51, %v1854_v32 }
0x10e0   :  { %v1876_v53 = vmul.f32 %v1874_v41, %v1870_v28 }
0x10e2   :  { %v1881_v59 = vpack.c.bf16 %v1876_v53, %v1875_v15  ;;  %v2127_v53 = vrot.slane %v8385_v4, %v2126_v26 }
0x10e4   :  { %6768 = vmatmul.mubr.msk.bf16.vlgmr.msra.gmra.mrb[48].mxu0 %vm67_vm0, %v1881_v59 }
0x10e5   :  { %6787 = vmatprep.mubr.msk.bf16.mxu0 %vm7829_vm1, %v7828_v7  ;;  %6784 = vmatpush3.bf16.msra.mxu0 %v7619_v50 }
0x10e6   :  { %6785 = vmatprep.subr.bf16.mxu0 %v7828_v7 }
0x11b7   :  { %v1931_v61 = vpop.f32.mrb[48].mxu0 }
0x11b8   :  { %v6769_v40 = vpop.f32.mrb[49].mxu0  ;;  %v1938_v21 = vmax.f32 %v1931_v61, 0.0 }
0x11b9   :  { %v1934_v42 = vpop.f32.mrb[50].mxu0 }
0x11ba   :  { %v1939_v43 = vmax.f32 %v1934_v42, 0.0  ;;  %v6770_v23 = vpop.f32.mrb[51].mxu0 }
0x11bc   :  { %v1948_v44 = vpack.c.bf16 %v1939_v43, %v1938_v21  ;;  %v7622_v21 = vld [vmem:[%s9277_s2 + $0xe8] sm:$0xff]  }
0x11be   :  { %6780 = vmatmul.mubr.msk.bf16.vlgmr.msra.gmra.mrb[32].mxu1 %vm1009_vm4, %v1948_v44 }
0x1291   :  { %v2010_v60 = vpop.f32.mrb[32].mxu1 }
0x1292   :  { %v2017_v2 = vadd.f32 %v2010_v60, %v1853_v20  ;;  %v6781_v3 = vpop.f32.mrb[33].mxu1  ;;  %v7620_v20 = vld [vmem:[%s9277_s2 + $0x1c8] sm:$0xff]  }
0x1293   :  { %v2013_v8 = vpop.f32.mrb[34].mxu1  ;;  %6786 = vmatpush3.bf16.msra.mxu0 %v7620_v20  ;;  %v8410_v3 = vld [vmem:[%s9276_s1 + $0xf0] sm:$0xff] }
0x1294   :  { %v2018_v47 = vadd.f32 %v2013_v8, %v1854_v32  ;;  %v6782_v0 = vpop.f32.mrb[35].mxu1  ;;  %v2019_v1 = vmul.f32 %v2017_v2, %v2017_v2  ;;  %6791 = vmatprep.subr.bf16.mxu0 %v7828_v7  ;;  %v2117_v32 = vmul.f32 0.03125, %v2115_v24  ;;  %6803 = vmatprep.mubr.msk.f32.mxu1 %vm162_vm2, %v8410_v3 }
0x1296   :  { %v2021_v58 = vsel %vm67_vm0, %v2019_v1, 0.0  ;;  %v2020_v9 = vmul.f32 %v2018_v47, %v2018_v47  ;;  %v2119_v35 = vadd.f32 1e-06, %v2117_v32  ;;  %v8427_v32 = vld [vmem:[%s9276_s1 + $0xf8] sm:$0xff] }
0x1297   :  { %2022 = vadd.xlane.f32.xlu0 %v2021_v58 }
0x1298   :  { %v2024_v13 = vsel %vm67_vm0, %v2020_v9, 0.0 }
0x129b   :  { %2025 = vadd.xlane.f32.xlu0 %v2024_v13 }
0x129f   :  { %2111 = vadd.xlane.f32.xlu0 %v2110_v49 }
0x1324   :  { %v2023_v29 = vpop.xlane.xlu0 %2022 }
0x1325   :  { %v2027_v33 = vmul.f32 0.03125, %v2023_v29 }
0x1327   :  { %v2029_v34 = vadd.f32 1e-06, %v2027_v33  ;;  %v8432_v33 = vld [vmem:[%s9276_s1 + $0x100] sm:$0xff] }
0x1328   :  { %v2026_v55 = vpop.xlane.xlu0 %2025 }
0x1329   :  { %7689 = vrsqrt.f32 %v2029_v34  ;;  %v2028_v36 = vmul.f32 0.03125, %v2026_v55  ;;  %v8445_v34 = vld [vmem:[%s9276_s1 + $0x108] sm:$0xff]  ;;  %v8452_v55 = vld [vmem:[%s9276_s1 + $0x110] sm:$0xff] }
0x132a   :  { %7691 = vrsqrt.f32 %v2119_v35  ;;  %v8463_v35 = vld [vmem:[%s9276_s1 + $0x118] sm:$0xff] }
0x132b   :  { %v2030_v37 = vadd.f32 1e-06, %v2028_v36  ;;  %v8470_v36 = vld [vmem:[%s9276_s1 + $0x120] sm:$0xff] }
0x132c   :  { %v2112_v54 = vpop.xlane.xlu0 %2111 }
0x132d   :  { %7693 = vrsqrt.f32 %v2030_v37  ;;  %v2116_v62 = vmul.f32 0.03125, %v2112_v54  ;;  %v8481_v37 = vld [vmem:[%s9276_s1 + $0x128] sm:$0xff]  ;;  %v8496_v54 = vld [vmem:[%s9276_s1 + $0x138] sm:$0xff] }
0x132f   :  { %v2118_v38 = vadd.f32 1e-06, %v2116_v62  ;;  %v8501_v62 = vld [vmem:[%s9276_s1 + $0x130] sm:$0xff] }
0x1331   :  { %7695 = vrsqrt.f32 %v2118_v38 }
0x1333   :  { %v7690_v56 = vpop.eup %7689 }
0x1334   :  { %v7692_v10 = vpop.eup %7691  ;;  %v2033_v22 = vmul.f32 %v7690_v56, %v2017_v2 }
0x1335   :  { %v2123_v51 = vmul.f32 %v7692_v10, %v8358_v45 }
0x1336   :  { %v2039_v28 = vmul.f32 %v2038_v6, %v2033_v22 }
0x1337   :  { %v7694_v39 = vpop.eup %7693  ;;  %v2129_v42 = vmul.f32 %v2127_v53, %v2123_v51  ;;  %v8515_v51 = vld [vmem:[%s9276_s1 + $0x140] sm:$0xff] }
0x1338   :  { %v2034_v41 = vmul.f32 %v7694_v39, %v2018_v47  ;;  %v8509_v39 = vld [vmem:[%s9276_s1 + $0x148] sm:$0xff] }
0x133a   :  { %v2040_v15 = vmul.f32 %v2038_v6, %v2034_v41 }
0x133b   :  { %v7696_v59 = vpop.eup %7695 }
0x133c   :  { %v2122_v19 = vmul.f32 %v7696_v59, %v8366_v52  ;;  %v2045_v61 = vpack.c.bf16 %v2040_v15, %v2039_v28 }
0x133e   :  { %6788 = vmatmul.mubr.msk.bf16.vlgmr.msra.gmra.mrb[52].mxu0 %vm67_vm0, %v2045_v61  ;;  %v2128_v40 = vmul.f32 %v2127_v53, %v2122_v19 }
0x133f   :  { %6792 = vmatpush3.bf16.msra.mxu0 %v7621_v27  ;;  %6795 = vmatprep.mubr.msk.bf16.mxu0 %vm7829_vm1, %v7828_v7 }
0x1340   :  { %6793 = vmatprep.subr.bf16.mxu0 %v7828_v7  ;;  %v2134_v43 = vpack.c.bf16 %v2129_v42, %v2128_v40 }
0x1343   :  { %6794 = vmatpush3.bf16.msra.mxu0 %v7622_v21  ;;  %v8525_v21 = vld [vmem:[%s9276_s1 + $0x158] sm:$0xff] }
0x1346   :  { %6796 = vmatmul.mubr.msk.bf16.vlgmr.msra.gmra.mrb[56].mxu0 %vm67_vm0, %v2134_v43 }
0x1347   :  { %6819 = vmatprep.mubr.msk.f32.mxu0 %vm162_vm2, %v8410_v3 }
0x1411   :  { %v2095_v23 = vpop.f32.mrb[52].mxu0 }
0x1412   :  { %v6789_v44 = vpop.f32.mrb[53].mxu0 }
0x1413   :  { %v2098_v30 = vpop.f32.mrb[54].mxu0 }
0x1414   :  { %v6790_v46 = vpop.f32.mrb[55].mxu0  ;;  %v8403_v60 = vpack.c.bf16 %v2098_v30, %v2095_v23  ;;  %v8405_v2 = vpack.i.bf16 %v2098_v30, %v2095_v23  ;;  %v8531_v23 = vld [vmem:[%s9276_s1 + $0x150] sm:$0xff] }
0x1419   :  { %v8416_v8 = vpop.f32.mrb[56].mxu0 }
0x141a   :  { %v6797_v47 = vpop.f32.mrb[57].mxu0 }
0x141b   :  { %v8418_v0 = vpop.f32.mrb[58].mxu0 }
0x141c   :  { %v7567_v1 = vpack.i.bf16 %v8418_v0, %v8416_v8  ;;  %v6798_v58 = vpop.f32.mrb[59].mxu0 }
0x141e   :  { %7568 = vrot.lane.b32.xlu1 %v7567_v1, %s7831_s28  ;;  %7563 = vrot.lane.b32.xlu0 %v7567_v1, %s7830_s27 }
0x1490   :  { %v7569_v9 = vpop.permute.xlu1 %7568  ;;  %v7564_v12 = vpop.permute.xlu0 %7563 }
0x1491   :  { %v7571_v13 = vunpack.i.h.bf16 %v7569_v9  ;;  %v7570_v49 = vunpack.i.l.bf16 %v7569_v9  ;;  %v7566_v50 = vunpack.i.h.bf16 %v7564_v12  ;;  %v7565_v20 = vunpack.i.l.bf16 %v7564_v12 }
0x1493   :  { %v7355_v24 = vpack.c.bf16 %v7571_v13, %v7570_v49  ;;  %v7351_v29 = vpack.c.bf16 %v7566_v50, %v7565_v20  ;;  %v8542_v49 = vld [vmem:[%s9276_s1 + $0x168] sm:$0xff]  ;;  %v8548_v20 = vld [vmem:[%s9276_s1 + $0x160] sm:$0xff] }
0x1495   :  { %7352 = vmatprep.subr.bf16.mxu1 %v7351_v29  ;;  %7356 = vmatprep.subr.bf16.mxu0 %v7355_v24 }
0x1496   :  { %7354 = vmatpush3.bf16.msra.mxu1 %v7351_v29  ;;  %7358 = vmatpush3.bf16.msra.mxu0 %v7355_v24 }
0x1497   :  { %7359 = vmatprep.subr.bf16.mxu1 %v7832_v48  ;;  %7367 = vmatprep.subr.bf16.mxu0 %v7832_v48 }
0x1499   :  { %6804 = vmatmul.mubr.msk.f32.vlgmr.msra.gmra.mrb[26].mxu1 %vm162_vm2, %v8427_v32  ;;  %6820 = vmatmul.mubr.msk.f32.vlgmr.msra.gmra.mrb[46].mxu0 %vm162_vm2, %v8427_v32 }
0x149a   :  { %6806 = vmatprep.mubr.msk.f32.mxu1 %vm162_vm2, %v8432_v33  ;;  %6822 = vmatprep.mubr.msk.f32.mxu0 %vm162_vm2, %v8432_v33 }
0x149d   :  { %6807 = vmatmul.mubr.msk.f32.gmra.mrb[36].mxu1 %vm162_vm2, %v8445_v34  ;;  %6823 = vmatmul.mubr.msk.f32.gmra.mrb[60].mxu0 %vm162_vm2, %v8445_v34 }
0x149e   :  { %6809 = vmatprep.mubr.msk.f32.mxu1 %vm162_vm2, %v8452_v55  ;;  %6825 = vmatprep.mubr.msk.f32.mxu0 %vm162_vm2, %v8452_v55 }
0x14a1   :  { %6810 = vmatmul.mubr.msk.f32.gmra.mrb[38].mxu1 %vm162_vm2, %v8463_v35  ;;  %6826 = vmatmul.mubr.msk.f32.gmra.mrb[62].mxu0 %vm162_vm2, %v8463_v35 }
0x14a2   :  { %6812 = vmatprep.mubr.msk.f32.mxu1 %vm162_vm2, %v8470_v36  ;;  %6828 = vmatprep.mubr.msk.f32.mxu0 %vm162_vm2, %v8470_v36 }
0x14a5   :  { %6813 = vmatmul.mubr.msk.f32.gmra.mrb[40].mxu1 %vm162_vm2, %v8481_v37  ;;  %6829 = vmatmul.mubr.msk.f32.gmra.mrb[64].mxu0 %vm162_vm2, %v8481_v37 }
0x14a6   :  { %6839 = vmatprep.mubr.msk.f32.mxu1 %vm7829_vm1, %v7828_v7  ;;  %6850 = vmatprep.mubr.msk.f32.mxu0 %vm7829_vm1, %v7828_v7 }
0x156c   :  { %v6805_v38 = vpop.f32.mrb[26].mxu1  ;;  %v6821_v63 = vpop.f32.mrb[46].mxu0 }
0x156d   :  { %v2333_v56 = vmul.f32 %v6805_v38, %v8496_v54  ;;  %v2293_v10 = vpop.f32.mrb[27].mxu1  ;;  %v2452_v22 = vmul.f32 %v6821_v63, %v8496_v54  ;;  %v2412_v6 = vpop.f32.mrb[47].mxu0 }
0x156e   :  { %v2332_v26 = vmul.f32 %v2293_v10, %v8501_v62  ;;  %v2451_v41 = vmul.f32 %v2412_v6, %v8501_v62 }
0x1570   :  { %v7360_v28 = vpack.c.bf16 %v2333_v56, %v2332_v26  ;;  %v6808_v15 = vpop.f32.mrb[36].mxu1  ;;  %v7384_v53 = vpack.c.bf16 %v2452_v22, %v2451_v41  ;;  %v6824_v59 = vpop.f32.mrb[60].mxu0 }
0x1571   :  { %v2335_v27 = vmul.f32 %v6808_v15, %v8509_v39  ;;  %v2303_v19 = vpop.f32.mrb[37].mxu1  ;;  %v2454_v61 = vmul.f32 %v6824_v59, %v8509_v39  ;;  %v2422_v40 = vpop.f32.mrb[61].mxu0 }
0x1572   :  { %v2334_v42 = vmul.f32 %v2303_v19, %v8515_v51  ;;  %7362 = vmatpush3.bf16.xpose.msk.msra.mxu1 %vm8015_vm3, %v7360_v28  ;;  %v2453_v43 = vmul.f32 %v2422_v40, %v8515_v51  ;;  %v8581_v19 = vld [vmem:[%s9276_s1 + $0x38] sm:$0xff] }
0x1573   :  { %7363 = vmatprep.subr.bf16.mxu1 %v7832_v48 }
0x1574   :  { %v7364_v44 = vpack.c.bf16 %v2335_v27, %v2334_v42  ;;  %v6811_v30 = vpop.f32.mrb[38].mxu1  ;;  %v7387_v46 = vpack.c.bf16 %v2454_v61, %v2453_v43  ;;  %v6827_v47 = vpop.f32.mrb[62].mxu0 }
0x1575   :  { %v2337_v1 = vmul.f32 %v6811_v30, %v8525_v21  ;;  %v2313_v58 = vpop.f32.mrb[39].mxu1  ;;  %v8536_v9 = vmul.f32 %v6827_v47, %v8525_v21  ;;  %v2432_v12 = vpop.f32.mrb[63].mxu0  ;;  %v58_v30 = vld [vmem:[%s9276_s1 + $0x178] sm:$0xff]  ;;  %v59_v47 = vld [vmem:[%s9276_s1 + $0x180] sm:$0xff] }
0x1576   :  { %v2336_v13 = vmul.f32 %v2313_v58, %v8531_v23  ;;  %v2455_v50 = vmul.f32 %v2432_v12, %v8531_v23 }
0x1578   :  { %v7368_v24 = vpack.c.bf16 %v2337_v1, %v2336_v13  ;;  %v6814_v29 = vpop.f32.mrb[40].mxu1  ;;  %v7390_v38 = vpack.c.bf16 %v8536_v9, %v2455_v50  ;;  %v6830_v6 = vpop.f32.mrb[64].mxu0  ;;  %v60_v1 = vld [vmem:[%s9276_s1 + $0x188] sm:$0xff] }
0x1579   :  { %v2339_v63 = vmul.f32 %v6814_v29, %v8542_v49  ;;  %v2323_v56 = vpop.f32.mrb[41].mxu1  ;;  %v2442_v26 = vpop.f32.mrb[65].mxu0  ;;  %v8601_v58 = vpack.c.bf16 %v60_v1, %v59_v47  ;;  %v8674_v47 = vld [vmem:[%s9276_s1 + $0x80] sm:$0xff]  ;;  %v8681_v1 = vld [vmem:[%s9276_s1 + $0x88] sm:$0xff] }
0x157a   :  { %7366 = vmatpush3.bf16.xpose.msk.msra.mxu1 %vm8015_vm3, %v7364_v44  ;;  %7370 = vmatpush3.bf16.xpose.msk.msra.mxu0 %vm8015_vm3, %v7368_v24  ;;  %v2338_v10 = vmul.f32 %v2323_v56, %v8548_v20  ;;  %v2457_v41 = vmul.f32 %v2442_v26, %v8548_v20  ;;  %v57_v44 = vld [vmem:[%s9276_s1 + $0x170] sm:$0xff] }
0x157b   :  { %7371 = vmatprep.subr.bf16.mxu0 %v7832_v48 }
0x157c   :  { %v7372_v22 = vpack.c.bf16 %v2339_v63, %v2338_v10 }
0x1581   :  { %6840 = vmatmul.mubr.msk.f32.vlgmr.msra.gmra.mrb[42].mxu1 %vm67_vm0, %v8416_v8  ;;  %v2458_v8 = vmul.f32 %v6830_v6, %v8542_v49 }
0x1582   :  { %7374 = vmatpush3.bf16.xpose.msk.msra.mxu0 %vm8015_vm3, %v7372_v22 }
0x1583   :  { %7383 = vmatprep.subr.bf16.mxu0 %v7832_v48  ;;  %v7393_v28 = vpack.c.bf16 %v2458_v8, %v2457_v41  ;;  %v7623_v41 = vld [vmem:[%s9277_s2 + $0xf0] sm:$0xff]  }
0x1589   :  { %6851 = vmatmul.mubr.msk.f32.vlgmr.msra.gmra.mrb[66].mxu0 %vm67_vm0, %v8418_v0  ;;  %v8574_v0 = vld [vmem:[%s9276_s1 + $0x30] sm:$0xff] }
0x158a   :  { %7385 = vmatpush3.bf16.msra.mxu0 %v7384_v53  ;;  %6872 = vmatprep.mubr.msk.f32.mxu0 %vm7829_vm1, %v7828_v7 }
0x158b   :  { %7386 = vmatprep.subr.bf16.mxu0 %v7832_v48 }
0x158e   :  { %7388 = vmatpush3.bf16.msra.mxu0 %v7387_v46  ;;  %v8591_v46 = vpack.c.bf16 %v58_v30, %v57_v44  ;;  %v8660_v44 = vld [vmem:[%s9276_s1 + $0x70] sm:$0xff]  ;;  %v8667_v30 = vld [vmem:[%s9276_s1 + $0x78] sm:$0xff] }
0x158f   :  { %6886 = vmatprep.subr.bf16.mxu0 %v7828_v7 }
0x1590   :  { %7376 = vmatprep.subr.bf16.mxu1 %v8591_v46 }
0x1591   :  { %7378 = vmatpush3.bf16.msra.mxu1 %v8591_v46 }
0x1592   :  { %7380 = vmatprep.subr.bf16.mxu1 %v8601_v58 }
0x1595   :  { %7382 = vmatpush3.bf16.msra.mxu1 %v8601_v58 }
0x1596   :  { %7389 = vmatprep.subr.bf16.mxu1 %v7832_v48 }
0x1654   :  { %v2539_v15 = vpop.f32.mrb[42].mxu1 }
0x1655   :  { %v2627_v53 = vadd.f32 %v2539_v15, %v8574_v0  ;;  %v6841_v59 = vpop.f32.mrb[43].mxu1 }
0x1657   :  { %v2629_v27 = vsel %vm67_vm0, %v2627_v53, -inf }
0x1658   :  { %2630 = vmax.xlane.f32.xlu1 %v2629_v27 }
0x165c   :  { %v2623_v61 = vpop.f32.mrb[66].mxu0 }
0x165d   :  { %v2628_v40 = vadd.f32 %v2623_v61, %v8581_v19  ;;  %v6852_v42 = vpop.f32.mrb[67].mxu0 }
0x165e   :  { %v8639_v42 = vld [vmem:[%s9276_s1 + $0x58] sm:$0xff] }
0x165f   :  { %v2632_v43 = vsel %vm67_vm0, %v2628_v40, -inf }
0x1660   :  { %2633 = vmax.xlane.f32.xlu0 %v2632_v43  ;;  %v8653_v43 = vld [vmem:[%s9276_s1 + $0x68] sm:$0xff] }
0x16e5   :  { %v2631_v9 = vpop.xlane.xlu1 %2630 }
0x16e6   :  { %v2635_v12 = vsub.f32 %v2627_v53, %v2631_v9 }
0x16e8   :  { %v2637_v13 = vmul.f32 1.442695, %v2635_v12 }
0x16ea   :  { %7697 = vpow2.f32 %v2637_v13 }
0x16ed   :  { %v2634_v50 = vpop.xlane.xlu0 %2633 }
0x16ee   :  { %v2636_v24 = vsub.f32 %v2628_v40, %v2634_v50  ;;  %v8631_v40 = vld [vmem:[%s9276_s1 + $0x50] sm:$0xff] }
0x16f0   :  { %v2639_v29 = vmul.f32 1.442695, %v2636_v24 }
0x16f2   :  { %7699 = vpow2.f32 %v2639_v29 }
0x16f4   :  { %v7698_v63 = vpop.eup %7697 }
0x16f5   :  { %6861 = vmatprep.mubr.msk.f32.mxu1 %vm67_vm0, %v7698_v63 }
0x16fc   :  { %v7700_v56 = vpop.eup %7699 }
0x16fd   :  { %6862 = vmatmul.mubr.msk.f32.vlgmr.msra.gmra.mrb[44].mxu1 %vm67_vm0, %v7700_v56 }
0x16fe   :  { %7391 = vmatpush3.bf16.msra.mxu1 %v7390_v38  ;;  %6883 = vmatprep.mubr.msk.f32.mxu1 %vm7829_vm1, %v7828_v7 }
0x16ff   :  { %7392 = vmatprep.subr.bf16.mxu1 %v7832_v48 }
0x1702   :  { %7394 = vmatpush3.bf16.msra.mxu1 %v7393_v28  ;;  %v7624_v28 = vld [vmem:[%s9277_s2 + $0xf8] sm:$0xff]  }
0x1703   :  { %6894 = vmatprep.subr.bf16.mxu1 %v7828_v7 }
0x17d0   :  { %v6863_v10 = vpop.f32.mrb[44].mxu1 }
0x17d1   :  { %7701 = vrcp.f32 %v6863_v10  ;;  %v2713_v22 = vpop.f32.mrb[45].mxu1 }
0x17d2   :  { %7703 = vrcp.f32 %v2713_v22 }
0x17db   :  { %v7702_v6 = vpop.eup %7701 }
0x17dc   :  { %v7704_v8 = vpop.eup %7703  ;;  %v2725_v26 = vmul.f32 %v7702_v6, %v7700_v56 }
0x17dd   :  { %v2723_v38 = vmul.f32 %v7704_v8, %v7698_v63  ;;  %v8711_v8 = vld [vmem:[%s9276_s1 + $0x98] sm:$0xff] }
0x17de   :  { %6884 = vmatmul.mubr.msk.f32.vlgmr.msra.gmra.mrb[46].mxu1 %vm67_vm0, %v2725_v26 }
0x17df   :  { %6873 = vmatmul.mubr.msk.f32.vlgmr.msra.gmra.mrb[68].mxu0 %vm67_vm0, %v2723_v38  ;;  %6898 = vmatprep.mubr.msk.bf16.mxu1 %vm7829_vm1, %v7828_v7  ;;  %v8717_v38 = vld [vmem:[%s9276_s1 + $0x90] sm:$0xff] }
0x17e0   :  { %6887 = vmatpush3.bf16.msra.mxu0 %v7623_v41  ;;  %6890 = vmatprep.mubr.msk.bf16.mxu0 %vm7829_vm1, %v7828_v7 }
0x17e1   :  { %6888 = vmatprep.subr.bf16.mxu0 %v7828_v7 }
0x17e4   :  { %6889 = vmatpush3.bf16.msra.mxu0 %v7624_v28 }
0x17e5   :  { %7396 = vmatprep.subr.bf16.mxu0 %v8403_v60 }
0x18b1   :  { %v2868_v15 = vpop.f32.mrb[46].mxu1 }
0x18b2   :  { %v2795_v53 = vpop.f32.mrb[68].mxu0  ;;  %v6885_v59 = vpop.f32.mrb[47].mxu1 }
0x18b3   :  { %v2872_v27 = vpack.c.bf16 %v2868_v15, %v2795_v53  ;;  %v6874_v61 = vpop.f32.mrb[69].mxu0  ;;  %v8723_v53 = vld [vmem:[%s9276_s1 + $0xa8] sm:$0xff] }
0x18b5   :  { %6891 = vmatmul.mubr.msk.bf16.vlgmr.msra.gmra.mrb[72].mxu0 %vm67_vm0, %v2872_v27 }
0x18b6   :  { %7398 = vmatpush3.bf16.msra.mxu0 %v8403_v60  ;;  %6906 = vmatprep.mubr.msk.f32.mxu0 %vm162_vm2, %v8631_v40  ;;  %v8646_v60 = vld [vmem:[%s9276_s1 + $0x60] sm:$0xff] }
0x18b7   :  { %7403 = vmatprep.subr.bf16.mxu0 %v7832_v48 }
0x18bd   :  { %6907 = vmatmul.mubr.msk.f32.vlgmr.msra.gmra.mrb[70].mxu0 %vm162_vm2, %v8639_v42 }
0x18be   :  { %6909 = vmatprep.mubr.msk.f32.mxu0 %vm162_vm2, %v8646_v60 }
0x18c1   :  { %6910 = vmatmul.mubr.msk.f32.gmra.mrb[76].mxu0 %vm162_vm2, %v8653_v43 }
0x18c2   :  { %6912 = vmatprep.mubr.msk.f32.mxu0 %vm162_vm2, %v8660_v44 }
0x18c5   :  { %6913 = vmatmul.mubr.msk.f32.gmra.mrb[78].mxu0 %vm162_vm2, %v8667_v30 }
0x18c6   :  { %6915 = vmatprep.mubr.msk.f32.mxu0 %vm162_vm2, %v8674_v47 }
0x18c9   :  { %6916 = vmatmul.mubr.msk.f32.gmra.mrb[80].mxu0 %vm162_vm2, %v8681_v1 }
0x18ca   :  { %6942 = vmatprep.mubr.msk.f32.mxu0 %vm7829_vm1, %v7828_v7 }
0x1988   :  { %v2922_v9 = vpop.f32.mrb[72].mxu0 }
0x1989   :  { %v8688_v12 = vadd.f32 %v2922_v9, %v8366_v52  ;;  %v6892_v13 = vpop.f32.mrb[73].mxu0  ;;  %v7625_v52 = vld [vmem:[%s9277_s2 + $0x100] sm:$0xff]  }
0x198a   :  { %v2925_v50 = vpop.f32.mrb[74].mxu0  ;;  %6895 = vmatpush3.bf16.msra.mxu1 %v7625_v52  ;;  %v8729_v9 = vld [vmem:[%s9276_s1 + $0xa0] sm:$0xff] }
0x198b   :  { %v8691_v24 = vadd.f32 %v2925_v50, %v8358_v45  ;;  %v6893_v29 = vpop.f32.mrb[75].mxu0  ;;  %v2931_v63 = vmul.f32 %v8688_v12, %v8688_v12  ;;  %6896 = vmatprep.subr.bf16.mxu1 %v7828_v7  ;;  %v7626_v45 = vld [vmem:[%s9277_s2 + $0x108] sm:$0xff]  }
0x198c   :  { %v8735_v29 = vld [vmem:[%s9276_s1 + $0xb8] sm:$0xff] }
0x198d   :  { %v2933_v56 = vsel %vm67_vm0, %v2931_v63, 0.0  ;;  %v2932_v10 = vmul.f32 %v8691_v24, %v8691_v24 }
0x198e   :  { %2934 = vadd.xlane.f32.xlu0 %v2933_v56  ;;  %6897 = vmatpush3.bf16.msra.mxu1 %v7626_v45 }
0x198f   :  { %v2936_v22 = vsel %vm67_vm0, %v2932_v10, 0.0 }
0x1990   :  { %2937 = vadd.xlane.f32.xlu1 %v2936_v22  ;;  %v6908_v6 = vpop.f32.mrb[70].mxu0  ;;  %v8743_v22 = vld [vmem:[%s9276_s1 + $0xb0] sm:$0xff] }
0x1991   :  { %v3124_v26 = vmul.f32 %v8711_v8, %v6908_v6  ;;  %v3084_v41 = vpop.f32.mrb[71].mxu0 }
0x1992   :  { %v3123_v28 = vmul.f32 %v8717_v38, %v3084_v41 }
0x1994   :  { %v6911_v15 = vpop.f32.mrb[76].mxu0  ;;  %v7404_v61 = vpack.c.bf16 %v3124_v26, %v3123_v28  ;;  %v8750_v26 = vld [vmem:[%s9276_s1 + $0xc8] sm:$0xff] }
0x1995   :  { %v3126_v59 = vmul.f32 %v8723_v53, %v6911_v15  ;;  %v3094_v27 = vpop.f32.mrb[77].mxu0  ;;  %v8756_v15 = vld [vmem:[%s9276_s1 + $0xc0] sm:$0xff] }
0x1996   :  { %v3125_v13 = vmul.f32 %v8729_v9, %v3094_v27  ;;  %7406 = vmatpush3.bf16.xpose.msk.msra.mxu0 %vm8015_vm3, %v7404_v61 }
0x1997   :  { %7407 = vmatprep.subr.bf16.mxu0 %v7832_v48 }
0x1998   :  { %v6914_v50 = vpop.f32.mrb[78].mxu0  ;;  %v7408_v10 = vpack.c.bf16 %v3126_v59, %v3125_v13 }
0x1999   :  { %v3128_v63 = vmul.f32 %v8735_v29, %v6914_v50  ;;  %v3104_v56 = vpop.f32.mrb[79].mxu0 }
0x199a   :  { %v3127_v52 = vmul.f32 %v8743_v22, %v3104_v56 }
0x199c   :  { %v7412_v45 = vpack.c.bf16 %v3128_v63, %v3127_v52  ;;  %v6917_v6 = vpop.f32.mrb[80].mxu0 }
0x199d   :  { %v3130_v41 = vmul.f32 %v8750_v26, %v6917_v6  ;;  %v3114_v28 = vpop.f32.mrb[81].mxu0 }
0x199e   :  { %v3129_v59 = vmul.f32 %v8756_v15, %v3114_v28  ;;  %7410 = vmatpush3.bf16.xpose.msk.msra.mxu0 %vm8015_vm3, %v7408_v10 }
0x199f   :  { %7420 = vmatprep.subr.bf16.mxu0 %v8104_v11 }
0x19a0   :  { %v7416_v27 = vpack.c.bf16 %v3130_v41, %v3129_v59  ;;  %v2949_v41 = vsub.s32 7, %v7891_v16 }
0x19a2   :  { %v2950_v59 = vrot.slane %v8385_v4, %v2949_v41 }
0x19a4   :  { %7573 = vrot.lane.b32.xlu0 %v8405_v2, %s7830_s27 }
0x1a1b   :  { %v2935_v61 = vpop.xlane.xlu0 %2934 }
0x1a1c   :  { %v2939_v13 = vmul.f32 0.03125, %v2935_v61 }
0x1a1d   :  { %v2938_v50 = vpop.xlane.xlu1 %2937 }
0x1a1e   :  { %v2941_v63 = vadd.f32 1e-06, %v2939_v13  ;;  %v2940_v56 = vmul.f32 0.03125, %v2938_v50 }
0x1a1f   :  { %v7574_v52 = vpop.permute.xlu0 %7573 }
0x1a20   :  { %7705 = vrsqrt.f32 %v2941_v63  ;;  %v2942_v6 = vadd.f32 1e-06, %v2940_v56  ;;  %v7576_v14 = vunpack.i.h.bf16 %v7574_v52  ;;  %v7575_v5 = vunpack.i.l.bf16 %v7574_v52 }
0x1a22   :  { %7707 = vrsqrt.f32 %v2942_v6  ;;  %v7399_v25 = vpack.c.bf16 %v7576_v14, %v7575_v5 }
0x1a24   :  { %7400 = vmatprep.subr.bf16.mxu1 %v7399_v25 }
0x1a2a   :  { %v7706_v28 = vpop.eup %7705 }
0x1a2b   :  { %v2945_v10 = vmul.f32 %v7706_v28, %v8688_v12 }
0x1a2c   :  { %v7708_v17 = vpop.eup %7707 }
0x1a2d   :  { %v2946_v61 = vmul.f32 %v7708_v17, %v8691_v24  ;;  %v2951_v13 = vmul.f32 %v2950_v59, %v2945_v10 }
0x1a2f   :  { %v2952_v50 = vmul.f32 %v2950_v59, %v2946_v61 }
0x1a31   :  { %v2957_v31 = vpack.c.bf16 %v2952_v50, %v2951_v13 }
0x1a33   :  { %6899 = vmatmul.mubr.msk.bf16.vlgmr.msra.gmra.mrb[48].mxu1 %vm67_vm0, %v2957_v31 }
0x1a34   :  { %7402 = vmatpush3.bf16.msra.mxu1 %v7399_v25  ;;  %6922 = vmatprep.mubr.msk.f32.mxu1 %vm162_vm2, %v8631_v40 }
0x1a35   :  { %7411 = vmatprep.subr.bf16.mxu1 %v7832_v48 }
0x1a3b   :  { %6923 = vmatmul.mubr.msk.f32.vlgmr.msra.gmra.mrb[52].mxu1 %vm162_vm2, %v8639_v42 }
0x1a3c   :  { %6925 = vmatprep.mubr.msk.f32.mxu1 %vm162_vm2, %v8646_v60 }
0x1a3d   :  { %7414 = vmatpush3.bf16.xpose.msk.msra.mxu1 %vm8015_vm3, %v7412_v45 }
0x1a3e   :  { %7415 = vmatprep.subr.bf16.mxu1 %v7832_v48 }
0x1a3f   :  { %6926 = vmatmul.mubr.msk.f32.gmra.mrb[54].mxu1 %vm162_vm2, %v8653_v43 }
0x1a40   :  { %6928 = vmatprep.mubr.msk.f32.mxu1 %vm162_vm2, %v8660_v44 }
0x1a43   :  { %6929 = vmatmul.mubr.msk.f32.gmra.mrb[56].mxu1 %vm162_vm2, %v8667_v30 }
0x1a44   :  { %6931 = vmatprep.mubr.msk.f32.mxu1 %vm162_vm2, %v8674_v47 }
0x1a45   :  { %7418 = vmatpush3.bf16.xpose.msk.msra.mxu1 %vm8015_vm3, %v7416_v27 }
0x1a46   :  { %7427 = vmatprep.subr.bf16.mxu1 %v7832_v48 }
0x1a47   :  { %6932 = vmatmul.mubr.msk.f32.gmra.mrb[58].mxu1 %vm162_vm2, %v8681_v1 }
0x1a48   :  { %6953 = vmatprep.mubr.msk.f32.mxu1 %vm7829_vm1, %v7828_v7 }
0x1b06   :  { %v3007_v14 = vpop.f32.mrb[48].mxu1 }
0x1b07   :  { %v6900_v17 = vpop.f32.mrb[49].mxu1  ;;  %6943 = vmatmul.mubr.msk.f32.vlgmr.msra.gmra.mrb[82].mxu0 %vm67_vm0, %v3007_v14 }
0x1b08   :  { %v3010_v25 = vpop.f32.mrb[50].mxu1  ;;  %7422 = vmatpush3.bf16.msra.mxu0 %v8104_v11 }
0x1b09   :  { %v6901_v31 = vpop.f32.mrb[51].mxu1  ;;  %6954 = vmatmul.mubr.msk.f32.vlgmr.msra.gmra.mrb[60].mxu1 %vm67_vm0, %v3010_v25  ;;  %7424 = vmatprep.subr.bf16.mxu0 %v8114_v18 }
0x1b0a   :  { %6975 = vmatprep.mubr.msk.f32.mxu1 %vm7829_vm1, %v7828_v7 }
0x1b0c   :  { %7426 = vmatpush3.bf16.msra.mxu0 %v8114_v18 }
0x1b0d   :  { %7433 = vmatprep.subr.bf16.mxu0 %v7832_v48 }
0x1b0e   :  { %v6924_v5 = vpop.f32.mrb[52].mxu1 }
0x1b0f   :  { %v3245_v45 = vmul.f32 %v8711_v8, %v6924_v5  ;;  %v3205_v27 = vpop.f32.mrb[53].mxu1 }
0x1b10   :  { %v3244_v63 = vmul.f32 %v8717_v38, %v3205_v27  ;;  %v8813_v27 = vld [vmem:[%s9276_s1 + $0x40] sm:$0xff] }
0x1b12   :  { %v7428_v56 = vpack.c.bf16 %v3245_v45, %v3244_v63  ;;  %v6927_v52 = vpop.f32.mrb[54].mxu1 }
0x1b13   :  { %v3247_v6 = vmul.f32 %v8723_v53, %v6927_v52  ;;  %v3215_v41 = vpop.f32.mrb[55].mxu1 }
0x1b14   :  { %v3246_v28 = vmul.f32 %v8729_v9, %v3215_v41  ;;  %7429 = vmatpush3.bf16.msra.mxu1 %v7428_v56  ;;  %v8818_v56 = vld [vmem:[%s9276_s1 + $0x48] sm:$0xff] }
0x1b15   :  { %7430 = vmatprep.subr.bf16.mxu1 %v7832_v48 }
0x1b16   :  { %v7431_v10 = vpack.c.bf16 %v3247_v6, %v3246_v28  ;;  %v6930_v59 = vpop.f32.mrb[56].mxu1 }
0x1b17   :  { %v3249_v61 = vmul.f32 %v8735_v29, %v6930_v59  ;;  %v3225_v13 = vpop.f32.mrb[57].mxu1 }
0x1b18   :  { %v3248_v50 = vmul.f32 %v8743_v22, %v3225_v13  ;;  %7432 = vmatpush3.bf16.msra.mxu1 %v7431_v10 }
0x1b19   :  { %6989 = vmatprep.subr.bf16.mxu1 %v7828_v7 }
0x1b1a   :  { %v7434_v14 = vpack.c.bf16 %v3249_v61, %v3248_v50  ;;  %v6933_v17 = vpop.f32.mrb[58].mxu1 }
0x1b1b   :  { %v3251_v25 = vmul.f32 %v8750_v26, %v6933_v17  ;;  %v3235_v31 = vpop.f32.mrb[59].mxu1 }
0x1b1c   :  { %v3250_v5 = vmul.f32 %v8756_v15, %v3235_v31 }
0x1b1e   :  { %v7437_v45 = vpack.c.bf16 %v3251_v25, %v3250_v5 }
0x1bda   :  { %v3333_v63 = vpop.f32.mrb[82].mxu0 }
0x1bdb   :  { %v3422_v52 = vadd.f32 %v3333_v63, %v8813_v27  ;;  %v6944_v6 = vpop.f32.mrb[83].mxu0 }
0x1bdc   :  { %v3418_v41 = vpop.f32.mrb[60].mxu1 }
0x1bdd   :  { %v3423_v28 = vadd.f32 %v3418_v41, %v8818_v56  ;;  %v6955_v10 = vpop.f32.mrb[61].mxu1  ;;  %v3424_v59 = vsel %vm67_vm0, %v3422_v52, -inf }
0x1bde   :  { %3425 = vmax.xlane.f32.xlu1 %v3424_v59 }
0x1bdf   :  { %v3427_v61 = vsel %vm67_vm0, %v3423_v28, -inf }
0x1be2   :  { %3428 = vmax.xlane.f32.xlu1 %v3427_v61  ;;  %v7627_v61 = vld [vmem:[%s9277_s2 + $0x110] sm:$0xff]  }
0x1c6b   :  { %v3426_v13 = vpop.xlane.xlu1 %3425 }
0x1c6c   :  { %v3430_v50 = vsub.f32 %v3422_v52, %v3426_v13 }
0x1c6e   :  { %v3432_v17 = vmul.f32 1.442695, %v3430_v50 }
0x1c6f   :  { %v3429_v25 = vpop.xlane.xlu1 %3428 }
0x1c70   :  { %7709 = vpow2.f32 %v3432_v17  ;;  %v3431_v31 = vsub.f32 %v3423_v28, %v3429_v25 }
0x1c72   :  { %v3434_v5 = vmul.f32 1.442695, %v3431_v31 }
0x1c74   :  { %7711 = vpow2.f32 %v3434_v5 }
0x1c7a   :  { %v7710_v63 = vpop.eup %7709 }
0x1c7b   :  { %6964 = vmatprep.mubr.msk.f32.mxu0 %vm67_vm0, %v7710_v63 }
0x1c7e   :  { %v7712_v6 = vpop.eup %7711 }
0x1c7f   :  { %6965 = vmatmul.mubr.msk.f32.vlgmr.msra.gmra.mrb[84].mxu0 %vm67_vm0, %v7712_v6 }
0x1c80   :  { %7435 = vmatpush3.bf16.msra.mxu0 %v7434_v14  ;;  %6986 = vmatprep.mubr.msk.f32.mxu0 %vm7829_vm1, %v7828_v7 }
0x1c81   :  { %7436 = vmatprep.subr.bf16.mxu0 %v7832_v48 }
0x1c84   :  { %7438 = vmatpush3.bf16.msra.mxu0 %v7437_v45  ;;  %v7628_v45 = vld [vmem:[%s9277_s2 + $0x118] sm:$0xff]  }
0x1c85   :  { %6997 = vmatprep.subr.bf16.mxu0 %v7828_v7 }
0x1d52   :  { %v6966_v52 = vpop.f32.mrb[84].mxu0 }
0x1d53   :  { %7713 = vrcp.f32 %v6966_v52  ;;  %v3508_v41 = vpop.f32.mrb[85].mxu0 }
0x1d54   :  { %7715 = vrcp.f32 %v3508_v41 }
0x1d5d   :  { %v7714_v28 = vpop.eup %7713 }
0x1d5e   :  { %v7716_v10 = vpop.eup %7715  ;;  %v3520_v59 = vmul.f32 %v7714_v28, %v7712_v6 }
0x1d5f   :  { %v3518_v14 = vmul.f32 %v7716_v10, %v7710_v63 }
0x1d60   :  { %6987 = vmatmul.mubr.msk.f32.vlgmr.msra.gmra.mrb[86].mxu0 %vm67_vm0, %v3520_v59 }
0x1d61   :  { %6976 = vmatmul.mubr.msk.f32.vlgmr.msra.gmra.mrb[62].mxu1 %vm67_vm0, %v3518_v14  ;;  %7001 = vmatprep.mubr.msk.bf16.mxu0 %vm7829_vm1, %v7828_v7 }
0x1d62   :  { %6990 = vmatpush3.bf16.msra.mxu1 %v7627_v61  ;;  %6993 = vmatprep.mubr.msk.bf16.mxu1 %vm7829_vm1, %v7828_v7 }
0x1d63   :  { %6991 = vmatprep.subr.bf16.mxu1 %v7828_v7 }
0x1d66   :  { %6992 = vmatpush3.bf16.msra.mxu1 %v7628_v45  ;;  %v7629_v45 = vld [vmem:[%s9277_s2 + $0x120] sm:$0xff]  }
0x1d67   :  { %7005 = vmatprep.subr.bf16.mxu1 %v7828_v7  ;;  %6998 = vmatpush3.bf16.msra.mxu0 %v7629_v45 }
0x1d68   :  { %6999 = vmatprep.subr.bf16.mxu0 %v7828_v7 }
0x1e33   :  { %v3663_v13 = vpop.f32.mrb[86].mxu0 }
0x1e34   :  { %v3590_v50 = vpop.f32.mrb[62].mxu1  ;;  %v6988_v17 = vpop.f32.mrb[87].mxu0 }
0x1e35   :  { %v3667_v25 = vpack.c.bf16 %v3663_v13, %v3590_v50  ;;  %v6977_v31 = vpop.f32.mrb[63].mxu1  ;;  %v7632_v13 = vld [vmem:[%s9277_s2 + $0x138] sm:$0xff]  }
0x1e37   :  { %6994 = vmatmul.mubr.msk.bf16.vlgmr.msra.gmra.mrb[64].mxu1 %vm67_vm0, %v3667_v25 }
0x1e38   :  { %7013 = vmatprep.mubr.msk.bf16.mxu1 %vm7829_vm1, %v7828_v7 }
0x1f0a   :  { %v3717_v5 = vpop.f32.mrb[64].mxu1 }
0x1f0b   :  { %v3724_v63 = vadd.f32 %v3717_v5, %v8688_v12  ;;  %v6995_v6 = vpop.f32.mrb[65].mxu1  ;;  %v7630_v12 = vld [vmem:[%s9277_s2 + $0x128] sm:$0xff]  }
0x1f0c   :  { %v3720_v52 = vpop.f32.mrb[66].mxu1  ;;  %7000 = vmatpush3.bf16.msra.mxu0 %v7630_v12 }
0x1f0d   :  { %v3725_v41 = vadd.f32 %v3720_v52, %v8691_v24  ;;  %v6996_v28 = vpop.f32.mrb[67].mxu1  ;;  %v3726_v10 = vmul.f32 %v3724_v63, %v3724_v63  ;;  %7017 = vmatprep.subr.bf16.mxu0 %v7828_v7  ;;  %v7631_v24 = vld [vmem:[%s9277_s2 + $0x130] sm:$0xff]  }
0x1f0e   :  { %7006 = vmatpush3.bf16.msra.mxu1 %v7631_v24  ;;  %v8870_v28 = vld [vmem:[%s9276_s1 + $0x198] sm:$0xf] }
0x1f0f   :  { %v3728_v59 = vsel %vm67_vm0, %v3726_v10, 0.0  ;;  %v3727_v61 = vmul.f32 %v3725_v41, %v3725_v41  ;;  %7007 = vmatprep.subr.bf16.mxu1 %v7828_v7 }
0x1f10   :  { %3729 = vadd.xlane.f32.xlu1 %v3728_v59  ;;  %v9287_v59 = vsub.s32 1, %v7891_v16 }
0x1f11   :  { %v3731_v14 = vsel %vm67_vm0, %v3727_v61, 0.0 }
0x1f12   :  { %7008 = vmatpush3.bf16.msra.mxu1 %v7632_v13  ;;  %v3745_v61 = vrot.slane %v8870_v28, %v9287_v59 }
0x1f13   :  { %7009 = vmatprep.subr.bf16.mxu1 %v7828_v7 }
0x1f14   :  { %3732 = vadd.xlane.f32.xlu1 %v3731_v14 }
0x1f9d   :  { %v3730_v50 = vpop.xlane.xlu1 %3729 }
0x1f9e   :  { %v3734_v17 = vmul.f32 0.03125, %v3730_v50  ;;  %v7633_v50 = vld [vmem:[%s9277_s2 + $0x140] sm:$0xff]  }
0x1f9f   :  { %7010 = vmatpush3.bf16.msra.mxu1 %v7633_v50 }
0x1fa0   :  { %v3736_v25 = vadd.f32 1e-06, %v3734_v17  ;;  %7011 = vmatprep.subr.bf16.mxu1 %v7828_v7  ;;  %v7634_v17 = vld [vmem:[%s9277_s2 + $0x148] sm:$0xff]  }
0x1fa1   :  { %v3733_v31 = vpop.xlane.xlu1 %3732 }
0x1fa2   :  { %7717 = vrsqrt.f32 %v3736_v25  ;;  %v3735_v5 = vmul.f32 0.03125, %v3733_v31 }
0x1fa3   :  { %7012 = vmatpush3.bf16.msra.mxu1 %v7634_v17 }
0x1fa4   :  { %v3737_v6 = vadd.f32 1e-06, %v3735_v5 }
0x1fa6   :  { %7719 = vrsqrt.f32 %v3737_v6 }
0x1fac   :  { %v7718_v52 = vpop.eup %7717 }
0x1fad   :  { %v3740_v10 = vmul.f32 %v7718_v52, %v3724_v63 }
0x1faf   :  { %v3746_v12 = vmul.f32 %v3745_v61, %v3740_v10 }
0x1fb0   :  { %v7720_v14 = vpop.eup %7719 }
0x1fb1   :  { %v3741_v45 = vmul.f32 %v7720_v14, %v3725_v41 }
0x1fb3   :  { %v3747_v24 = vmul.f32 %v3745_v61, %v3741_v45 }
0x1fb5   :  { %v3752_v13 = vpack.c.bf16 %v3747_v24, %v3746_v12 }
0x1fb7   :  { %7002 = vmatmul.mubr.msk.bf16.vlgmr.msra.gmra.mrb[88].mxu0 %vm67_vm0, %v3752_v13 }
0x1fb8   :  { %7021 = vmatprep.mubr.msk.bf16.mxu0 %vm7829_vm1, %v7828_v7 }
0x208a   :  { %v3802_v25 = vpop.f32.mrb[88].mxu0 }
0x208b   :  { %v7003_v31 = vpop.f32.mrb[89].mxu0  ;;  %v3809_v6 = vmax.f32 %v3802_v25, 0.0 }
0x208c   :  { %v3805_v5 = vpop.f32.mrb[90].mxu0 }
0x208d   :  { %v3810_v52 = vmax.f32 %v3805_v5, 0.0  ;;  %v7004_v10 = vpop.f32.mrb[91].mxu0 }
0x208f   :  { %v3819_v59 = vpack.c.bf16 %v3810_v52, %v3809_v6 }
0x2091   :  { %7014 = vmatmul.mubr.msk.bf16.vlgmr.msra.gmra.mrb[68].mxu1 %vm1009_vm4, %v3819_v59 }
0x2092   :  { %7045 = vmatprep.mubr.msk.f32.mxu1 %vm162_vm2, %v8410_v3 }
0x2164   :  { %v3881_v61 = vpop.f32.mrb[68].mxu1 }
0x2165   :  { %v8888_v14 = vadd.f32 %v3881_v61, %v3724_v63  ;;  %v7015_v45 = vpop.f32.mrb[69].mxu1  ;;  %v7635_v63 = vld [vmem:[%s9277_s2 + $0x150] sm:$0xff]  }
0x2166   :  { %v3884_v12 = vpop.f32.mrb[70].mxu1  ;;  %7018 = vmatpush3.bf16.msra.mxu0 %v7635_v63  ;;  %v3908_v45 = vsub.s32 6, %v7891_v16 }
0x2167   :  { %v8890_v24 = vadd.f32 %v3884_v12, %v3725_v41  ;;  %v7016_v13 = vpop.f32.mrb[71].mxu1  ;;  %v3890_v50 = vmul.f32 %v8888_v14, %v8888_v14  ;;  %v7636_v41 = vld [vmem:[%s9277_s2 + $0x158] sm:$0xff]   ;;  %7019 = vmatprep.subr.bf16.mxu0 %v7828_v7 }
0x2169   :  { %v3892_v17 = vsel %vm67_vm0, %v3890_v50, 0.0  ;;  %v3891_v25 = vmul.f32 %v8890_v24, %v8890_v24  ;;  %v3909_v50 = vrot.slane %v8385_v4, %v3908_v45 }
0x216a   :  { %3893 = vadd.xlane.f32.xlu1 %v3892_v17  ;;  %7020 = vmatpush3.bf16.msra.mxu0 %v7636_v41 }
0x216b   :  { %v3895_v31 = vsel %vm67_vm0, %v3891_v25, 0.0 }
0x216e   :  { %3896 = vadd.xlane.f32.xlu1 %v3895_v31 }
0x21f7   :  { %v3894_v5 = vpop.xlane.xlu1 %3893 }
0x21f8   :  { %v3898_v6 = vmul.f32 0.03125, %v3894_v5 }
0x21fa   :  { %v3900_v52 = vadd.f32 1e-06, %v3898_v6 }
0x21fb   :  { %v3897_v10 = vpop.xlane.xlu1 %3896 }
0x21fc   :  { %7721 = vrsqrt.f32 %v3900_v52  ;;  %v3899_v59 = vmul.f32 0.03125, %v3897_v10 }
0x21fe   :  { %v3901_v61 = vadd.f32 1e-06, %v3899_v59 }
0x2200   :  { %7723 = vrsqrt.f32 %v3901_v61 }
0x2206   :  { %v7722_v12 = vpop.eup %7721 }
0x2207   :  { %v3904_v13 = vmul.f32 %v7722_v12, %v8888_v14 }
0x2209   :  { %v3910_v31 = vmul.f32 %v3909_v50, %v3904_v13 }
0x220a   :  { %v7724_v17 = vpop.eup %7723 }
0x220b   :  { %v3905_v25 = vmul.f32 %v7724_v17, %v8890_v24 }
0x220d   :  { %v3911_v63 = vmul.f32 %v3909_v50, %v3905_v25 }
0x220f   :  { %v3916_v41 = vpack.c.bf16 %v3911_v63, %v3910_v31 }
0x2211   :  { %7022 = vmatmul.mubr.msk.bf16.vlgmr.msra.gmra.mrb[92].mxu0 %vm67_vm0, %v3916_v41 }
0x2212   :  { %7029 = vmatprep.mubr.msk.f32.mxu0 %vm162_vm2, %v8410_v3 }
0x22e4   :  { %v8912_v5 = vpop.f32.mrb[92].mxu0 }
0x22e5   :  { %v7023_v6 = vpop.f32.mrb[93].mxu0 }
0x22e6   :  { %v8914_v52 = vpop.f32.mrb[94].mxu0 }
0x22e7   :  { %v7582_v10 = vpack.i.bf16 %v8914_v52, %v8912_v5  ;;  %v7024_v4 = vpop.f32.mrb[95].mxu0 }
0x22e9   :  { %7583 = vrot.lane.b32.xlu1 %v7582_v10, %s7831_s28  ;;  %7578 = vrot.lane.b32.xlu0 %v7582_v10, %s7830_s27  ;;  %s7833_s27 = smov 32  }
0x235b   :  { %v7584_v59 = vpop.permute.xlu1 %7583  ;;  %v7579_v61 = vpop.permute.xlu0 %7578 }
0x235c   :  { %v7586_v45 = vunpack.i.h.bf16 %v7584_v59  ;;  %v7585_v12 = vunpack.i.l.bf16 %v7584_v59  ;;  %v7581_v13 = vunpack.i.h.bf16 %v7579_v61  ;;  %v7580_v50 = vunpack.i.l.bf16 %v7579_v61 }
0x235e   :  { %v7443_v3 = vpack.c.bf16 %v7586_v45, %v7585_v12  ;;  %v7439_v17 = vpack.c.bf16 %v7581_v13, %v7580_v50 }
0x2360   :  { %7440 = vmatprep.subr.bf16.mxu0 %v7439_v17  ;;  %7444 = vmatprep.subr.bf16.mxu1 %v7443_v3 }
0x2361   :  { %7442 = vmatpush3.bf16.msra.mxu0 %v7439_v17  ;;  %7446 = vmatpush3.bf16.msra.mxu1 %v7443_v3 }
0x2362   :  { %7447 = vmatprep.subr.bf16.mxu0 %v7832_v48  ;;  %7455 = vmatprep.subr.bf16.mxu1 %v7832_v48 }
0x2364   :  { %7030 = vmatmul.mubr.msk.f32.vlgmr.msra.gmra.mrb[96].mxu0 %vm162_vm2, %v8427_v32  ;;  %7046 = vmatmul.mubr.msk.f32.vlgmr.msra.gmra.mrb[72].mxu1 %vm162_vm2, %v8427_v32 }
0x2365   :  { %7032 = vmatprep.mubr.msk.f32.mxu0 %vm162_vm2, %v8432_v33  ;;  %7048 = vmatprep.mubr.msk.f32.mxu1 %vm162_vm2, %v8432_v33 }
0x2368   :  { %7033 = vmatmul.mubr.msk.f32.gmra.mrb[98].mxu0 %vm162_vm2, %v8445_v34  ;;  %7049 = vmatmul.mubr.msk.f32.gmra.mrb[74].mxu1 %vm162_vm2, %v8445_v34 }
0x2369   :  { %7035 = vmatprep.mubr.msk.f32.mxu0 %vm162_vm2, %v8452_v55  ;;  %7051 = vmatprep.mubr.msk.f32.mxu1 %vm162_vm2, %v8452_v55 }
0x236c   :  { %7036 = vmatmul.mubr.msk.f32.gmra.mrb[100].mxu0 %vm162_vm2, %v8463_v35  ;;  %7052 = vmatmul.mubr.msk.f32.gmra.mrb[76].mxu1 %vm162_vm2, %v8463_v35 }
0x236d   :  { %7038 = vmatprep.mubr.msk.f32.mxu0 %vm162_vm2, %v8470_v36  ;;  %7054 = vmatprep.mubr.msk.f32.mxu1 %vm162_vm2, %v8470_v36 }
0x2370   :  { %7039 = vmatmul.mubr.msk.f32.gmra.mrb[102].mxu0 %vm162_vm2, %v8481_v37  ;;  %7055 = vmatmul.mubr.msk.f32.gmra.mrb[78].mxu1 %vm162_vm2, %v8481_v37 }
0x2371   :  { %7065 = vmatprep.mubr.msk.f32.mxu0 %vm7829_vm1, %v7828_v7  ;;  %7076 = vmatprep.mubr.msk.f32.mxu1 %vm7829_vm1, %v7828_v7 }
0x2437   :  { %v7031_v32 = vpop.f32.mrb[96].mxu0  ;;  %v7047_v33 = vpop.f32.mrb[72].mxu1 }
0x2438   :  { %v4091_v34 = vmul.f32 %v7031_v32, %v8496_v54  ;;  %v4051_v55 = vpop.f32.mrb[97].mxu0  ;;  %v4210_v35 = vmul.f32 %v7047_v33, %v8496_v54  ;;  %v4170_v36 = vpop.f32.mrb[73].mxu1 }
0x2439   :  { %v4090_v25 = vmul.f32 %v4051_v55, %v8501_v62  ;;  %v4209_v31 = vmul.f32 %v4170_v36, %v8501_v62 }
0x243b   :  { %v7448_v63 = vpack.c.bf16 %v4091_v34, %v4090_v25  ;;  %v7034_v37 = vpop.f32.mrb[98].mxu0  ;;  %v7472_v41 = vpack.c.bf16 %v4210_v35, %v4209_v31  ;;  %v7050_v6 = vpop.f32.mrb[74].mxu1 }
0x243c   :  { %v4093_v10 = vmul.f32 %v7034_v37, %v8509_v39  ;;  %v4061_v4 = vpop.f32.mrb[99].mxu0  ;;  %v4212_v59 = vmul.f32 %v7050_v6, %v8509_v39  ;;  %v4180_v61 = vpop.f32.mrb[75].mxu1 }
0x243d   :  { %v4092_v45 = vmul.f32 %v4061_v4, %v8515_v51  ;;  %7450 = vmatpush3.bf16.xpose.msk.msra.mxu0 %vm8015_vm3, %v7448_v63  ;;  %v4211_v54 = vmul.f32 %v4180_v61, %v8515_v51 }
0x243e   :  { %7451 = vmatprep.subr.bf16.mxu0 %v7832_v48 }
0x243f   :  { %v7452_v62 = vpack.c.bf16 %v4093_v10, %v4092_v45  ;;  %v7037_v12 = vpop.f32.mrb[100].mxu0  ;;  %v7475_v13 = vpack.c.bf16 %v4212_v59, %v4211_v54  ;;  %v7053_v50 = vpop.f32.mrb[76].mxu1 }
0x2440   :  { %v4095_v3 = vmul.f32 %v7037_v12, %v8525_v21  ;;  %v4071_v17 = vpop.f32.mrb[101].mxu0  ;;  %v4214_v32 = vmul.f32 %v7053_v50, %v8525_v21  ;;  %v4190_v39 = vpop.f32.mrb[77].mxu1 }
0x2441   :  { %v4094_v33 = vmul.f32 %v4071_v17, %v8531_v23  ;;  %v4213_v34 = vmul.f32 %v4190_v39, %v8531_v23 }
0x2443   :  { %v7456_v55 = vpack.c.bf16 %v4095_v3, %v4094_v33  ;;  %v7040_v35 = vpop.f32.mrb[102].mxu0  ;;  %v7478_v36 = vpack.c.bf16 %v4214_v32, %v4213_v34  ;;  %v7056_v23 = vpop.f32.mrb[78].mxu1  ;;  %v7637_v32 = vld [vmem:[%s9277_s2 + $0x170] sm:$0xff]   ;;  %v7639_v34 = vld [vmem:[%s9277_s2 + $0x160] sm:$0xff]  }
0x2444   :  { %v4097_v51 = vmul.f32 %v7040_v35, %v8542_v49  ;;  %v4081_v25 = vpop.f32.mrb[103].mxu0 }
0x2445   :  { %7454 = vmatpush3.bf16.xpose.msk.msra.mxu0 %vm8015_vm3, %v7452_v62  ;;  %7458 = vmatpush3.bf16.xpose.msk.msra.mxu1 %vm8015_vm3, %v7456_v55  ;;  %v4096_v31 = vmul.f32 %v4081_v25, %v8548_v20 }
0x2446   :  { %7459 = vmatprep.subr.bf16.mxu1 %v7832_v48  ;;  %7464 = vmatprep.subr.bf16.mxu0 %v8591_v46 }
0x2447   :  { %v7460_v21 = vpack.c.bf16 %v4097_v51, %v4096_v31  ;;  %v7638_v51 = vld [vmem:[%s9277_s2 + $0x178] sm:$0xff]   ;;  %v7640_v31 = vld [vmem:[%s9277_s2 + $0x168] sm:$0xff]  }
0x244c   :  { %7066 = vmatmul.mubr.msk.f32.vlgmr.msra.gmra.mrb[104].mxu0 %vm67_vm0, %v8912_v5  ;;  %v4200_v5 = vpop.f32.mrb[79].mxu1 }
0x244d   :  { %7462 = vmatpush3.bf16.xpose.msk.msra.mxu1 %vm8015_vm3, %v7460_v21  ;;  %7466 = vmatpush3.bf16.msra.mxu0 %v8591_v46  ;;  %v4216_v46 = vmul.f32 %v7056_v23, %v8542_v49 }
0x244e   :  { %7471 = vmatprep.subr.bf16.mxu1 %v7832_v48  ;;  %7468 = vmatprep.subr.bf16.mxu0 %v8601_v58 }
0x2451   :  { %7470 = vmatpush3.bf16.msra.mxu0 %v8601_v58  ;;  %v4215_v58 = vmul.f32 %v4200_v5, %v8548_v20 }
0x2452   :  { %7477 = vmatprep.subr.bf16.mxu0 %v7832_v48 }
0x2453   :  { %v7481_v63 = vpack.c.bf16 %v4216_v46, %v4215_v58 }
0x2454   :  { %7077 = vmatmul.mubr.msk.f32.vlgmr.msra.gmra.mrb[80].mxu1 %vm67_vm0, %v8914_v52 }
0x2455   :  { %7473 = vmatpush3.bf16.msra.mxu1 %v7472_v41  ;;  %7098 = vmatprep.mubr.msk.f32.mxu1 %vm7829_vm1, %v7828_v7 }
0x2456   :  { %7474 = vmatprep.subr.bf16.mxu1 %v7832_v48 }
0x2459   :  { %7476 = vmatpush3.bf16.msra.mxu1 %v7475_v13 }
0x245a   :  { %7112 = vmatprep.subr.bf16.mxu1 %v7828_v7 }
0x251f   :  { %v4297_v37 = vpop.f32.mrb[104].mxu0 }
0x2520   :  { %v4385_v6 = vadd.f32 %v4297_v37, %v8574_v0  ;;  %v7067_v52 = vpop.f32.mrb[105].mxu0 }
0x2522   :  { %v4387_v41 = vsel %vm67_vm0, %v4385_v6, -inf }
0x2523   :  { %4388 = vmax.xlane.f32.xlu0 %v4387_v41 }
0x2527   :  { %v4381_v10 = vpop.f32.mrb[80].mxu1 }
0x2528   :  { %v4386_v4 = vadd.f32 %v4381_v10, %v8581_v19  ;;  %v7078_v59 = vpop.f32.mrb[81].mxu1 }
0x252a   :  { %v4390_v61 = vsel %vm67_vm0, %v4386_v4, -inf }
0x252b   :  { %4391 = vmax.xlane.f32.xlu1 %v4390_v61 }
0x253c   :  { %7593 = vrot.lane.b32.xlu1 %v8405_v2, %s7833_s27 }
0x25b0   :  { %v4389_v49 = vpop.xlane.xlu0 %4388 }
0x25b1   :  { %v4393_v20 = vsub.f32 %v4385_v6, %v4389_v49 }
0x25b3   :  { %v4395_v45 = vmul.f32 1.442695, %v4393_v20 }
0x25b5   :  { %7725 = vpow2.f32 %v4395_v45 }
0x25b8   :  { %v4392_v54 = vpop.xlane.xlu1 %4391 }
0x25b9   :  { %v4394_v0 = vsub.f32 %v4386_v4, %v4392_v54 }
0x25bb   :  { %v4397_v62 = vmul.f32 1.442695, %v4394_v0 }
0x25bc   :  { %v7594_v17 = vpop.permute.xlu1 %7593 }
0x25bd   :  { %7727 = vpow2.f32 %v4397_v62  ;;  %v7596_v35 = vunpack.i.h.bf16 %v7594_v17 }
0x25bf   :  { %v7726_v12 = vpop.eup %7725 }
0x25c0   :  { %7087 = vmatprep.mubr.msk.f32.mxu0 %vm67_vm0, %v7726_v12 }
0x25c7   :  { %v7728_v13 = vpop.eup %7727 }
0x25c8   :  { %7088 = vmatmul.mubr.msk.f32.vlgmr.msra.gmra.mrb[106].mxu0 %vm67_vm0, %v7728_v13 }
0x25c9   :  { %7479 = vmatpush3.bf16.msra.mxu0 %v7478_v36  ;;  %7109 = vmatprep.mubr.msk.f32.mxu0 %vm7829_vm1, %v7828_v7  ;;  %v7595_v36 = vunpack.i.l.bf16 %v7594_v17 }
0x25ca   :  { %7480 = vmatprep.subr.bf16.mxu0 %v7832_v48 }
0x25cb   :  { %v7487_v25 = vpack.c.bf16 %v7596_v35, %v7595_v36 }
0x25cd   :  { %7482 = vmatpush3.bf16.msra.mxu0 %v7481_v63 }
0x25ce   :  { %7120 = vmatprep.subr.bf16.mxu0 %v7828_v7 }
0x269b   :  { %v7089_v19 = vpop.f32.mrb[106].mxu0 }
0x269c   :  { %7729 = vrcp.f32 %v7089_v19  ;;  %v4471_v50 = vpop.f32.mrb[107].mxu0 }
0x269d   :  { %7731 = vrcp.f32 %v4471_v50 }
0x26a6   :  { %v7730_v3 = vpop.eup %7729 }
0x26a7   :  { %v7732_v39 = vpop.eup %7731  ;;  %v4483_v33 = vmul.f32 %v7730_v3, %v7728_v13 }
0x26a8   :  { %v4481_v55 = vmul.f32 %v7732_v39, %v7726_v12 }
0x26a9   :  { %7110 = vmatmul.mubr.msk.f32.vlgmr.msra.gmra.mrb[108].mxu0 %vm67_vm0, %v4483_v33 }
0x26aa   :  { %7121 = vmatpush3.bf16.msra.mxu0 %v7637_v32  ;;  %7099 = vmatmul.mubr.msk.f32.vlgmr.msra.gmra.mrb[82].mxu1 %vm67_vm0, %v4481_v55 }
0x26ab   :  { %7122 = vmatprep.subr.bf16.mxu0 %v7828_v7  ;;  %7113 = vmatpush3.bf16.msra.mxu1 %v7639_v34 }
0x26ac   :  { %7114 = vmatprep.subr.bf16.mxu1 %v7828_v7  ;;  %7116 = vmatprep.mubr.msk.bf16.mxu1 %vm7829_vm1, %v7828_v7 }
0x26ad   :  { %7124 = vmatprep.mubr.msk.bf16.mxu0 %vm7829_vm1, %v7828_v7 }
0x26ae   :  { %7123 = vmatpush3.bf16.msra.mxu0 %v7638_v51 }
0x26af   :  { %7488 = vmatprep.subr.bf16.mxu0 %v7487_v25  ;;  %7115 = vmatpush3.bf16.msra.mxu1 %v7640_v31 }
0x277c   :  { %v4626_v21 = vpop.f32.mrb[108].mxu0 }
0x277d   :  { %v4553_v23 = vpop.f32.mrb[82].mxu1  ;;  %v7111_v46 = vpop.f32.mrb[109].mxu0 }
0x277e   :  { %v4630_v5 = vpack.c.bf16 %v4626_v21, %v4553_v23  ;;  %v7100_v58 = vpop.f32.mrb[83].mxu1 }
0x2780   :  { %7117 = vmatmul.mubr.msk.bf16.vlgmr.msra.gmra.mrb[84].mxu1 %vm67_vm0, %v4630_v5 }
0x2781   :  { %7132 = vmatprep.mubr.msk.f32.mxu1 %vm162_vm2, %v8631_v40 }
0x2853   :  { %v4680_v63 = vpop.f32.mrb[84].mxu1 }
0x2854   :  { %v9029_v37 = vadd.f32 %v4680_v63, %v8888_v14  ;;  %v7118_v6 = vpop.f32.mrb[85].mxu1 }
0x2855   :  { %v4683_v52 = vpop.f32.mrb[86].mxu1 }
0x2856   :  { %v9032_v41 = vadd.f32 %v4683_v52, %v8890_v24  ;;  %v7119_v10 = vpop.f32.mrb[87].mxu1  ;;  %v4689_v4 = vmul.f32 %v9029_v37, %v9029_v37 }
0x2858   :  { %v4691_v59 = vsel %vm67_vm0, %v4689_v4, 0.0  ;;  %v4690_v61 = vmul.f32 %v9032_v41, %v9032_v41 }
0x2859   :  { %4692 = vadd.xlane.f32.xlu0 %v4691_v59 }
0x285a   :  { %v4694_v49 = vsel %vm67_vm0, %v4690_v61, 0.0 }
0x285d   :  { %4695 = vadd.xlane.f32.xlu0 %v4694_v49 }
0x2873   :  { %7588 = vrot.lane.b32.xlu0 %v8405_v2, %s7831_s28  ;;  %v9288_v2 = vsub.s32 0, %v7891_v16 }
0x2875   :  { %v4708_v3 = vrot.slane %v8870_v28, %v9288_v2 }
0x28e6   :  { %v4693_v14 = vpop.xlane.xlu0 %4692 }
0x28e7   :  { %v4697_v20 = vmul.f32 0.03125, %v4693_v14 }
0x28e9   :  { %v4699_v24 = vadd.f32 1e-06, %v4697_v20 }
0x28ea   :  { %v4696_v45 = vpop.xlane.xlu0 %4695 }
0x28eb   :  { %7733 = vrsqrt.f32 %v4699_v24  ;;  %v4698_v54 = vmul.f32 0.03125, %v4696_v45 }
0x28ed   :  { %v4700_v0 = vadd.f32 1e-06, %v4698_v54 }
0x28ee   :  { %v7589_v62 = vpop.permute.xlu0 %7588 }
0x28ef   :  { %7735 = vrsqrt.f32 %v4700_v0  ;;  %v7591_v12 = vunpack.i.h.bf16 %v7589_v62  ;;  %v7590_v13 = vunpack.i.l.bf16 %v7589_v62 }
0x28f1   :  { %v7483_v19 = vpack.c.bf16 %v7591_v12, %v7590_v13 }
0x28f3   :  { %7484 = vmatprep.subr.bf16.mxu1 %v7483_v19 }
0x28f4   :  { %7486 = vmatpush3.bf16.msra.mxu1 %v7483_v19 }
0x28f5   :  { %v7734_v50 = vpop.eup %7733  ;;  %7491 = vmatprep.subr.bf16.mxu1 %v7832_v48 }
0x28f6   :  { %v4703_v17 = vmul.f32 %v7734_v50, %v9029_v37 }
0x28f7   :  { %7133 = vmatmul.mubr.msk.f32.vlgmr.msra.gmra.mrb[88].mxu1 %vm162_vm2, %v8639_v42 }
0x28f8   :  { %7135 = vmatprep.mubr.msk.f32.mxu1 %vm162_vm2, %v8646_v60  ;;  %v4709_v33 = vmul.f32 %v4708_v3, %v4703_v17 }
0x28f9   :  { %v7736_v32 = vpop.eup %7735 }
0x28fa   :  { %v4704_v39 = vmul.f32 %v7736_v32, %v9032_v41 }
0x28fb   :  { %7136 = vmatmul.mubr.msk.f32.gmra.mrb[90].mxu1 %vm162_vm2, %v8653_v43 }
0x28fc   :  { %7138 = vmatprep.mubr.msk.f32.mxu1 %vm162_vm2, %v8660_v44  ;;  %v4710_v34 = vmul.f32 %v4708_v3, %v4704_v39 }
0x28fe   :  { %v4715_v55 = vpack.c.bf16 %v4710_v34, %v4709_v33 }
0x28ff   :  { %7139 = vmatmul.mubr.msk.f32.gmra.mrb[92].mxu1 %vm162_vm2, %v8667_v30 }
0x2900   :  { %7125 = vmatmul.mubr.msk.bf16.vlgmr.msra.gmra.mrb[112].mxu0 %vm67_vm0, %v4715_v55  ;;  %7141 = vmatprep.mubr.msk.f32.mxu1 %vm162_vm2, %v8674_v47 }
0x2901   :  { %7490 = vmatpush3.bf16.msra.mxu0 %v7487_v25  ;;  %7148 = vmatprep.mubr.msk.f32.mxu0 %vm162_vm2, %v8631_v40 }
0x2902   :  { %7499 = vmatprep.subr.bf16.mxu0 %v7832_v48 }
0x2903   :  { %7142 = vmatmul.mubr.msk.f32.gmra.mrb[94].mxu1 %vm162_vm2, %v8681_v1 }
0x2904   :  { %7168 = vmatprep.mubr.msk.f32.mxu1 %vm7829_vm1, %v7828_v7 }
0x2908   :  { %7149 = vmatmul.mubr.msk.f32.vlgmr.msra.gmra.mrb[110].mxu0 %vm162_vm2, %v8639_v42 }
0x2909   :  { %7151 = vmatprep.mubr.msk.f32.mxu0 %vm162_vm2, %v8646_v60 }
0x290c   :  { %7152 = vmatmul.mubr.msk.f32.gmra.mrb[116].mxu0 %vm162_vm2, %v8653_v43 }
0x290d   :  { %7154 = vmatprep.mubr.msk.f32.mxu0 %vm162_vm2, %v8660_v44 }
0x2910   :  { %7155 = vmatmul.mubr.msk.f32.gmra.mrb[118].mxu0 %vm162_vm2, %v8667_v30 }
0x2911   :  { %7157 = vmatprep.mubr.msk.f32.mxu0 %vm162_vm2, %v8674_v47 }
0x2914   :  { %7158 = vmatmul.mubr.msk.f32.gmra.mrb[120].mxu0 %vm162_vm2, %v8681_v1 }
0x2915   :  { %7179 = vmatprep.mubr.msk.f32.mxu0 %vm7829_vm1, %v7828_v7 }
0x29ca   :  { %v7134_v40 = vpop.f32.mrb[88].mxu1 }
0x29cb   :  { %v4888_v42 = vmul.f32 %v8711_v8, %v7134_v40  ;;  %v4848_v60 = vpop.f32.mrb[89].mxu1 }
0x29cc   :  { %v4887_v43 = vmul.f32 %v8717_v38, %v4848_v60 }
0x29ce   :  { %v7492_v35 = vpack.c.bf16 %v4888_v42, %v4887_v43  ;;  %v7137_v44 = vpop.f32.mrb[90].mxu1 }
0x29cf   :  { %v4890_v36 = vmul.f32 %v8723_v53, %v7137_v44  ;;  %v4858_v30 = vpop.f32.mrb[91].mxu1 }
0x29d0   :  { %7494 = vmatpush3.bf16.xpose.msk.msra.mxu1 %vm8015_vm3, %v7492_v35  ;;  %v4889_v47 = vmul.f32 %v8729_v9, %v4858_v30  ;;  %v7641_v30 = vld [vmem:[%s9277_s2 + $0x180] sm:$0xff]  }
0x29d1   :  { %7495 = vmatprep.subr.bf16.mxu1 %v7832_v48 }
0x29d2   :  { %v7496_v1 = vpack.c.bf16 %v4890_v36, %v4889_v47  ;;  %v7140_v51 = vpop.f32.mrb[92].mxu1 }
0x29d3   :  { %v4892_v25 = vmul.f32 %v8735_v29, %v7140_v51  ;;  %v4765_v31 = vpop.f32.mrb[112].mxu0  ;;  %v4868_v21 = vpop.f32.mrb[93].mxu1 }
0x29d4   :  { %v4891_v23 = vmul.f32 %v8743_v22, %v4868_v21  ;;  %v7126_v46 = vpop.f32.mrb[113].mxu0 }
0x29d5   :  { %v4768_v5 = vpop.f32.mrb[114].mxu0 }
0x29d6   :  { %v7500_v58 = vpack.c.bf16 %v4892_v25, %v4891_v23  ;;  %v7127_v63 = vpop.f32.mrb[115].mxu0  ;;  %v7143_v6 = vpop.f32.mrb[94].mxu1 }
0x29d7   :  { %v4894_v52 = vmul.f32 %v8750_v26, %v7143_v6  ;;  %v4878_v10 = vpop.f32.mrb[95].mxu1 }
0x29d8   :  { %7498 = vmatpush3.bf16.xpose.msk.msra.mxu1 %vm8015_vm3, %v7496_v1  ;;  %7502 = vmatpush3.bf16.xpose.msk.msra.mxu0 %vm8015_vm3, %v7500_v58  ;;  %v4893_v4 = vmul.f32 %v8756_v15, %v4878_v10 }
0x29d9   :  { %7503 = vmatprep.subr.bf16.mxu0 %v7832_v48  ;;  %7508 = vmatprep.subr.bf16.mxu1 %v8104_v11 }
0x29da   :  { %v7504_v59 = vpack.c.bf16 %v4894_v52, %v4893_v4 }
0x29db   :  { %v7150_v61 = vpop.f32.mrb[110].mxu0 }
0x29dc   :  { %v5007_v49 = vmul.f32 %v8711_v8, %v7150_v61  ;;  %v4967_v14 = vpop.f32.mrb[111].mxu0  ;;  %v7645_v61 = vld [vmem:[%s9277_s2 + $0x1a0] sm:$0xff]  }
0x29dd   :  { %v5006_v20 = vmul.f32 %v8717_v38, %v4967_v14 }
0x29df   :  { %7169 = vmatmul.mubr.msk.f32.vlgmr.msra.gmra.mrb[96].mxu1 %vm67_vm0, %v4765_v31  ;;  %v7516_v24 = vpack.c.bf16 %v5007_v49, %v5006_v20  ;;  %v7153_v45 = vpop.f32.mrb[116].mxu0  ;;  %v7646_v49 = vld [vmem:[%s9277_s2 + $0x1a8] sm:$0xff]  }
0x29e0   :  { %7506 = vmatpush3.bf16.xpose.msk.msra.mxu0 %vm8015_vm3, %v7504_v59  ;;  %7510 = vmatpush3.bf16.msra.mxu1 %v8104_v11  ;;  %v5009_v57 = vmul.f32 %v8723_v53, %v7153_v45  ;;  %v4977_v8 = vpop.f32.mrb[117].mxu0 }
0x29e1   :  { %7515 = vmatprep.subr.bf16.mxu0 %v7832_v48  ;;  %7512 = vmatprep.subr.bf16.mxu1 %v8114_v18  ;;  %v5008_v11 = vmul.f32 %v8729_v9, %v4977_v8 }
0x29e3   :  { %v7519_v38 = vpack.c.bf16 %v5009_v57, %v5008_v11  ;;  %v7156_v54 = vpop.f32.mrb[118].mxu0 }
0x29e4   :  { %7514 = vmatpush3.bf16.msra.mxu1 %v8114_v18  ;;  %v4987_v0 = vpop.f32.mrb[119].mxu0  ;;  %v5011_v18 = vmul.f32 %v8735_v29, %v7156_v54  ;;  %v9289_v54 = vsub.s32 2, %v7891_v16 }
0x29e5   :  { %7521 = vmatprep.subr.bf16.mxu1 %v7832_v48  ;;  %v5010_v62 = vmul.f32 %v8743_v22, %v4987_v0 }
0x29e6   :  { %v5507_v0 = vrot.slane %v8870_v28, %v9289_v54 }
0x29e7   :  { %7180 = vmatmul.mubr.msk.f32.vlgmr.msra.gmra.mrb[122].mxu0 %vm67_vm0, %v4768_v5  ;;  %v7522_v12 = vpack.c.bf16 %v5011_v18, %v5010_v62  ;;  %v7159_v13 = vpop.f32.mrb[120].mxu0 }
0x29e8   :  { %7517 = vmatpush3.bf16.msra.mxu0 %v7516_v24  ;;  %7201 = vmatprep.mubr.msk.f32.mxu0 %vm7829_vm1, %v7828_v7  ;;  %v5013_v19 = vmul.f32 %v8750_v26, %v7159_v13  ;;  %v4997_v50 = vpop.f32.mrb[121].mxu0 }
0x29e9   :  { %7518 = vmatprep.subr.bf16.mxu0 %v7832_v48  ;;  %v5012_v53 = vmul.f32 %v8756_v15, %v4997_v50  ;;  %v7647_v50 = vld [vmem:[%s9277_s2 + $0x1b0] sm:$0xff]  }
0x29eb   :  { %v7525_v2 = vpack.c.bf16 %v5013_v19, %v5012_v53  ;;  %v7648_v53 = vld [vmem:[%s9277_s2 + $0x1b8] sm:$0xff]  }
0x29ec   :  { %7520 = vmatpush3.bf16.msra.mxu0 %v7519_v38 }
0x29ed   :  { %7215 = vmatprep.subr.bf16.mxu0 %v7828_v7 }
0x2ab2   :  { %v5095_v3 = vpop.f32.mrb[96].mxu1 }
0x2ab3   :  { %v5184_v9 = vadd.f32 %v5095_v3, %v8813_v27  ;;  %v7170_v17 = vpop.f32.mrb[97].mxu1 }
0x2ab5   :  { %v5186_v32 = vsel %vm67_vm0, %v5184_v9, -inf }
0x2ab6   :  { %5187 = vmax.xlane.f32.xlu0 %v5186_v32 }
0x2aba   :  { %v5180_v29 = vpop.f32.mrb[122].mxu0 }
0x2abb   :  { %v5185_v22 = vadd.f32 %v5180_v29, %v8818_v56  ;;  %v7181_v39 = vpop.f32.mrb[123].mxu0 }
0x2abc   :  { %v7649_v39 = vld [vmem:[%s9277_s2] sm:$0xff]  }
0x2abd   :  { %v5189_v33 = vsel %vm67_vm0, %v5185_v22, -inf }
0x2abe   :  { %5190 = vmax.xlane.f32.xlu1 %v5189_v33  ;;  %v5737_v33 = vsel %vm67_vm0, %v7649_v39, 0 }
0x2b43   :  { %v5188_v34 = vpop.xlane.xlu0 %5187 }
0x2b44   :  { %v5192_v26 = vsub.f32 %v5184_v9, %v5188_v34  ;;  %v7650_v34 = vld [vmem:[%s9277_s2 + $0x8] sm:$0xff]  }
0x2b46   :  { %v5194_v55 = vmul.f32 1.442695, %v5192_v26  ;;  %v5740_v26 = vsel %vm67_vm0, %v7650_v34, 0 }
0x2b48   :  { %7737 = vpow2.f32 %v5194_v55  ;;  %v7651_v55 = vld [vmem:[%s9277_s2 + $0x10] sm:$0xff]  }
0x2b4b   :  { %v5191_v15 = vpop.xlane.xlu1 %5190 }
0x2b4c   :  { %v5193_v40 = vsub.f32 %v5185_v22, %v5191_v15  ;;  %v5743_v15 = vsel %vm67_vm0, %v7651_v55, 0 }
0x2b4e   :  { %v5196_v42 = vmul.f32 1.442695, %v5193_v40  ;;  %v7652_v40 = vld [vmem:[%s9277_s2 + $0x18] sm:$0xff]  }
0x2b50   :  { %7739 = vpow2.f32 %v5196_v42  ;;  %v5746_v42 = vsel %vm67_vm0, %v7652_v40, 0 }
0x2b52   :  { %v7738_v27 = vpop.eup %7737 }
0x2b53   :  { %7190 = vmatprep.mubr.msk.f32.mxu1 %vm67_vm0, %v7738_v27 }
0x2b5a   :  { %v7740_v60 = vpop.eup %7739 }
0x2b5b   :  { %7191 = vmatmul.mubr.msk.f32.vlgmr.msra.gmra.mrb[98].mxu1 %vm67_vm0, %v7740_v60 }
0x2b5c   :  { %7523 = vmatpush3.bf16.msra.mxu1 %v7522_v12  ;;  %7212 = vmatprep.mubr.msk.f32.mxu1 %vm7829_vm1, %v7828_v7 }
0x2b5d   :  { %7524 = vmatprep.subr.bf16.mxu1 %v7832_v48  ;;  %v7642_v48 = vld [vmem:[%s9277_s2 + $0x188] sm:$0xff]  }
0x2b60   :  { %7526 = vmatpush3.bf16.msra.mxu1 %v7525_v2 }
0x2b61   :  { %7223 = vmatprep.subr.bf16.mxu1 %v7828_v7 }
0x2c2e   :  { %v7192_v56 = vpop.f32.mrb[98].mxu1 }
0x2c2f   :  { %7741 = vrcp.f32 %v7192_v56  ;;  %v5270_v43 = vpop.f32.mrb[99].mxu1 }
0x2c30   :  { %7743 = vrcp.f32 %v5270_v43 }
0x2c39   :  { %v7742_v35 = vpop.eup %7741 }
0x2c3a   :  { %v7744_v44 = vpop.eup %7743  ;;  %v5282_v36 = vmul.f32 %v7742_v35, %v7740_v60 }
0x2c3b   :  { %v5280_v47 = vmul.f32 %v7744_v44, %v7738_v27  ;;  %v7653_v27 = vld [vmem:[%s9277_s2 + $0x20] sm:$0xff]  }
0x2c3c   :  { %7213 = vmatmul.mubr.msk.f32.vlgmr.msra.gmra.mrb[100].mxu1 %vm67_vm0, %v5282_v36  ;;  %v5749_v60 = vsel %vm67_vm0, %v7653_v27, 0 }
0x2c3d   :  { %7202 = vmatmul.mubr.msk.f32.vlgmr.msra.gmra.mrb[124].mxu0 %vm67_vm0, %v5280_v47  ;;  %7227 = vmatprep.mubr.msk.bf16.mxu1 %vm7829_vm1, %v7828_v7 }
0x2c3e   :  { %7216 = vmatpush3.bf16.msra.mxu0 %v7641_v30  ;;  %7219 = vmatprep.mubr.msk.bf16.mxu0 %vm7829_vm1, %v7828_v7 }
0x2c3f   :  { %7217 = vmatprep.subr.bf16.mxu0 %v7828_v7 }
0x2c42   :  { %7218 = vmatpush3.bf16.msra.mxu0 %v7642_v48 }
0x2c43   :  { %7231 = vmatprep.subr.bf16.mxu0 %v7828_v7 }
0x2d0f   :  { %v5425_v1 = vpop.f32.mrb[100].mxu1 }
0x2d10   :  { %v5352_v51 = vpop.f32.mrb[124].mxu0  ;;  %v7214_v25 = vpop.f32.mrb[101].mxu1 }
0x2d11   :  { %v5429_v31 = vpack.c.bf16 %v5425_v1, %v5352_v51  ;;  %v7203_v21 = vpop.f32.mrb[125].mxu0  ;;  %v7654_v25 = vld [vmem:[%s9277_s2 + $0x28] sm:$0xff]  }
0x2d12   :  { %v7655_v21 = vld [vmem:[%s9277_s2 + $0x30] sm:$0xff]  }
0x2d13   :  { %7220 = vmatmul.mubr.msk.bf16.vlgmr.msra.gmra.mrb[128].mxu0 %vm67_vm0, %v5429_v31  ;;  %v5752_v31 = vsel %vm67_vm0, %v7654_v25, 0 }
0x2d14   :  { %7239 = vmatprep.mubr.msk.bf16.mxu0 %vm7829_vm1, %v7828_v7  ;;  %7232 = vmatpush3.bf16.msra.mxu0 %v7645_v61 }
0x2d15   :  { %7233 = vmatprep.subr.bf16.mxu0 %v7828_v7 }
0x2d18   :  { %7234 = vmatpush3.bf16.msra.mxu0 %v7646_v49 }
0x2d19   :  { %7235 = vmatprep.subr.bf16.mxu0 %v7828_v7 }
0x2d1c   :  { %7236 = vmatpush3.bf16.msra.mxu0 %v7647_v50 }
0x2d1d   :  { %7237 = vmatprep.subr.bf16.mxu0 %v7828_v7 }
0x2d20   :  { %7238 = vmatpush3.bf16.msra.mxu0 %v7648_v53 }
0x2de6   :  { %v5479_v23 = vpop.f32.mrb[128].mxu0 }
0x2de7   :  { %v9150_v46 = vadd.f32 %v5479_v23, %v9029_v37  ;;  %v7221_v5 = vpop.f32.mrb[129].mxu0  ;;  %v7643_v37 = vld [vmem:[%s9277_s2 + $0x190] sm:$0xff]   ;;  %v5755_v23 = vsel %vm67_vm0, %v7655_v21, 0 }
0x2de8   :  { %v5482_v58 = vpop.f32.mrb[130].mxu0  ;;  %7224 = vmatpush3.bf16.msra.mxu1 %v7643_v37 }
0x2de9   :  { %v9153_v63 = vadd.f32 %v5482_v58, %v9032_v41  ;;  %v7222_v6 = vpop.f32.mrb[131].mxu0  ;;  %v5488_v52 = vmul.f32 %v9150_v46, %v9150_v46  ;;  %v7644_v41 = vld [vmem:[%s9277_s2 + $0x198] sm:$0xff]   ;;  %7225 = vmatprep.subr.bf16.mxu1 %v7828_v7 }
0x2deb   :  { %v5490_v10 = vsel %vm67_vm0, %v5488_v52, 0.0  ;;  %v5489_v4 = vmul.f32 %v9153_v63, %v9153_v63 }
0x2dec   :  { %5491 = vadd.xlane.f32.xlu0 %v5490_v10  ;;  %7226 = vmatpush3.bf16.msra.mxu1 %v7644_v41  ;;  %v9290_v41 = vsub.s32 3, %v7891_v16 }
0x2ded   :  { %v5493_v59 = vsel %vm67_vm0, %v5489_v4, 0.0  ;;  %7243 = vmatprep.subr.bf16.mxu1 %v7828_v7 }
0x2dee   :  { %v5671_v61 = vrot.slane %v8870_v28, %v9290_v41  ;;  %v5803_v28 = vld [vmem:[%s9275_s0] sm:$0xff] }
0x2def   :  { %vm5845_vm7 = vcmp.ne.s32.totalorder %v5803_v28, 4294967196 }
0x2df0   :  { %5494 = vadd.xlane.f32.xlu0 %v5493_v59 }
0x2e79   :  { %v5492_v14 = vpop.xlane.xlu0 %5491 }
0x2e7a   :  { %v5496_v20 = vmul.f32 0.03125, %v5492_v14 }
0x2e7c   :  { %v5498_v24 = vadd.f32 1e-06, %v5496_v20 }
0x2e7d   :  { %v5495_v45 = vpop.xlane.xlu0 %5494 }
0x2e7e   :  { %7745 = vrsqrt.f32 %v5498_v24  ;;  %v5497_v57 = vmul.f32 0.03125, %v5495_v45 }
0x2e80   :  { %v5499_v8 = vadd.f32 1e-06, %v5497_v57 }
0x2e82   :  { %7747 = vrsqrt.f32 %v5499_v8 }
0x2e88   :  { %v7746_v11 = vpop.eup %7745 }
0x2e89   :  { %v5502_v38 = vmul.f32 %v7746_v11, %v9150_v46  ;;  %v7834_v11 = vmov 0  }
0x2e8a   :  { %7597 = vset.pattern.permute.xlu1 %v7834_v11  ;;  %7598 = vset.pattern.permute.xlu0 %v7834_v11 }
0x2e8b   :  { %v5508_v12 = vmul.f32 %v5507_v0, %v5502_v38 }
0x2e8c   :  { %v7748_v18 = vpop.eup %7747 }
0x2e8d   :  { %v5503_v62 = vmul.f32 %v7748_v18, %v9153_v63  ;;  %v5804_v18 = vld [vmem:[%s9275_s0 + $0x8] sm:$0xff]  ;;  %s7835_s0 = smov [#allocation2]  }
0x2e8e   :  { %vm5846_vm8 = vcmp.ne.s32.totalorder %v5804_v18, 4294967196  ;;  %s5892_s29 = sshll.u32 %s7835_s0, 4  ;;  %s5893_s29 = int_to_ptr.vmem [resolvable:$true] %s5892_s29 }
0x2e8f   :  { %v5509_v13 = vmul.f32 %v5507_v0, %v5503_v62  ;;  %s7780_s30 = scalar_lea.vmem %s5893_s29, 256  ;;  %p7785_p1 = scmp.lt.s32.totalorder %s5893_s29, %s5893_s29 }
0x2e90   :  { %p7781_p0 = scmp.ne.s32.totalorder %s5893_s29, %s7780_s30  ;;  %p7786_p2 = scmp.lt.s32.totalorder %s7780_s30, %s7780_s30 }
0x2e91   :  { %v5514_v19 = vpack.c.bf16 %v5509_v13, %v5508_v12 }
0x2e92   :  { %p7787_p3 = por %p7786_p2, %p7785_p1 }
0x2e93   :  { %7228 = vmatmul.mubr.msk.bf16.vlgmr.msra.gmra.mrb[104].mxu1 %vm67_vm0, %v5514_v19 }
0x2e94   :  { %7259 = vmatprep.mubr.msk.bf16.mxu1 %vm7829_vm1, %v7828_v7  ;;  %7244 = vmatpush3.bf16.xpose.msra.mxu1 %v5737_v33  ;;  %p7788_p4 = pnand %p7787_p3, %p7781_p0 }
0x2e95   :  { %7245 = vmatprep.subr.bf16.mxu1 %v7828_v7 }
0x2e9c   :  { %7246 = vmatpush3.bf16.xpose.msra.mxu1 %v5740_v26 }
0x2e9d   :  { %7247 = vmatprep.subr.bf16.mxu1 %v7828_v7 }
0x2ea4   :  { %7248 = vmatpush3.bf16.xpose.msra.mxu1 %v5743_v15 }
0x2ea5   :  { %7249 = vmatprep.subr.bf16.mxu1 %v7828_v7 }
0x2eac   :  { %7250 = vmatpush3.bf16.xpose.msra.mxu1 %v5746_v42 }
0x2ead   :  { %7251 = vmatprep.subr.bf16.mxu1 %v7828_v7 }
0x2eb4   :  { %7252 = vmatpush3.bf16.xpose.msra.mxu1 %v5749_v60 }
0x2eb5   :  { %7253 = vmatprep.subr.bf16.mxu1 %v7828_v7 }
0x2ebc   :  { %7254 = vmatpush3.bf16.xpose.msra.mxu1 %v5752_v31 }
0x2ebd   :  { %7255 = vmatprep.subr.bf16.mxu1 %v7828_v7 }
0x2ec4   :  { %7256 = vmatpush3.bf16.xpose.msra.mxu1 %v5755_v23 }
0x2ec5   :  { %7257 = vmatprep.subr.bf16.mxu1 %v7828_v7 }
0x2f66   :  { %v5564_v2 = vpop.f32.mrb[104].mxu1 }
0x2f67   :  { %v7229_v3 = vpop.f32.mrb[105].mxu1  ;;  %v5571_v17 = vmax.f32 %v5564_v2, 0.0  ;;  %v9291_v2 = vlaneseq }
0x2f68   :  { %v5567_v9 = vpop.f32.mrb[106].mxu1 }
0x2f69   :  { %v5572_v32 = vmax.f32 %v5567_v9, 0.0  ;;  %v7230_v29 = vpop.f32.mrb[107].mxu1  ;;  %v5826_v3 = vand.u32 127, %v9291_v2 }
0x2f6b   :  { %v5581_v22 = vpack.c.bf16 %v5572_v32, %v5571_v17 }
0x2f6d   :  { %7240 = vmatmul.mubr.msk.bf16.vlgmr.msra.gmra.mrb[132].mxu0 %vm1009_vm4, %v5581_v22 }
0x3040   :  { %v5643_v56 = vpop.f32.mrb[132].mxu0 }
0x3041   :  { %v5650_v43 = vadd.f32 %v5643_v56, %v9150_v46  ;;  %v7241_v35 = vpop.f32.mrb[133].mxu0  ;;  %v7656_v46 = vld [vmem:[%s9277_s2 + $0x38] sm:$0xff]  }
0x3042   :  { %v5646_v44 = vpop.f32.mrb[134].mxu0  ;;  %v5758_v5 = vsel %vm67_vm0, %v7656_v46, 0 }
0x3043   :  { %v5651_v36 = vadd.f32 %v5646_v44, %v9153_v63  ;;  %v7242_v30 = vpop.f32.mrb[135].mxu0  ;;  %v5652_v47 = vmul.f32 %v5650_v43, %v5650_v43  ;;  %7258 = vmatpush3.bf16.xpose.msra.mxu1 %v5758_v5 }
0x3045   :  { %v5654_v48 = vsel %vm67_vm0, %v5652_v47, 0.0  ;;  %v5653_v1 = vmul.f32 %v5651_v36, %v5651_v36 }
0x3046   :  { %5655 = vadd.xlane.f32.xlu0 %v5654_v48 }
0x3047   :  { %v5657_v51 = vsel %vm67_vm0, %v5653_v1, 0.0 }
0x304a   :  { %5658 = vadd.xlane.f32.xlu0 %v5657_v51 }
0x30d3   :  { %v5656_v58 = vpop.xlane.xlu0 %5655 }
0x30d4   :  { %v5660_v63 = vmul.f32 0.03125, %v5656_v58 }
0x30d6   :  { %v5662_v6 = vadd.f32 1e-06, %v5660_v63 }
0x30d7   :  { %v5659_v52 = vpop.xlane.xlu0 %5658 }
0x30d8   :  { %7749 = vrsqrt.f32 %v5662_v6  ;;  %v5661_v10 = vmul.f32 0.03125, %v5659_v52 }
0x30da   :  { %v5663_v4 = vadd.f32 1e-06, %v5661_v10 }
0x30dc   :  { %7751 = vrsqrt.f32 %v5663_v4 }
0x30e2   :  { %v7750_v59 = vpop.eup %7749 }
0x30e3   :  { %v5666_v37 = vmul.f32 %v7750_v59, %v5650_v43  ;;  %v6179_v43 = vsel %vm5845_vm7, 1.0, %v7828_v7 }
0x30e4   :  { %v5869_v31 = vsel %vm5855_vm9, %v6179_v43, 0.0 }
0x30e5   :  { %v5672_v20 = vmul.f32 %v5671_v61, %v5666_v37 }
0x30e6   :  { %v7752_v49 = vpop.eup %7751 }
0x30e7   :  { %v5667_v14 = vmul.f32 %v7752_v49, %v5651_v36  ;;  %v5674_v45 = vmul.f32 0.17677669, %v5672_v20  ;;  %v6180_v36 = vsel %vm5846_vm8, 1.0, %v7828_v7 }
0x30e8   :  { %v5870_v21 = vsel %vm5855_vm9, %v6180_v36, 0.0 }
0x30e9   :  { %v5673_v24 = vmul.f32 %v5671_v61, %v5667_v14  ;;  %v5871_v46 = vadd.f32 %v5870_v21, %v5869_v31 }
0x30eb   :  { %v5675_v57 = vmul.f32 0.17677669, %v5673_v24 }
0x30ed   :  { %v5676_v8 = vpack.c.bf16 %v5675_v57, %v5674_v45 }
0x30ef   :  { %7260 = vmatmul.mubr.msk.bf16.vlgmr.msra.gmra.mrb[108].mxu1 %vm67_vm0, %v5676_v8 }
0x31c2   :  { %v5794_v38 = vpop.f32.mrb[108].mxu1 }
0x31c3   :  { %5801 = vst [vmem:[#allocation2] sm:$0xff] %v5794_v38  ;;  %5805 = vmax.xlane.f32.xlu1 %v5794_v38  ;;  %v7261_v54 = vpop.f32.mrb[109].mxu1 }
0x31c4   :  { %v5797_v0 = vpop.f32.mrb[110].mxu1 }
0x31c5   :  { %5802 = vst [vmem:[#allocation2 + $0x8] sm:$0xff] %v5797_v0  ;;  %5807 = vmax.xlane.f32.xlu0 %v5797_v0  ;;  %v7262_v16 = vpop.f32.mrb[111].mxu1 }
0x31d4   :  { %5828 = vperm.xlu1 %7597, %v5803_v28  }
0x31db   :  { %5831 = vperm.xlu0 %7598, %v5804_v18  }
0x3250   :  { %v5806_v62 = vpop.xlane.xlu1 %5805 }
0x3251   :  { %v5809_v12 = vsub.f32 %v5794_v38, %v5806_v62 }
0x3252   :  { %v5808_v13 = vpop.xlane.xlu0 %5807 }
0x3253   :  { %v5811_v19 = vmul.f32 1.442695, %v5809_v12  ;;  %v5810_v50 = vsub.f32 %v5797_v0, %v5808_v13 }
0x3254   :  { %v5829_v9 = vpop.permute.xlu1 %5828 }
0x3255   :  { %7753 = vpow2.f32 %v5811_v19  ;;  %v5813_v53 = vmul.f32 1.442695, %v5810_v50  ;;  %vm5833_vm5 = vcmp.eq.s32.totalorder %v5826_v3, %v5829_v9 }
0x3256   :  { %v6177_v29 = vsel %vm5833_vm5, 1.0, %v7828_v7 }
0x3257   :  { %7755 = vpow2.f32 %v5813_v53  ;;  %v5839_v39 = vmul.f32 %v6177_v29, %v5794_v38 }
0x325a   :  { %v5832_v17 = vpop.permute.xlu0 %5831 }
0x325b   :  { %vm5834_vm6 = vcmp.eq.s32.totalorder %v5826_v3, %v5832_v17 }
0x325c   :  { %v6178_v33 = vsel %vm5834_vm6, 1.0, %v7828_v7 }
0x325d   :  { %v5840_v34 = vmul.f32 %v6178_v33, %v5797_v0 }
0x325f   :  { %v7754_v32 = vpop.eup %7753 }
0x3260   :  { %5815 = vadd.xlane.f32.xlu1 %v7754_v32 }
0x3261   :  { %v7756_v22 = vpop.eup %7755 }
0x3262   :  { %5817 = vadd.xlane.f32.xlu0 %v7756_v22 }
0x3264   :  { %5841 = vadd.xlane.f32.xlu1 %v5839_v39 }
0x3268   :  { %5843 = vadd.xlane.f32.xlu1 %v5840_v34 }
0x32ed   :  { %v5816_v26 = vpop.xlane.xlu1 %5815 }
0x32ee   :  { %7757 = vlog2.f32 %v5816_v26 }
0x32ef   :  { %v5818_v55 = vpop.xlane.xlu0 %5817 }
0x32f0   :  { %7759 = vlog2.f32 %v5818_v55 }
0x32f1   :  { %v5842_v40 = vpop.xlane.xlu1 %5841 }
0x32f5   :  { %v5844_v30 = vpop.xlane.xlu1 %5843 }
0x32f8   :  { %v7758_v15 = vpop.eup %7757 }
0x32f9   :  { %v5820_v42 = vmul.f32 0.6931472, %v7758_v15 }
0x32fa   :  { %v7760_v27 = vpop.eup %7759 }
0x32fb   :  { %v5822_v60 = vmul.f32 0.6931472, %v7760_v27  ;;  %v5823_v56 = vadd.f32 %v5820_v42, %v5806_v62 }
0x32fd   :  { %v5851_v35 = vsub.f32 %v5823_v56, %v5842_v40  ;;  %v5824_v44 = vadd.f32 %v5822_v60, %v5808_v13 }
0x32ff   :  { %v5853_v47 = vmul.f32 %v6179_v43, %v5851_v35  ;;  %v5852_v48 = vsub.f32 %v5824_v44, %v5844_v30 }
0x3301   :  { %v5854_v1 = vmul.f32 %v6180_v36, %v5852_v48  ;;  %v5856_v51 = vsel %vm5855_vm9, %v5853_v47, 0.0 }
0x3303   :  { %v5857_v25 = vsel %vm5855_vm9, %v5854_v1, 0.0 }
0x3304   :  { %v5858_v23 = vadd.f32 %v5857_v25, %v5856_v51 }
0x3306   :  { %5859 = vadd.xlane.f32.xlu1 %v5858_v23 }
0x330a   :  { %5872 = vadd.xlane.f32.xlu1 %v5871_v46 }
0x330b   :  { %7791 = shalt.err (!%p7788_p4)
}
0x330c   :  { %s7792_s1 = scalar_lea.hbm %s9278_s3, 256 }
0x330d   :  { %p7793_p5 = scmp.ne.s32.totalorder %s9278_s3, %s7792_s1  ;;  %p7796_p6 = scmp.lt.u32.totalorder %s7792_s1, %s9278_s3 }
0x330f   :  { %p7798_p7 = pnand %p7796_p6, %p7793_p5 }
0x3311   :  { %7801 = shalt.err (!%p7798_p7)
}
0x3312   :  { %s7836_s11 = smov 128   ;;  %s7837_s27 = smov 8   ;;  %vm5885_vm10 = vcmask 0  }
0x3313   :  { %5898 = dma.vmem_to_hbm [thread:$0]  %s5893_s29, 256, %s9278_s3, [#allocation3], %s7836_s11, %s7836_s11, %s7837_s27  }
0x3314   :  { %s7838_s3 = smov [#allocation4]  }
0x3315   :  { %s5905_s16 = sshll.u32 %s7838_s3, 4  ;;  %s5906_s16 = int_to_ptr.vmem [resolvable:$true] %s5905_s16 }
0x3316   :  { %s7802_s17 = scalar_lea.vmem %s5906_s16, 16  ;;  %s7806_s18 = scalar_lea.vmem %s5906_s16, 32 }
0x3317   :  { %p7803_p8 = scmp.ne.s32.totalorder %s5906_s16, %s7802_s17  ;;  %p7807_p9 = scmp.lt.s32.totalorder %s5906_s16, %s5906_s16 }
0x3318   :  { %p7808_p10 = scmp.lt.s32.totalorder %s7806_s18, %s7802_s17 }
0x331a   :  { %p7809_p11 = por %p7808_p10, %p7807_p9 }
0x331c   :  { %p7810_p12 = pnand %p7809_p11, %p7803_p8 }
0x3393   :  { %v5860_v7 = vpop.xlane.xlu1 %5859 }
0x3394   :  { %v5861_v5 = vrot.slane %v5860_v7, 4 }
0x3396   :  { %v5862_v58 = vadd.f32 %v5861_v5, %v5860_v7 }
0x3397   :  { %v5873_v63 = vpop.xlane.xlu1 %5872 }
0x3398   :  { %v5863_v6 = vrot.slane %v5862_v58, 2  ;;  %v5874_v52 = vrot.slane %v5873_v63, 4 }
0x339a   :  { %v5875_v10 = vadd.f32 %v5874_v52, %v5873_v63  ;;  %v5864_v4 = vadd.f32 %v5863_v6, %v5862_v58 }
0x339c   :  { %v5876_v59 = vrot.slane %v5875_v10, 2  ;;  %v5865_v37 = vrot.slane %v5864_v4, 1 }
0x339e   :  { %v5877_v41 = vadd.f32 %v5876_v59, %v5875_v10  ;;  %v5866_v61 = vadd.f32 %v5865_v37, %v5864_v4 }
0x33a0   :  { %7527 = vpush %v5866_v61  ;;  %v5878_v49 = vrot.slane %v5877_v41, 1 }
0x33a2   :  { %v5879_v14 = vadd.f32 %v5878_v49, %v5877_v41 }
0x33a4   :  { %7529 = vpush %v5879_v14 }
0x33d1   :  { %s7528_s14 = spop %7527 }
0x33d2   :  { %v5868_v57 = vstv %s7528_s14 }
0x33d5   :  { %s7530_s15 = spop %7529 }
0x33d6   :  { %v5881_v20 = vstv %s7530_s15 }
0x33d7   :  { %v5882_v24 = vmax.f32 %v5881_v20, 1.0 }
0x33d9   :  { %7761 = vrcp.f32 %v5882_v24 }
0x33e3   :  { %v7762_v45 = vpop.eup %7761 }
0x33e4   :  { %v5884_v8 = vmul.f32 %v7762_v45, %v5868_v57 }
0x33e6   :  { %5886 = vst.msk [vmem:[#allocation4] sm:$0x1] %vm5885_vm10, %v5884_v8 }
0x33e7   :  { %7813 = shalt.err (!%p7810_p12)
}
0x33e8   :  { %s7814_s20 = scalar_lea.hbm %s9279_s4, 16 }
0x33e9   :  { %p7815_p13 = scmp.ne.s32.totalorder %s9279_s4, %s7814_s20  ;;  %p7818_p0 = scmp.lt.u32.totalorder %s7814_s20, %s9279_s4 }
0x33eb   :  { %p7820_p1 = pnand %p7818_p0, %p7815_p13 }
0x33ed   :  { %7823 = shalt.err (!%p7820_p1)
}
0x33ee   :  { %5908 = dma.vmem_to_hbm [thread:$0]  %s5906_s16, 16, %s9279_s4, [#allocation5]  }
0x33ef   :  { %7824 = dma.done.wait [#allocation3], 256  }
0x33f0   :  { %7825 = vsyncadd [#allocation3], 4294967040 }
0x33f1   :  { %7826 = dma.done.wait [#allocation5], 16  }
0x33f2   :  { %7827 = vsyncadd [#allocation5], 4294967280 }
0x33f3   :  { %5915 = vsyncpa [#allocation3], 1 }
0x33f4   :  { %5916 = vsyncpa [#allocation5], 1 }

</bundles_post_ra>
